<compile_context>
chip_gen: v7x
topology: tpu7x:2x2x1
jax: 0.10.0
libtpu: 0.0.40
codegen_flags: <defaults>
</compile_context>

<pallas_src>
import functools

import jax
import jax.numpy as jnp
from jax import lax
from jax.experimental import pallas as pl
from jax.experimental.pallas import tpu as pltpu


# --------------------------------------------------------------------------- #
# One-time weight preparation (plain XLA; run once and cache per param set).
# --------------------------------------------------------------------------- #
def _conv3x3_same_to_dense(w, H, W):
    """Dense matrix of a 3x3 / stride-1 / pad-1 conv (pure weight preparation).

    w: (O, I, 3, 3) OIHW. Returns M of shape (H*W*I, H*W*O) such that
        out[q*O + o] = sum_row in[row] * M[row, q*O + o]
    with in[q'*I + i] = x[i, h', w'] and q = h*W + w (row-major spatial).
    """
    hp = lax.Precision.HIGHEST
    dy = jnp.arange(3)[:, None, None]
    hi = jnp.arange(H)[None, :, None]
    ho = jnp.arange(H)[None, None, :]
    Sy = (hi == ho + dy - 1).astype(w.dtype)            # (3, H, H) shift indicators
    dx = jnp.arange(3)[:, None, None]
    wi = jnp.arange(W)[None, :, None]
    wo = jnp.arange(W)[None, None, :]
    Sx = (wi == wo + dx - 1).astype(w.dtype)            # (3, W, W)
    M = jnp.einsum("yab,xcd,oiyx->acibdo", Sy, Sx, w, precision=hp)
    return M.reshape(H * W * w.shape[1], H * W * w.shape[0])


def prepare_params(params, vec_feature_dim, part_height, *, block_k=None):
    """Turn PyTorch-layout weights into the kernel's streaming-friendly form.

    Call ONCE per parameter set and reuse the result for every forward call;
    all HBM-heavy transposes / casts / quantization happen here, not per call.
    """
    H, W = part_height, 8
    HW = H * W
    C0, Cin = params["conv0_w"].shape[0], params["conv0_w"].shape[1]
    C1 = params["conv1_w"].shape[0]
    vec = vec_feature_dim
    Kflat = HW * C1
    n1 = params["lin1_w"].shape[0]
    n2 = params["lin2_w"].shape[0]
    n3 = params["lin3_w"].shape[0]
    assert params["lin1_w"].shape[1] == vec + Kflat

    if block_k is None:
        half = Kflat // 2
        block_k = half if (Kflat % 2 == 0 and half % 128 == 0) else Kflat
    # block_k is both the sublane extent of the streamed weight block and the
    # lane-axis slice width into the cached activations -> keep it 128-aligned.
    assert Kflat % block_k == 0 and block_k % 128 == 0, (Kflat, block_k)

    f32, bf16 = jnp.float32, jnp.bfloat16

    # Dense conv matrices (exact). conv0's rows are permuted from NHWC-flat
    # (q*Cin + i) to NCHW-flat (i*HW + q) so the kernel consumes y2.reshape(B,-1)
    # directly with no per-call transpose.
    w0d = _conv3x3_same_to_dense(params["conv0_w"], H, W)          # (HW*Cin, HW*C0)
    w0d = (w0d.reshape(HW, Cin, HW * C0).transpose(1, 0, 2)
              .reshape(Cin * HW, HW * C0).astype(bf16))
    b0r = jnp.tile(params["conv0_b"], HW).reshape(1, HW * C0).astype(f32)
    w1d = _conv3x3_same_to_dense(params["conv1_w"], H, W).astype(bf16)  # (HW*C0, HW*C1)
    b1r = jnp.tile(params["conv1_b"], HW).reshape(1, HW * C1).astype(f32)

    dense_conv_bytes = 2 * (w0d.size + w1d.size)
    assert dense_conv_bytes <= 8 * 1024 * 1024, (
        "dense conv matrices too large for this formulation; see TODO(synk)")

    W1 = params["lin1_w"]                                 # (n1, vec + C1*HW)
    w1a = jnp.transpose(W1[:, :vec]).astype(bf16)         # (vec, n1)
    # PyTorch NCHW flatten order (row c*HW + q) -> kernel order (row q*C1 + c).
    w1p = (jnp.transpose(W1[:, vec:])                     # (C1*HW, n1)
           .reshape(C1, HW, n1).transpose(1, 0, 2).reshape(Kflat, n1)
           .astype(f32))
    # Per-output-column symmetric int8 quantization of the dominant weight.
    s1p = jnp.max(jnp.abs(w1p), axis=0, keepdims=True) / 127.0      # (1, n1) f32
    s1p = jnp.where(s1p == 0.0, jnp.ones_like(s1p), s1p)
    w1p_q = jnp.clip(jnp.round(w1p / s1p), -127.0, 127.0).astype(jnp.int8)

    bl1 = params["lin1_b"].reshape(1, n1).astype(f32)
    w2 = jnp.transpose(params["lin2_w"]).astype(bf16)     # (n1, n2)
    bl2 = params["lin2_b"].reshape(1, n2).astype(f32)
    w3 = jnp.transpose(params["lin3_w"]).astype(f32)      # (n2, n3) -- tiny, keep f32
    bl3 = params["lin3_b"].reshape(1, n3).astype(f32)

    return {
        "w0d": w0d, "b0r": b0r, "w1d": w1d, "b1r": b1r,
        "w1a": w1a, "w1p_q": w1p_q, "s1p": s1p, "bl1": bl1,
        "w2": w2, "bl2": bl2, "w3": w3, "bl3": bl3,
        # static metadata (python ints) used for grid / BlockSpec construction
        "meta": dict(H=H, W=W, Cin=Cin, C0=C0, C1=C1, vec=vec, Kflat=Kflat,
                     n1=n1, n2=n2, n3=n3, block_k=block_k),
    }


# --------------------------------------------------------------------------- #
# Kernel
# --------------------------------------------------------------------------- #
def _part_disc_kernel(y1_ref, y2f_ref, w0_ref, b0_ref, w1_ref, b1_ref,
                      w1a_ref, w1p_ref, s1p_ref, bl1_ref, w2_ref, bl2_ref,
                      w3_ref, bl3_ref, out_ref, a1_ref, z_ref, *, block_k):
    bf16, f32 = jnp.bfloat16, jnp.float32
    k = pl.program_id(0)

    # --- step 0: conv0 -> relu -> conv1 -> relu (two dense MXU matmuls), plus
    #             linear1's y1 contribution + bias; both cached in VMEM scratch.
    @pl.when(k == 0)
    def _init():
        a0 = jnp.dot(y2f_ref[...].astype(bf16), w0_ref[...],
                     preferred_element_type=f32) + b0_ref[...]
        a0 = jnp.maximum(a0, 0.0).astype(bf16)                      # (B, H*W*C0)
        a1 = jnp.dot(a0, w1_ref[...], preferred_element_type=f32) + b1_ref[...]
        a1_ref[...] = jnp.maximum(a1, 0.0).astype(bf16)             # (B, H*W*C1)
        z_ref[...] = jnp.dot(y1_ref[...].astype(bf16), w1a_ref[...],
                             preferred_element_type=f32) + bl1_ref[...]

    # --- every step: accumulate one K-block of linear1's image-part matmul.
    #     The weight block is streamed as int8 (half the HBM bytes), widened to
    #     bf16 for the MXU, and its per-column scale is applied to the (B, n1)
    #     f32 partial result (scale commutes with the matmul).
    off = pl.multiple_of(k * block_k, block_k)
    a1_blk = a1_ref[:, pl.ds(off, block_k)]                         # (B, block_k) bf16
    wq = w1p_ref[...].astype(bf16)                                  # int8 -> bf16
    z_ref[...] += jnp.dot(a1_blk, wq,
                          preferred_element_type=f32) * s1p_ref[...]

    # --- last step: batched MLP head + single output store. ------------------
    @pl.when(k == pl.num_programs(0) - 1)
    def _finish():
        h1 = jnp.maximum(z_ref[...], 0.0).astype(bf16)              # (B, 1024)
        h2 = jnp.dot(h1, w2_ref[...], preferred_element_type=f32) + bl2_ref[...]
        h2 = jnp.maximum(h2, 0.0)                                   # (B, 256) f32
        out_ref[...] = jnp.dot(h2, w3_ref[...],
                               preferred_element_type=f32) + bl3_ref[...]


# --------------------------------------------------------------------------- #
# Per-call forward (no weight-side work; only the input reshape + pallas_call)
# --------------------------------------------------------------------------- #
def part_discriminator_forward(y1, y2, prepped):
    """y1: (B, vec) f32; y2: (B, Cin, H, 8) f32 NCHW; prepped from prepare_params."""
    m = prepped["meta"]
    B = y1.shape[0]
    assert y2.shape == (B, m["Cin"], m["H"], m["W"]), y2.shape
    f32, bf16 = jnp.float32, jnp.bfloat16

    # Contiguous NCHW flatten (row = c*H*W + q): free reshape, no transpose.
    y2f = y2.reshape(B, m["Cin"] * m["H"] * m["W"]).astype(f32)

    block_k, Kflat = m["block_k"], m["Kflat"]
    nk = Kflat // block_k
    n1, n3 = m["n1"], m["n3"]

    def _full(shape):
        nd = len(shape)
        return pl.BlockSpec(shape, lambda k: (0,) * nd)  # whole array, no re-DMA

    in_specs = [
        _full(y1.shape), _full(y2f.shape),
        _full(prepped["w0d"].shape), _full(prepped["b0r"].shape),
        _full(prepped["w1d"].shape), _full(prepped["b1r"].shape),
        _full(prepped["w1a"].shape),
        pl.BlockSpec((block_k, n1), lambda k: (k, 0)),   # int8 W1p streamed over grid
        _full(prepped["s1p"].shape),
        _full(prepped["bl1"].shape),
        _full(prepped["w2"].shape), _full(prepped["bl2"].shape),
        _full(prepped["w3"].shape), _full(prepped["bl3"].shape),
    ]

    kernel = functools.partial(_part_disc_kernel, block_k=block_k)
    return pl.pallas_call(
        kernel,
        out_shape=jax.ShapeDtypeStruct((B, n3), f32),
        grid_spec=pltpu.PrefetchScalarGridSpec(
            num_scalar_prefetch=0,
            grid=(nk,),
            in_specs=in_specs,
            out_specs=pl.BlockSpec((B, n3), lambda k: (0, 0)),
            scratch_shapes=[pltpu.VMEM((B, Kflat), bf16),   # cached conv1 activations
                            pltpu.VMEM((B, n1), f32)],      # linear1 accumulator
        ),
        compiler_params=pltpu.CompilerParams(
            dimension_semantics=("arbitrary",),              # reduction axis
            vmem_limit_bytes=24 * 1024 * 1024),               # safe on v7x's 64 MiB VMEM
    )(y1.astype(f32), y2f,
      prepped["w0d"], prepped["b0r"], prepped["w1d"], prepped["b1r"],
      prepped["w1a"], prepped["w1p_q"], prepped["s1p"], prepped["bl1"],
      prepped["w2"], prepped["bl2"], prepped["w3"], prepped["bl3"])


# --------------------------------------------------------------------------- #
# Pure-JAX reference (matches the PyTorch forward, f32 / HIGHEST precision)
# --------------------------------------------------------------------------- #
def part_discriminator_reference(y1, y2, params):
    dn = ("NCHW", "OIHW", "NCHW")
    hp = lax.Precision.HIGHEST
    h = lax.conv_general_dilated(y2, params["conv0_w"], (1, 1), "SAME",
                                 dimension_numbers=dn, precision=hp)
    h = jax.nn.relu(h + params["conv0_b"][None, :, None, None])
    h = lax.conv_general_dilated(h, params["conv1_w"], (1, 1), "SAME",
                                 dimension_numbers=dn, precision=hp)
    h = jax.nn.relu(h + params["conv1_b"][None, :, None, None])
    flat = h.reshape(h.shape[0], -1)                       # NCHW flatten
    x = jnp.concatenate([y1, flat], axis=1)
    x = jax.nn.relu(jnp.dot(x, params["lin1_w"].T, precision=hp) + params["lin1_b"])
    x = jax.nn.relu(jnp.dot(x, params["lin2_w"].T, precision=hp) + params["lin2_b"])
    return jnp.dot(x, params["lin3_w"].T, precision=hp) + params["lin3_b"]


def init_params(key, in_feature_dim, feature_dim, vec_feature_dim, part_height):
    """Deterministic synthetic init mimicking the module's _init_params."""
    C1 = 128
    flat_dim = part_height * 8 * C1
    k = jax.random.split(key, 5)
    f32 = jnp.float32
    return {
        # kaiming_normal_(mode='fan_out', relu): std = sqrt(2 / (out_ch * kH * kW))
        "conv0_w": jax.random.normal(k[0], (feature_dim, in_feature_dim, 3, 3), f32)
                   * jnp.sqrt(2.0 / (feature_dim * 9)),
        "conv0_b": jnp.zeros((feature_dim,), f32),
        "conv1_w": jax.random.normal(k[1], (C1, feature_dim, 3, 3), f32)
                   * jnp.sqrt(2.0 / (C1 * 9)),
        "conv1_b": jnp.zeros((C1,), f32),
        # Linear: normal(0, 0.01), zero bias
        "lin1_w": jax.random.normal(k[2], (1024, flat_dim + vec_feature_dim), f32) * 0.01,
        "lin1_b": jnp.zeros((1024,), f32),
        "lin2_w": jax.random.normal(k[3], (256, 1024), f32) * 0.01,
        "lin2_b": jnp.zeros((256,), f32),
        "lin3_w": jax.random.normal(k[4], (1, 256), f32) * 0.01,
        "lin3_b": jnp.zeros((1,), f32),
    }


if __name__ == "__main__":
    # Small shapes consistent with the module:
    #   in_feature_dim=4, feature_dim=8, vec_feature_dim=16, part_height=2
    #   y2 spatial must be (part_height, 8) so linear1's input dim matches.
    B, Cin, C0, vec, part_h = 2, 4, 8, 16, 2
    H, W = part_h, 8

    key = jax.random.PRNGKey(0)
    kp, ka, kb = jax.random.split(key, 3)
    params = init_params(kp, Cin, C0, vec, part_h)
    y1 = jax.random.normal(ka, (B, vec), jnp.float32)
    y2 = jax.random.normal(kb, (B, Cin, H, W), jnp.float32)

    # One-time weight preparation (cache this per parameter set).
    prepped = prepare_params(params, vec, part_h)
    jax.block_until_ready(prepped["w1p_q"])

    out = jax.block_until_ready(part_discriminator_forward(y1, y2, prepped))
    assert out.shape == (B, 1), out.shape

    ref = jax.block_until_ready(part_discriminator_reference(y1, y2, params))
    err = float(jnp.max(jnp.abs(out - ref)))
    tol = 1e-3 + 2e-2 * float(jnp.max(jnp.abs(ref)))   # relative + absolute (bf16/int8)
    assert err < tol, f"Pallas vs reference mismatch: max abs err = {err}, tol = {tol}"

    print("KERNEL_OK")
</pallas_src>

<mosaic_0001>
module attributes {stable_mosaic.version = 11 : i64} {
  func.func @_part_disc_kernel(%arg0: i32, %arg1: memref<2x16xf32, #tpu.memory_space<vmem>>, %arg2: memref<2x64xf32, #tpu.memory_space<vmem>>, %arg3: memref<64x128xbf16, #tpu.memory_space<vmem>>, %arg4: memref<1x128xf32, #tpu.memory_space<vmem>>, %arg5: memref<128x2048xbf16, #tpu.memory_space<vmem>>, %arg6: memref<1x2048xf32, #tpu.memory_space<vmem>>, %arg7: memref<16x1024xbf16, #tpu.memory_space<vmem>>, %arg8: memref<1024x1024xi8, #tpu.memory_space<vmem>>, %arg9: memref<1x1024xf32, #tpu.memory_space<vmem>>, %arg10: memref<1x1024xf32, #tpu.memory_space<vmem>>, %arg11: memref<1024x256xbf16, #tpu.memory_space<vmem>>, %arg12: memref<1x256xf32, #tpu.memory_space<vmem>>, %arg13: memref<256x1xf32, #tpu.memory_space<vmem>>, %arg14: memref<1x1xf32, #tpu.memory_space<vmem>>, %arg15: memref<2x1xf32, #tpu.memory_space<vmem>>, %arg16: memref<2x2048xbf16, #tpu.memory_space<vmem>>, %arg17: memref<2x1024xf32, #tpu.memory_space<vmem>>) attributes {dimension_semantics = [#tpu.dimension_semantics<arbitrary>], iteration_bounds = array<i64: 2>, scalar_prefetch = 0 : i64, scratch_operands = 2 : i64, tpu.core_type = #tpu.core_type<tc>, window_params = [{pipeline_mode = #tpu.pipeline_mode<synchronous>, transform_indices = @transform_0, window_bounds = array<i64: 2, 16>}, {pipeline_mode = #tpu.pipeline_mode<synchronous>, transform_indices = @transform_1, window_bounds = array<i64: 2, 64>}, {pipeline_mode = #tpu.pipeline_mode<synchronous>, transform_indices = @transform_2, window_bounds = array<i64: 64, 128>}, {pipeline_mode = #tpu.pipeline_mode<synchronous>, transform_indices = @transform_3, window_bounds = array<i64: 1, 128>}, {pipeline_mode = #tpu.pipeline_mode<synchronous>, transform_indices = @transform_4, window_bounds = array<i64: 128, 2048>}, {pipeline_mode = #tpu.pipeline_mode<synchronous>, transform_indices = @transform_5, window_bounds = array<i64: 1, 2048>}, {pipeline_mode = #tpu.pipeline_mode<synchronous>, transform_indices = @transform_6, window_bounds = array<i64: 16, 1024>}, {transform_indices = @transform_7, window_bounds = array<i64: 1024, 1024>}, {pipeline_mode = #tpu.pipeline_mode<synchronous>, transform_indices = @transform_8, window_bounds = array<i64: 1, 1024>}, {pipeline_mode = #tpu.pipeline_mode<synchronous>, transform_indices = @transform_9, window_bounds = array<i64: 1, 1024>}, {pipeline_mode = #tpu.pipeline_mode<synchronous>, transform_indices = @transform_10, window_bounds = array<i64: 1024, 256>}, {pipeline_mode = #tpu.pipeline_mode<synchronous>, transform_indices = @transform_11, window_bounds = array<i64: 1, 256>}, {pipeline_mode = #tpu.pipeline_mode<synchronous>, transform_indices = @transform_12, window_bounds = array<i64: 256, 1>}, {pipeline_mode = #tpu.pipeline_mode<synchronous>, transform_indices = @transform_13, window_bounds = array<i64: 1, 1>}, {pipeline_mode = #tpu.pipeline_mode<synchronous>, transform_indices = @transform_14, window_bounds = array<i64: 2, 1>}]} {
    %c0_i32 = arith.constant 0 : i32
    %0 = arith.cmpi eq, %arg0, %c0_i32 : i32
    %1 = arith.extui %0 : i1 to i32
    %c0_i32_0 = arith.constant 0 : i32
    %2 = arith.cmpi ne, %1, %c0_i32_0 : i32
    scf.if %2 {
      %c0_10 = arith.constant 0 : index
      %c0_11 = arith.constant 0 : index
      %19 = vector.load %arg2[%c0_10, %c0_11] : memref<2x64xf32, #tpu.memory_space<vmem>>, vector<2x64xf32>
      %20 = arith.truncf %19 : vector<2x64xf32> to vector<2x64xbf16>
      %c0_12 = arith.constant 0 : index
      %c0_13 = arith.constant 0 : index
      %21 = vector.load %arg3[%c0_12, %c0_13] : memref<64x128xbf16, #tpu.memory_space<vmem>>, vector<64x128xbf16>
      %cst_14 = arith.constant dense<0.000000e+00> : vector<2x128xf32>
      %22 = tpu.matmul %20, %21, %cst_14 {dimension_numbers = #tpu.dot_dimension_numbers<[1], [0], [0], [1], [0, 0, 1, 1], [], []>} : vector<2x64xbf16>, vector<64x128xbf16>, vector<2x128xf32> -> vector<2x128xf32>
      %c0_15 = arith.constant 0 : index
      %c0_16 = arith.constant 0 : index
      %23 = vector.load %arg4[%c0_15, %c0_16] : memref<1x128xf32, #tpu.memory_space<vmem>>, vector<1x128xf32>
      %24 = vector.broadcast %23 : vector<1x128xf32> to vector<2x128xf32>
      %25 = arith.addf %22, %24 : vector<2x128xf32>
      %cst_17 = arith.constant 0.000000e+00 : f32
      %26 = vector.broadcast %cst_17 : f32 to vector<2x128xf32>
      %27 = arith.maximumf %25, %26 : vector<2x128xf32>
      %28 = arith.truncf %27 : vector<2x128xf32> to vector<2x128xbf16>
      %c0_18 = arith.constant 0 : index
      %c0_19 = arith.constant 0 : index
      %29 = vector.load %arg5[%c0_18, %c0_19] : memref<128x2048xbf16, #tpu.memory_space<vmem>>, vector<128x2048xbf16>
      %cst_20 = arith.constant dense<0.000000e+00> : vector<2x2048xf32>
      %30 = tpu.matmul %28, %29, %cst_20 {dimension_numbers = #tpu.dot_dimension_numbers<[1], [0], [0], [1], [0, 0, 1, 1], [], []>} : vector<2x128xbf16>, vector<128x2048xbf16>, vector<2x2048xf32> -> vector<2x2048xf32>
      %c0_21 = arith.constant 0 : index
      %c0_22 = arith.constant 0 : index
      %31 = vector.load %arg6[%c0_21, %c0_22] : memref<1x2048xf32, #tpu.memory_space<vmem>>, vector<1x2048xf32>
      %32 = vector.broadcast %31 : vector<1x2048xf32> to vector<2x2048xf32>
      %33 = arith.addf %30, %32 : vector<2x2048xf32>
      %cst_23 = arith.constant 0.000000e+00 : f32
      %34 = vector.broadcast %cst_23 : f32 to vector<2x2048xf32>
      %35 = arith.maximumf %33, %34 : vector<2x2048xf32>
      %36 = arith.truncf %35 : vector<2x2048xf32> to vector<2x2048xbf16>
      %c0_24 = arith.constant 0 : index
      %c0_25 = arith.constant 0 : index
      %37 = vector.load %arg16[%c0_24, %c0_25] : memref<2x2048xbf16, #tpu.memory_space<vmem>>, vector<2x2048xbf16>
      tpu.vector_store %arg16[%c0_24, %c0_25], %36 {strides = array<i32>} : memref<2x2048xbf16, #tpu.memory_space<vmem>>, vector<2x2048xbf16>,
      %c0_26 = arith.constant 0 : index
      %c0_27 = arith.constant 0 : index
      %38 = vector.load %arg1[%c0_26, %c0_27] : memref<2x16xf32, #tpu.memory_space<vmem>>, vector<2x16xf32>
      %39 = arith.truncf %38 : vector<2x16xf32> to vector<2x16xbf16>
      %c0_28 = arith.constant 0 : index
      %c0_29 = arith.constant 0 : index
      %40 = vector.load %arg7[%c0_28, %c0_29] : memref<16x1024xbf16, #tpu.memory_space<vmem>>, vector<16x1024xbf16>
      %cst_30 = arith.constant dense<0.000000e+00> : vector<2x1024xf32>
      %41 = tpu.matmul %39, %40, %cst_30 {dimension_numbers = #tpu.dot_dimension_numbers<[1], [0], [0], [1], [0, 0, 1, 1], [], []>} : vector<2x16xbf16>, vector<16x1024xbf16>, vector<2x1024xf32> -> vector<2x1024xf32>
      %c0_31 = arith.constant 0 : index
      %c0_32 = arith.constant 0 : index
      %42 = vector.load %arg10[%c0_31, %c0_32] : memref<1x1024xf32, #tpu.memory_space<vmem>>, vector<1x1024xf32>
      %43 = vector.broadcast %42 : vector<1x1024xf32> to vector<2x1024xf32>
      %44 = arith.addf %41, %43 : vector<2x1024xf32>
      %c0_33 = arith.constant 0 : index
      %c0_34 = arith.constant 0 : index
      %45 = vector.load %arg17[%c0_33, %c0_34] : memref<2x1024xf32, #tpu.memory_space<vmem>>, vector<2x1024xf32>
      tpu.vector_store %arg17[%c0_33, %c0_34], %44 {strides = array<i32>} : memref<2x1024xf32, #tpu.memory_space<vmem>>, vector<2x1024xf32>,
    } else {
    }
    %c1024_i32 = arith.constant 1024 : i32
    %3 = arith.muli %arg0, %c1024_i32 : i32
    %4 = tpu.assume_multiple %3, 1024 : i32
    %c0 = arith.constant 0 : index
    %5 = arith.index_cast %4 : i32 to index
    %6 = vector.load %arg16[%c0, %5] : memref<2x2048xbf16, #tpu.memory_space<vmem>>, vector<2x1024xbf16>
    %c0_1 = arith.constant 0 : index
    %c0_2 = arith.constant 0 : index
    %7 = vector.load %arg8[%c0_1, %c0_2] : memref<1024x1024xi8, #tpu.memory_space<vmem>>, vector<1024x1024xi8>
    %8 = arith.sitofp %7 : vector<1024x1024xi8> to vector<1024x1024xbf16>
    %c0_3 = arith.constant 0 : index
    %c0_4 = arith.constant 0 : index
    %9 = vector.load %arg17[%c0_3, %c0_4] : memref<2x1024xf32, #tpu.memory_space<vmem>>, vector<2x1024xf32>
    %cst = arith.constant dense<0.000000e+00> : vector<2x1024xf32>
    %10 = tpu.matmul %6, %8, %cst {dimension_numbers = #tpu.dot_dimension_numbers<[1], [0], [0], [1], [0, 0, 1, 1], [], []>} : vector<2x1024xbf16>, vector<1024x1024xbf16>, vector<2x1024xf32> -> vector<2x1024xf32>
    %c0_5 = arith.constant 0 : index
    %c0_6 = arith.constant 0 : index
    %11 = vector.load %arg9[%c0_5, %c0_6] : memref<1x1024xf32, #tpu.memory_space<vmem>>, vector<1x1024xf32>
    %12 = vector.broadcast %11 : vector<1x1024xf32> to vector<2x1024xf32>
    %13 = arith.mulf %10, %12 : vector<2x1024xf32>
    %14 = arith.addf %9, %13 : vector<2x1024xf32>
    %c0_7 = arith.constant 0 : index
    %c0_8 = arith.constant 0 : index
    %15 = vector.load %arg17[%c0_7, %c0_8] : memref<2x1024xf32, #tpu.memory_space<vmem>>, vector<2x1024xf32>
    tpu.vector_store %arg17[%c0_7, %c0_8], %14 {strides = array<i32>} : memref<2x1024xf32, #tpu.memory_space<vmem>>, vector<2x1024xf32>,
    %c1_i32 = arith.constant 1 : i32
    %16 = arith.cmpi eq, %arg0, %c1_i32 : i32
    %17 = arith.extui %16 : i1 to i32
    %c0_i32_9 = arith.constant 0 : i32
    %18 = arith.cmpi ne, %17, %c0_i32_9 : i32
    scf.if %18 {
      %c0_10 = arith.constant 0 : index
      %c0_11 = arith.constant 0 : index
      %19 = vector.load %arg17[%c0_10, %c0_11] : memref<2x1024xf32, #tpu.memory_space<vmem>>, vector<2x1024xf32>
      %cst_12 = arith.constant 0.000000e+00 : f32
      %20 = vector.broadcast %cst_12 : f32 to vector<2x1024xf32>
      %21 = arith.maximumf %19, %20 : vector<2x1024xf32>
      %22 = arith.truncf %21 : vector<2x1024xf32> to vector<2x1024xbf16>
      %c0_13 = arith.constant 0 : index
      %c0_14 = arith.constant 0 : index
      %23 = vector.load %arg11[%c0_13, %c0_14] : memref<1024x256xbf16, #tpu.memory_space<vmem>>, vector<1024x256xbf16>
      %cst_15 = arith.constant dense<0.000000e+00> : vector<2x256xf32>
      %24 = tpu.matmul %22, %23, %cst_15 {dimension_numbers = #tpu.dot_dimension_numbers<[1], [0], [0], [1], [0, 0, 1, 1], [], []>} : vector<2x1024xbf16>, vector<1024x256xbf16>, vector<2x256xf32> -> vector<2x256xf32>
      %c0_16 = arith.constant 0 : index
      %c0_17 = arith.constant 0 : index
      %25 = vector.load %arg12[%c0_16, %c0_17] : memref<1x256xf32, #tpu.memory_space<vmem>>, vector<1x256xf32>
      %26 = vector.broadcast %25 : vector<1x256xf32> to vector<2x256xf32>
      %27 = arith.addf %24, %26 : vector<2x256xf32>
      %cst_18 = arith.constant 0.000000e+00 : f32
      %28 = vector.broadcast %cst_18 : f32 to vector<2x256xf32>
      %29 = arith.maximumf %27, %28 : vector<2x256xf32>
      %c0_19 = arith.constant 0 : index
      %c0_20 = arith.constant 0 : index
      %30 = vector.load %arg13[%c0_19, %c0_20] : memref<256x1xf32, #tpu.memory_space<vmem>>, vector<256x1xf32>
      %cst_21 = arith.constant dense<0.000000e+00> : vector<2x1xf32>
      %31 = tpu.matmul %29, %30, %cst_21 {dimension_numbers = #tpu.dot_dimension_numbers<[1], [0], [0], [1], [0, 0, 1, 1], [], []>} : vector<2x256xf32>, vector<256x1xf32>, vector<2x1xf32> -> vector<2x1xf32>
      %c0_22 = arith.constant 0 : index
      %c0_23 = arith.constant 0 : index
      %32 = vector.load %arg14[%c0_22, %c0_23] : memref<1x1xf32, #tpu.memory_space<vmem>>, vector<1x1xf32>
      %33 = vector.broadcast %32 : vector<1x1xf32> to vector<2x1xf32>
      %34 = arith.addf %31, %33 : vector<2x1xf32>
      %c0_24 = arith.constant 0 : index
      %c0_25 = arith.constant 0 : index
      %35 = vector.load %arg15[%c0_24, %c0_25] : memref<2x1xf32, #tpu.memory_space<vmem>>, vector<2x1xf32>
      tpu.vector_store %arg15[%c0_24, %c0_25], %34 {strides = array<i32>} : memref<2x1xf32, #tpu.memory_space<vmem>>, vector<2x1xf32>,
    } else {
    }
    return
  }
  func.func @transform_0(%arg0: i32) -> (i32, i32) {
    %c0_i32 = arith.constant 0 : i32
    %c0_i32_0 = arith.constant 0 : i32
    %c0_i32_1 = arith.constant 0 : i32
    return %c0_i32, %c0_i32_0 : i32, i32
  }
  func.func @transform_1(%arg0: i32) -> (i32, i32) {
    %c0_i32 = arith.constant 0 : i32
    %c0_i32_0 = arith.constant 0 : i32
    %c0_i32_1 = arith.constant 0 : i32
    return %c0_i32, %c0_i32_0 : i32, i32
  }
  func.func @transform_2(%arg0: i32) -> (i32, i32) {
    %c0_i32 = arith.constant 0 : i32
    %c0_i32_0 = arith.constant 0 : i32
    %c0_i32_1 = arith.constant 0 : i32
    return %c0_i32, %c0_i32_0 : i32, i32
  }
  func.func @transform_3(%arg0: i32) -> (i32, i32) {
    %c0_i32 = arith.constant 0 : i32
    %c0_i32_0 = arith.constant 0 : i32
    %c0_i32_1 = arith.constant 0 : i32
    return %c0_i32, %c0_i32_0 : i32, i32
  }
  func.func @transform_4(%arg0: i32) -> (i32, i32) {
    %c0_i32 = arith.constant 0 : i32
    %c0_i32_0 = arith.constant 0 : i32
    %c0_i32_1 = arith.constant 0 : i32
    return %c0_i32, %c0_i32_0 : i32, i32
  }
  func.func @transform_5(%arg0: i32) -> (i32, i32) {
    %c0_i32 = arith.constant 0 : i32
    %c0_i32_0 = arith.constant 0 : i32
    %c0_i32_1 = arith.constant 0 : i32
    return %c0_i32, %c0_i32_0 : i32, i32
  }
  func.func @transform_6(%arg0: i32) -> (i32, i32) {
    %c0_i32 = arith.constant 0 : i32
    %c0_i32_0 = arith.constant 0 : i32
    %c0_i32_1 = arith.constant 0 : i32
    return %c0_i32, %c0_i32_0 : i32, i32
  }
  func.func @transform_7(%arg0: i32) -> (i32, i32) {
    %c0_i32 = arith.constant 0 : i32
    %c0_i32_0 = arith.constant 0 : i32
    return %arg0, %c0_i32 : i32, i32
  }
  func.func @transform_8(%arg0: i32) -> (i32, i32) {
    %c0_i32 = arith.constant 0 : i32
    %c0_i32_0 = arith.constant 0 : i32
    %c0_i32_1 = arith.constant 0 : i32
    return %c0_i32, %c0_i32_0 : i32, i32
  }
  func.func @transform_9(%arg0: i32) -> (i32, i32) {
    %c0_i32 = arith.constant 0 : i32
    %c0_i32_0 = arith.constant 0 : i32
    %c0_i32_1 = arith.constant 0 : i32
    return %c0_i32, %c0_i32_0 : i32, i32
  }
  func.func @transform_10(%arg0: i32) -> (i32, i32) {
    %c0_i32 = arith.constant 0 : i32
    %c0_i32_0 = arith.constant 0 : i32
    %c0_i32_1 = arith.constant 0 : i32
    return %c0_i32, %c0_i32_0 : i32, i32
  }
  func.func @transform_11(%arg0: i32) -> (i32, i32) {
    %c0_i32 = arith.constant 0 : i32
    %c0_i32_0 = arith.constant 0 : i32
    %c0_i32_1 = arith.constant 0 : i32
    return %c0_i32, %c0_i32_0 : i32, i32
  }
  func.func @transform_12(%arg0: i32) -> (i32, i32) {
    %c0_i32 = arith.constant 0 : i32
    %c0_i32_0 = arith.constant 0 : i32
    %c0_i32_1 = arith.constant 0 : i32
    return %c0_i32, %c0_i32_0 : i32, i32
  }
  func.func @transform_13(%arg0: i32) -> (i32, i32) {
    %c0_i32 = arith.constant 0 : i32
    %c0_i32_0 = arith.constant 0 : i32
    %c0_i32_1 = arith.constant 0 : i32
    return %c0_i32, %c0_i32_0 : i32, i32
  }
  func.func @transform_14(%arg0: i32) -> (i32, i32) {
    %c0_i32 = arith.constant 0 : i32
    %c0_i32_0 = arith.constant 0 : i32
    %c0_i32_1 = arith.constant 0 : i32
    return %c0_i32, %c0_i32_0 : i32, i32
  }
}

</mosaic_0001>

<bundles_post_ra>
// kernel: tpu_custom_call.1
= control target key start
LH: loop header
LB: loop body
LE: loop exit
PB: predicated region body
PF: predicated region fallthrough
CT: control target
= control target key end

     0   :  { %s7497_s0 = inlined_call_operand.hbm [shape: f32[2,16], index: 0, kind: input, shape index: {}]   ;;  %s7498_s1 = inlined_call_operand.hbm [shape: f32[2,64], index: 1, kind: input, shape index: {}]   ;;  %s7499_s2 = inlined_call_operand.hbm [shape: bf16[64,128], index: 2, kind: input, shape index: {}]   ;;  %s7500_s3 = inlined_call_operand.hbm [shape: f32[1,128], index: 3, kind: input, shape index: {}]   ;;  %s7501_s4 = inlined_call_operand.hbm [shape: bf16[128,2048], index: 4, kind: input, shape index: {}]   ;;  %s7502_s5 = inlined_call_operand.hbm [shape: f32[1,2048], index: 5, kind: input, shape index: {}]   ;;  %s7503_s6 = inlined_call_operand.hbm [shape: bf16[16,1024], index: 6, kind: input, shape index: {}]   ;;  %s7504_s7 = inlined_call_operand.hbm [shape: s8[2048,1024], index: 7, kind: input, shape index: {}]   ;;  %s7505_s8 = inlined_call_operand.hbm [shape: f32[1,1024], index: 8, kind: input, shape index: {}]   ;;  %s7506_s9 = inlined_call_operand.hbm [shape: f32[1,1024], index: 9, kind: input, shape index: {}]   ;;  %s7507_s10 = inlined_call_operand.hbm [shape: bf16[1024,256], index: 10, kind: input, shape index: {}]   ;;  %s7508_s11 = inlined_call_operand.hbm [shape: f32[1,256], index: 11, kind: input, shape index: {}]   ;;  %s7509_s12 = inlined_call_operand.vmem [shape: f32[256,1], index: 12, kind: input, shape index: {}]   ;;  %s7510_s13 = inlined_call_operand.<no memory space> [shape: f32[1,1], index: 13, kind: input, shape index: {}]   ;;  %s7511_s14 = inlined_call_operand.vmem [shape: f32[2,1], index: 14, kind: output, shape index: {}]  }
   0x1   :  { %7519 = sst [smem:[#allocation33_spill]] %s7497_s0  ;;  %v19_v0 = vstv %s7510_s13 }
   0x2   :  { %7520 = sst [smem:[#allocation34_spill]] %s7504_s7  ;;  %20 = vst [vmem:[#allocation4] sm:$0x1] %v19_v0 }
   0x3   :  { %7521 = sst [smem:[#allocation35_spill]] %s7509_s12 }
   0x4   :  { %7522 = sst [smem:[#allocation36_spill]] %s7511_s14 }
   0x5   :  { %21 = vsyncpa [#allocation6], 0 }
   0x6   :  { %22 = vsyncpa [#allocation8], 0 }
   0x7   :  { %23 = vsyncpa [#allocation11], 0 }
   0x8   :  { %24 = vsyncpa [#allocation14], 0 }
   0x9   :  { %25 = vsyncpa [#allocation17], 0 }
   0xa   :  { %27 = vsyncpa [#allocation17 + $0x1], 0 }
   0xb   :  { %28 = vsyncpa [#allocation20], 0 }
   0xc   :  { %29 = vsyncpa [#allocation23], 0  ;;  %s6534_s15 = smov 0   ;;  %s6536_s16 = smov 0  }
   0xd   :  { %s6538_s17 = smov 0   ;;  %s6540_s18 = smov 0  }
   0xe LB: > { %s6430_s13 = smov [#allocation7]   ;;  %s6555_s20 = sadd.s32 4294967295, %s6428_s18   ;;  %s6428_s18 = sphi %s6540_s18, %s7556_s18   ;;  %s6424_s17 = sphi %s6538_s17, %s7555_s17   ;;  %s6420_s16 = sphi %s6536_s16, %s7554_s16   ;;  %s6416_s15 = sphi %s6534_s15, %s7553_s15  }
   0xf   : > { %s384_s19 = sshll.u32 %s6430_s13, 4  ;;  %p5203_p0 = scmp.ge.s32.totalorder %s6428_s18, 1  ;;  %s6561_s19 = int_to_ptr.vmem [resolvable:$true] %s384_s19 }
  0x10   : > { %p7515_p1 = scmp.eq.s32.totalorder %s6555_s20, 0  ;;  %p360_p2 = scmp.lt.s32.totalorder %s6428_s18, 3 }
  0x11   : > { %s6431_s22 = smov [#allocation10]   ;;  %s6432_s24 = smov [#allocation13]  }
  0x12   : > { %p6563_p4 = pnand %p5203_p0, %p360_p2  ;;  %s408_s23 = sshll.u32 %s6431_s22, 4  ;;  %s6569_s23 = int_to_ptr.vmem [resolvable:$true] %s408_s23 }
  0x13   : > { %s432_s25 = sshll.u32 %s6432_s24, 4  ;;  %s6433_s27 = smov [#allocation18]   ;;  %s6577_s25 = int_to_ptr.vmem [resolvable:$true] %s432_s25 }
  0x14   : > { %s7523_s21 = scalar_select %p6563_p4, 1, 0 }
  0x15   : > { %p5713_p5 = pneg %p6563_p4  ;;  %s6579_s28 = sshll.u32 %s6433_s27, 4  ;;  %s457_s28 = int_to_ptr.vmem [resolvable:$true] %s6579_s28 }
  0x16   : > { %7524 = sst [smem:[#allocation32_spill]] %s7523_s21  ;;  %s6028_s13 = scalar_lea.hbm %s7498_s1, 32 }
  0x17   : > { %p6573_p6 = pnand %p5713_p5, %p7515_p1  ;;  %p6029_p7 = scmp.ne.s32.totalorder %s7498_s1, %s6028_s13 }
  0x18   : > { %p6035_p11 = scmp.lt.u32.totalorder %s6028_s13, %s7498_s1 }
  0x19   : > { %p6589_p8 = pneg %p6573_p6 }
  0x1b   : > { %p6031_p9 = pnand %p6589_p8, %p6029_p7 }
  0x1d   : > { %p6032_p10 = pneg %p6031_p9 }
  0x1f   : > { %p6037_p12 = pnand %p6035_p11, %p6032_p10 }
  0x21   : > { %6040 = shalt.err (!%p6037_p12)
}
  0x22   : > { %s6041_s14 = scalar_lea.vmem %s6561_s19, 32  ;;  %p6049_p5 = scmp.lt.s32.totalorder %s6561_s19, %s6561_s19 }
  0x23   : > { %p6042_p13 = scmp.ne.s32.totalorder %s6561_s19, %s6041_s14  ;;  %p6050_p3 = scmp.lt.s32.totalorder %s6041_s14, %s6041_s14 }
  0x25   : > { %p6044_p0 = pnand %p6042_p13, %p6589_p8  ;;  %p6051_p7 = por %p6050_p3, %p6049_p5 }
  0x27   : > { %p6045_p2 = pneg %p6044_p0 }
  0x29   : > { %p6052_p9 = pnand %p6051_p7, %p6045_p2 }
  0x2b   : > { %6055 = shalt.err (!%p6052_p9)
}
  0x2c   : > { %5719 = dma.hbm_to_vmem [thread:$0]  (!%p6573_p6), %s7498_s1, 32, %s6561_s19, [#allocation8]  }
  0x2d   : > { %s6056_s22 = scalar_lea.hbm %s7500_s3, 16 }
  0x2e   : > { %p6057_p10 = scmp.ne.s32.totalorder %s7500_s3, %s6056_s22  ;;  %p6063_p12 = scmp.lt.u32.totalorder %s6056_s22, %s7500_s3 }
  0x30   : > { %p6059_p3 = pnand %p6057_p10, %p6589_p8 }
  0x32   : > { %p6060_p11 = pneg %p6059_p3 }
  0x34   : > { %p6065_p13 = pnand %p6063_p12, %p6060_p11 }
  0x36   : > { %6068 = shalt.err (!%p6065_p13)
}
  0x37   : > { %s6069_s19 = scalar_lea.vmem %s6569_s23, 16  ;;  %s6076_s21 = scalar_lea.vmem %s6569_s23, 32 }
  0x38   : > { %p6070_p0 = scmp.ne.s32.totalorder %s6569_s23, %s6069_s19  ;;  %p6077_p7 = scmp.lt.s32.totalorder %s6569_s23, %s6569_s23 }
  0x39   : > { %p6078_p9 = scmp.lt.s32.totalorder %s6076_s21, %s6069_s19 }
  0x3a   : > { %p6072_p2 = pnand %p6070_p0, %p6589_p8 }
  0x3b   : > { %p6079_p10 = por %p6078_p9, %p6077_p7 }
  0x3c   : > { %p6073_p5 = pneg %p6072_p2 }
  0x3e   : > { %p6080_p3 = pnand %p6079_p10, %p6073_p5 }
  0x40   : > { %6083 = shalt.err (!%p6080_p3)
}
  0x41   : > { %5725 = dma.hbm_to_vmem [thread:$0]  (!%p6573_p6), %s7500_s3, 16, %s6569_s23, [#allocation11]  }
  0x42   : > { %s6084_s13 = scalar_lea.hbm %s7502_s5, 256 }
  0x43   : > { %p6085_p11 = scmp.ne.s32.totalorder %s7502_s5, %s6084_s13  ;;  %p6091_p0 = scmp.lt.u32.totalorder %s6084_s13, %s7502_s5 }
  0x45   : > { %p6087_p12 = pnand %p6085_p11, %p6589_p8 }
  0x47   : > { %p6088_p13 = pneg %p6087_p12 }
  0x49   : > { %p6093_p2 = pnand %p6091_p0, %p6088_p13 }
  0x4b   : > { %6096 = shalt.err (!%p6093_p2)
}
  0x4c   : > { %s6097_s23 = scalar_lea.vmem %s6577_s25, 256  ;;  %p6105_p10 = scmp.lt.s32.totalorder %s6577_s25, %s6577_s25 }
  0x4d   : > { %p6098_p5 = scmp.ne.s32.totalorder %s6577_s25, %s6097_s23  ;;  %p6106_p3 = scmp.lt.s32.totalorder %s6097_s23, %s6097_s23 }
  0x4f   : > { %p6100_p7 = pnand %p6098_p5, %p6589_p8  ;;  %p6107_p11 = por %p6106_p3, %p6105_p10 }
  0x51   : > { %p6101_p9 = pneg %p6100_p7 }
  0x53   : > { %p6108_p12 = pnand %p6107_p11, %p6101_p9 }
  0x55   : > { %6111 = shalt.err (!%p6108_p12)
}
  0x56   : > { %5731 = dma.hbm_to_vmem [thread:$0]  (!%p6573_p6), %s7502_s5, 256, %s6577_s25, [#allocation14]  }
  0x57   : > { %s6434_s12 = smov [#allocation19]   ;;  %s6112_s22 = scalar_lea.hbm %s7505_s8, 128 }
  0x58   : > { %s467_s29 = sshll.u32 %s6434_s12, 4  ;;  %p6113_p13 = scmp.ne.s32.totalorder %s7505_s8, %s6112_s22  ;;  %s468_s29 = int_to_ptr.vmem [resolvable:$true] %s467_s29 }
  0x59   : > { %p6119_p5 = scmp.lt.u32.totalorder %s6112_s22, %s7505_s8 }
  0x5a   : > { %p6115_p0 = pnand %p6113_p13, %p6589_p8 }
  0x5c   : > { %p6116_p2 = pneg %p6115_p0 }
  0x5e   : > { %p6121_p7 = pnand %p6119_p5, %p6116_p2 }
  0x60   : > { %6124 = shalt.err (!%p6121_p7)
}
  0x61   : > { %s6125_s25 = scalar_lea.vmem %s457_s28, 128  ;;  %p6133_p11 = scmp.lt.s32.totalorder %s457_s28, %s457_s28 }
  0x62   : > { %p6126_p9 = scmp.ne.s32.totalorder %s457_s28, %s6125_s25  ;;  %p6134_p12 = scmp.lt.s32.totalorder %s6125_s25, %s6125_s25 }
  0x64   : > { %p6128_p10 = pnand %p6126_p9, %p6589_p8  ;;  %p6135_p1 = por %p6134_p12, %p6133_p11 }
  0x66   : > { %p6129_p3 = pneg %p6128_p10 }
  0x68   : > { %p6136_p4 = pnand %p6135_p1, %p6129_p3 }
  0x6a   : > { %6139 = shalt.err (!%p6136_p4)
}
  0x6b   : > { %5737 = dma.hbm_to_vmem [thread:$0]  (!%p6573_p6), %s7505_s8, 128, %s457_s28, [#allocation17]  }
  0x6c   : > { %s6140_s13 = scalar_lea.hbm %s7506_s9, 128 }
  0x6d   : > { %p6141_p13 = scmp.ne.s32.totalorder %s7506_s9, %s6140_s13  ;;  %p6147_p4 = scmp.lt.u32.totalorder %s6140_s13, %s7506_s9 }
  0x6f   : > { %p6143_p0 = pnand %p6141_p13, %p6589_p8 }
  0x71   : > { %p6144_p1 = pneg %p6143_p0 }
  0x73   : > { %p6149_p2 = pnand %p6147_p4, %p6144_p1 }
  0x75   : > { %6152 = shalt.err (!%p6149_p2)
}
  0x76   : > { %s6153_s23 = scalar_lea.vmem %s468_s29, 128  ;;  %p6161_p10 = scmp.lt.s32.totalorder %s468_s29, %s468_s29 }
  0x77   : > { %p6154_p5 = scmp.ne.s32.totalorder %s468_s29, %s6153_s23  ;;  %p6162_p3 = scmp.lt.s32.totalorder %s6153_s23, %s6153_s23 }
  0x79   : > { %p6156_p7 = pnand %p6154_p5, %p6589_p8  ;;  %p6163_p11 = por %p6162_p3, %p6161_p10 }
  0x7b   : > { %p6157_p9 = pneg %p6156_p7 }
  0x7d   : > { %p6164_p12 = pnand %p6163_p11, %p6157_p9 }
  0x7f   : > { %6167 = shalt.err (!%p6164_p12)
}
  0x80   : > { %5740 = dma.hbm_to_vmem [thread:$0]  (!%p6573_p6), %s7506_s9, 128, %s468_s29, [#allocation20]  }
  0x81   : > { %s6435_s21 = smov [#allocation5]   ;;  %s6436_s12 = smov [#allocation9]  }
  0x82   : > { %s373_s7 = sshll.u32 %s6435_s21, 4  ;;  %s394_s30 = sshll.u32 %s6436_s12, 4  ;;  %s374_s7 = int_to_ptr.vmem [resolvable:$true] %s373_s7  ;;  %s395_s30 = int_to_ptr.vmem [resolvable:$true] %s394_s30 }
  0x83   : > { %s7527_s0 = sld [smem:[#allocation33_spill]] }
  0x89   : > { %s6168_s27 = scalar_lea.hbm %s7527_s0, 32 }
  0x8a   : > { %p6169_p13 = scmp.ne.s32.totalorder %s7527_s0, %s6168_s27  ;;  %p6175_p4 = scmp.lt.u32.totalorder %s6168_s27, %s7527_s0 }
  0x8c   : > { %p6171_p0 = pnand %p6169_p13, %p6589_p8 }
  0x8e   : > { %p6172_p1 = pneg %p6171_p0 }
  0x90   : > { %p6177_p2 = pnand %p6175_p4, %p6172_p1 }
  0x92   : > { %6180 = shalt.err (!%p6177_p2)
}
  0x93   : > { %s6181_s29 = scalar_lea.vmem %s374_s7, 32  ;;  %p6189_p10 = scmp.lt.s32.totalorder %s374_s7, %s374_s7 }
  0x94   : > { %p6182_p5 = scmp.ne.s32.totalorder %s374_s7, %s6181_s29  ;;  %p6190_p3 = scmp.lt.s32.totalorder %s6181_s29, %s6181_s29 }
  0x96   : > { %p6184_p7 = pnand %p6182_p5, %p6589_p8  ;;  %p6191_p11 = por %p6190_p3, %p6189_p10 }
  0x98   : > { %p6185_p9 = pneg %p6184_p7 }
  0x9a   : > { %p6192_p12 = pnand %p6191_p11, %p6185_p9 }
  0x9c   : > { %6195 = shalt.err (!%p6192_p12)
}
  0x9d   : > { %5716 = dma.hbm_to_vmem [thread:$0]  (!%p6573_p6), %s7527_s0, 32, %s374_s7, [#allocation6]  }
  0x9e   : > { %s6196_s22 = scalar_lea.hbm %s7499_s2, 512 }
  0x9f   : > { %p6197_p13 = scmp.ne.s32.totalorder %s7499_s2, %s6196_s22  ;;  %p6203_p4 = scmp.lt.u32.totalorder %s6196_s22, %s7499_s2 }
  0xa1   : > { %p6199_p0 = pnand %p6197_p13, %p6589_p8 }
  0xa3   : > { %p6200_p1 = pneg %p6199_p0 }
  0xa5   : > { %p6205_p2 = pnand %p6203_p4, %p6200_p1 }
  0xa7   : > { %6208 = shalt.err (!%p6205_p2)
}
  0xa8   : > { %s6209_s28 = scalar_lea.vmem %s395_s30, 512  ;;  %p6217_p10 = scmp.lt.s32.totalorder %s395_s30, %s395_s30 }
  0xa9   : > { %p6210_p5 = scmp.ne.s32.totalorder %s395_s30, %s6209_s28  ;;  %p6218_p3 = scmp.lt.s32.totalorder %s6209_s28, %s6209_s28 }
  0xab   : > { %p6212_p7 = pnand %p6210_p5, %p6589_p8  ;;  %p6219_p11 = por %p6218_p3, %p6217_p10 }
  0xad   : > { %p6213_p9 = pneg %p6212_p7 }
  0xaf   : > { %p6220_p12 = pnand %p6219_p11, %p6213_p9 }
  0xb1   : > { %6223 = shalt.err (!%p6220_p12)
}
  0xb2   : > { %s7518_s7 = smov 64   ;;  %s6438_s29 = smov 4  }
  0xb3   : > { %5722 = dma.hbm_to_vmem [thread:$0]  (!%p6573_p6), %s7499_s2, 512, %s395_s30, [#allocation8], %s7518_s7, %s7518_s7, %s6438_s29  }
  0xb4   : > { %s6439_s12 = smov [#allocation12]   ;;  %s6224_s14 = scalar_lea.hbm %s7501_s4, 16384 }
  0xb5   : > { %s418_s13 = sshll.u32 %s6439_s12, 4  ;;  %p6225_p13 = scmp.ne.s32.totalorder %s7501_s4, %s6224_s14  ;;  %s419_s13 = int_to_ptr.vmem [resolvable:$true] %s418_s13 }
  0xb6   : > { %p6231_p4 = scmp.lt.u32.totalorder %s6224_s14, %s7501_s4 }
  0xb7   : > { %p6227_p0 = pnand %p6225_p13, %p6589_p8 }
  0xb9   : > { %p6228_p1 = pneg %p6227_p0 }
  0xbb   : > { %p6233_p2 = pnand %p6231_p4, %p6228_p1 }
  0xbd   : > { %6236 = shalt.err (!%p6233_p2)
}
  0xbe   : > { %s6237_s30 = scalar_lea.vmem %s419_s13, 16384  ;;  %p6245_p10 = scmp.lt.s32.totalorder %s419_s13, %s419_s13 }
  0xbf   : > { %p6238_p5 = scmp.ne.s32.totalorder %s419_s13, %s6237_s30  ;;  %p6246_p3 = scmp.lt.s32.totalorder %s6237_s30, %s6237_s30 }
  0xc1   : > { %p6240_p7 = pnand %p6238_p5, %p6589_p8  ;;  %p6247_p11 = por %p6246_p3, %p6245_p10 }
  0xc3   : > { %p6241_p9 = pneg %p6240_p7 }
  0xc5   : > { %p6248_p12 = pnand %p6247_p11, %p6241_p9 }
  0xc7   : > { %6251 = shalt.err (!%p6248_p12)
}
  0xc8   : > { %s7517_s29 = smov 1024   ;;  %s6441_s21 = smov [#allocation15]  }
  0xc9   : > { %5728 = dma.hbm_to_vmem [thread:$0]  (!%p6573_p6), %s7501_s4, 16384, %s419_s13, [#allocation11], %s7517_s29, %s7517_s29, %s7518_s7  }
  0xca   : > { %s442_s12 = sshll.u32 %s6441_s21, 4  ;;  %s6252_s14 = scalar_lea.hbm %s7503_s6, 1024  ;;  %s443_s12 = int_to_ptr.vmem [resolvable:$true] %s442_s12 }
  0xcb   : > { %p6253_p13 = scmp.ne.s32.totalorder %s7503_s6, %s6252_s14  ;;  %p6259_p4 = scmp.lt.u32.totalorder %s6252_s14, %s7503_s6 }
  0xcd   : > { %p6255_p0 = pnand %p6253_p13, %p6589_p8 }
  0xcf   : > { %p6256_p1 = pneg %p6255_p0 }
  0xd1   : > { %p6261_p2 = pnand %p6259_p4, %p6256_p1 }
  0xd3   : > { %6264 = shalt.err (!%p6261_p2)
}
  0xd4   : > { %s6265_s13 = scalar_lea.vmem %s443_s12, 1024  ;;  %p6273_p10 = scmp.lt.s32.totalorder %s443_s12, %s443_s12 }
  0xd5   : > { %p6266_p5 = scmp.ne.s32.totalorder %s443_s12, %s6265_s13  ;;  %p6274_p3 = scmp.lt.s32.totalorder %s6265_s13, %s6265_s13 }
  0xd7   : > { %p6268_p7 = pnand %p6266_p5, %p6589_p8  ;;  %p6275_p11 = por %p6274_p3, %p6273_p10 }
  0xd9   : > { %p6269_p9 = pneg %p6268_p7 }
  0xdb   : > { %p6276_p12 = pnand %p6275_p11, %p6269_p9 }
  0xdd   : > { %6279 = shalt.err (!%p6276_p12)
}
  0xde   : > { %s6442_s0 = smov 512   ;;  %s6443_s25 = smov 32  }
  0xdf   : > { %5734 = dma.hbm_to_vmem [thread:$0]  (!%p6573_p6), %s7503_s6, 1024, %s443_s12, [#allocation14], %s6442_s0, %s6442_s0, %s6443_s25  }
  0xe0   : > { %s6444_s27 = smov [#allocation21]   ;;  %s6280_s28 = scalar_lea.hbm %s7507_s10, 16384 }
  0xe1   : > { %s477_s14 = sshll.u32 %s6444_s27, 4  ;;  %p6281_p13 = scmp.ne.s32.totalorder %s7507_s10, %s6280_s28  ;;  %s478_s14 = int_to_ptr.vmem [resolvable:$true] %s477_s14 }
  0xe2   : > { %p6287_p4 = scmp.lt.u32.totalorder %s6280_s28, %s7507_s10 }
  0xe3   : > { %p6283_p0 = pnand %p6281_p13, %p6589_p8 }
  0xe5   : > { %p6284_p1 = pneg %p6283_p0 }
  0xe7   : > { %p6289_p2 = pnand %p6287_p4, %p6284_p1 }
  0xe9   : > { %6292 = shalt.err (!%p6289_p2)
}
  0xea   : > { %s6293_s12 = scalar_lea.vmem %s478_s14, 16384  ;;  %p6301_p10 = scmp.lt.s32.totalorder %s478_s14, %s478_s14 }
  0xeb   : > { %p6294_p5 = scmp.ne.s32.totalorder %s478_s14, %s6293_s12  ;;  %p6302_p3 = scmp.lt.s32.totalorder %s6293_s12, %s6293_s12 }
  0xed   : > { %p6296_p7 = pnand %p6294_p5, %p6589_p8  ;;  %p6303_p11 = por %p6302_p3, %p6301_p10 }
  0xef   : > { %p6297_p9 = pneg %p6296_p7 }
  0xf1   : > { %p6304_p12 = pnand %p6303_p11, %p6297_p9 }
  0xf3   : > { %6307 = shalt.err (!%p6304_p12)
}
  0xf4   : > { %s6445_s0 = smov 128   ;;  %s6446_s25 = smov 8  }
  0xf5   : > { %5743 = dma.hbm_to_vmem [thread:$0]  (!%p6573_p6), %s7507_s10, 16384, %s478_s14, [#allocation20], %s6445_s0, %s6445_s0, %s6446_s25  }
  0xf6   : > { %s6447_s21 = smov [#allocation22]   ;;  %s6308_s23 = scalar_lea.hbm %s7508_s11, 32 }
  0xf7   : > { %s491_s22 = sshll.u32 %s6447_s21, 4  ;;  %p6309_p13 = scmp.ne.s32.totalorder %s7508_s11, %s6308_s23  ;;  %s492_s22 = int_to_ptr.vmem [resolvable:$true] %s491_s22 }
  0xf8   : > { %p6315_p4 = scmp.lt.u32.totalorder %s6308_s23, %s7508_s11 }
  0xf9   : > { %p6311_p0 = pnand %p6309_p13, %p6589_p8 }
  0xfb   : > { %p6312_p1 = pneg %p6311_p0 }
  0xfd   : > { %p6317_p2 = pnand %p6315_p4, %p6312_p1 }
  0xff   : > { %6320 = shalt.err (!%p6317_p2)
}
 0x100   : > { %s6321_s14 = scalar_lea.vmem %s492_s22, 32  ;;  %p6329_p10 = scmp.lt.s32.totalorder %s492_s22, %s492_s22 }
 0x101   : > { %p6322_p5 = scmp.ne.s32.totalorder %s492_s22, %s6321_s14  ;;  %p6330_p3 = scmp.lt.s32.totalorder %s6321_s14, %s6321_s14 }
 0x103   : > { %p6324_p7 = pnand %p6322_p5, %p6589_p8  ;;  %p6331_p11 = por %p6330_p3, %p6329_p10 }
 0x105   : > { %p6325_p9 = pneg %p6324_p7 }
 0x107   : > { %p6332_p12 = pnand %p6331_p11, %p6325_p9 }
 0x109   : > { %6335 = shalt.err (!%p6332_p12)
}
 0x10a   : > { %5746 = dma.hbm_to_vmem [thread:$0]  (!%p6573_p6), %s7508_s11, 32, %s492_s22, [#allocation23]  }
 0x10b   : > { %s6808_s24 = sadd.s32 1, %s6428_s18   ;;  %s189_s26 = sadd.s32 1, %s6424_s17 }
 0x10c   : > { %s186_s7 = ssub.s32 %s6428_s18, %s6808_s24  ;;  %p196_p8 = scmp.ne.s32.totalorder %s6424_s17, %s6420_s16 }
 0x10d   : > { %p187_p13 = scmp.eq.s32.totalorder %s186_s7, 0  ;;  %p197_p0 = scmp.eq.s32.totalorder %s6428_s18, 0 }
 0x10e   : > { %p202_p1 = scmp.ne.s32.totalorder %s6420_s16, %s6416_s15  ;;  %p5762_p4 = scmp.lt.s32.totalorder %s6428_s18, 2 }
 0x10f   : > { %s6820_s29 = scalar_select %p187_p13, %s6424_s17, %s189_s26  }
 0x110   : > { %p198_p2 = por %p197_p0, %p196_p8  ;;  %p7528_p5 = scmp.eq.s32.totalorder %s6555_s20, 0 }
 0x111   : > { %s508_s27 = sand.u32 1, %s6428_s18   ;;  %s510_s22 = sand.u32 1, %s6424_s17  }
 0x112   : > { %p6824_p7 = por %p7528_p5, %p202_p1  ;;  %s5216_s19 = sshll.u32 %s510_s22, 11 }
 0x113   : > { %s5522_s23 = sshll.u32 %s6428_s18, 15  ;;  %s7530_s13 = sld [smem:[#allocation34_spill]] }
 0x114   : > { %s512_s15 = scalar_lea.vmem [#allocation16], %s5216_s19  ;;  %p6838_p6 = pnand %p5762_p4, %p198_p2 }
 0x115   : > { %s520_s14 = sshll.u32 %s512_s15, 4  ;;  %s6842_s18 = scalar_lea.sflag [#allocation17], %s508_s27  ;;  %s6836_s14 = int_to_ptr.vmem [resolvable:$true] %s520_s14 }
 0x116   : > { %p6338_p10 = pneg %p6838_p6 }
 0x119   : > { %s6834_s12 = scalar_lea.hbm %s7530_s13, %s5522_s23  ;;  %s6341_s22 = scalar_lea.hbm %s7530_s13, 65536 }
 0x11a   : > { %s6336_s25 = scalar_lea.hbm %s6834_s12, 32768  ;;  %p6342_p12 = scmp.lt.u32.totalorder %s6834_s12, %s7530_s13 }
 0x11b   : > { %p6337_p9 = scmp.ne.s32.totalorder %s6834_s12, %s6336_s25  ;;  %p6343_p8 = scmp.lt.u32.totalorder %s6341_s22, %s6336_s25 }
 0x11c   : > { %p6345_p0 = scmp.lt.u32.totalorder %s6336_s25, %s6834_s12 }
 0x11d   : > { %p6339_p3 = pnand %p6338_p10, %p6337_p9  ;;  %p6344_p13 = por %p6343_p8, %p6342_p12 }
 0x11f   : > { %p6340_p11 = pneg %p6339_p3  ;;  %p6346_p1 = por %p6345_p0, %p6344_p13 }
 0x121   : > { %p6347_p4 = pnand %p6346_p1, %p6340_p11 }
 0x123   : > { %6350 = shalt.err (!%p6347_p4)
}
 0x124   : > { %s6351_s27 = scalar_lea.vmem %s6836_s14, 32768  ;;  %s6448_s28 = smov [#allocation16]  }
 0x125   : > { %p6352_p2 = scmp.ne.s32.totalorder %s6836_s14, %s6351_s27  ;;  %s6356_s30 = sshll.u32 %s6448_s28, 4  ;;  %s6357_s30 = int_to_ptr.vmem [resolvable:$false] %s6356_s30 }
 0x126   : > { %s6358_s15 = scalar_lea.vmem %s6357_s30, 65536  ;;  %p6359_p3 = scmp.lt.s32.totalorder %s6836_s14, %s6357_s30 }
 0x127   : > { %p6354_p5 = pnand %p6352_p2, %p6338_p10  ;;  %p6360_p12 = scmp.lt.s32.totalorder %s6358_s15, %s6351_s27 }
 0x129   : > { %p6355_p9 = pneg %p6354_p5  ;;  %p6361_p8 = por %p6360_p12, %p6359_p3 }
 0x12b   : > { %p6362_p13 = pnand %p6361_p8, %p6355_p9 }
 0x12d   : > { %6365 = shalt.err (!%p6362_p13)
}
 0x12e   : > { %s7532_s25 = smov 64   ;;  %s7533_s26 = smov 1024  }
 0x12f   : > { %5750 = dma.hbm_to_vmem [thread:$0]  (!%p6838_p6), %s6834_s12, 32768, %s6836_s14, %s6842_s18, %s7533_s26, %s7533_s26, %s7532_s25  }
 0x130   : > { %s7534_s7 = sld [smem:[#allocation32_spill]] }
 0x136   : > { %p7535_p10 = scmp.ne.s32.totalorder %s7534_s7, 0 }
 0x137   : > { %p7536_p11 = scmp.eq.s32.totalorder (!%p7535_p10), %s6555_s20, 0 }
 0x138   : > { %532 = sbr.rel (%p7535_p10) target bundleno = 2178 (0x882), region = 76 }
 0x13f   : > { %6383 = dma.done.wait (%p7536_p11), [#allocation6], 32   ;;  %p7537_p0 = pmov %p7536_p11 }
 0x141   : > { %6385 = vsyncadd (%p7537_p0), [#allocation6], 4294967264  ;;  %p7538_p1 = pmov %p7537_p0 }
 0x142   : > { %p7539_p4 = pmov %p7537_p0 }
 0x143   : > { %6387 = dma.done.wait (%p7538_p1), [#allocation8], 544  }
 0x144   : > { %6389 = vsyncadd (%p7539_p4), [#allocation8], 4294966752  ;;  %p7540_p2 = pmov %p7537_p0 }
 0x145   : > { %p7541_p6 = pmov %p7537_p0 }
 0x146   : > { %6391 = dma.done.wait (%p7540_p2), [#allocation11], 16400  }
 0x147   : > { %6393 = vsyncadd (%p7541_p6), [#allocation11], 4294950896  ;;  %p7542_p5 = pmov %p7537_p0 }
 0x148   : > { %p7543_p9 = pmov %p7537_p0 }
 0x149   : > { %6395 = dma.done.wait (%p7542_p5), [#allocation14], 1280  }
 0x14a   : > { %6397 = vsyncadd (%p7543_p9), [#allocation14], 4294966016  ;;  %s562_s12 = sand.u32 1, %s6555_s20   ;;  %s564_s14 = sand.u32 1, %s6420_s16  }
 0x14b   : > { %s5228_s0 = sshll.u32 %s564_s14, 11  ;;  %s563_s18 = scalar_lea.sflag [#allocation17], %s562_s12 }
 0x14c   : > { %s6893_s22 = scalar_lea.vmem [#allocation16], %s5228_s0 }
 0x14d   : > { %6399 = dma.done.wait (%p6824_p7), %s563_s18, 32768  }
 0x14e   : > { %6401 = vsyncadd (%p6824_p7), %s563_s18, 4294934528  ;;  %p7544_p3 = pmov %p7537_p0 }
 0x14f   : > { %p7545_p12 = pmov %p7537_p0 }
 0x150   : > { %6403 = dma.done.wait (%p7544_p3), [#allocation17], 128  }
 0x151   : > { %6405 = vsyncadd (%p7545_p12), [#allocation17], 4294967168  ;;  %p7546_p8 = pmov %p7537_p0 }
 0x152   : > { %p7547_p13 = pmov %p7537_p0 }
 0x153   : > { %6407 = dma.done.wait (%p7546_p8), [#allocation20], 16512  }
 0x154   : > { %6409 = vsyncadd (%p7547_p13), [#allocation20], 4294950784  ;;  %p7548_p10 = pmov %p7537_p0 }
 0x155   : > { %p7549_p11 = pmov %p7537_p0 }
 0x156   : > { %6411 = dma.done.wait (%p7548_p10), [#allocation23], 32  }
 0x157   : > { %6413 = vsyncadd (%p7549_p11), [#allocation23], 4294967264  ;;  %p7550_p7 = scmp.ne.s32.totalorder %s6555_s20, 0 }
 0x158   : > { %v5831_v1 = vld [vmem:[#allocation9] sm:$0xff] (!%p7550_p7)   ;;  %v6449_v2 = vmov (!%p7550_p7), 0.0   ;;  %v5832_v3 = vld [vmem:[#allocation9 + $0x8] sm:$0xff] (!%p7550_p7)   ;;  %vm6450_vm0 = vmmov (!%p7550_p7), 0   ;;  %v5833_v9 = vld [vmem:[#allocation9 + $0x10] sm:$0xff] (!%p7550_p7)   ;;  %vm669_vm1 = vcmask (!%p7550_p7), 523264  }
 0x159   : > { %627 = sbr.rel (%p7550_p7) target bundleno = 921 (0x399), region = 128  ;;  %5563 = vmatprep.subr.bf16.mxu0 (!%p7550_p7), %v6449_v2  ;;  %5571 = vmatprep.mubr.msk.bf16.mxu0 (!%p7550_p7), %vm6450_vm0, %v6449_v2  ;;  %v715_v4 = vld [vmem:[#allocation12] sm:$0xff] (!%p7550_p7)  ;;  %v716_v14 = vld [vmem:[#allocation12 + $0x8] sm:$0xff] (!%p7550_p7)  ;;  %v5834_v17 = vld [vmem:[#allocation9 + $0x18] sm:$0xff] (!%p7550_p7)   ;;  %vm2137_vm2 = vcmask (!%p7550_p7), 130048  }
 0x15a   : > { %5564 = vmatpush3.bf16.msra.mxu0 (!%p7550_p7), %v5831_v1  ;;  %v723_v5 = vld [vmem:[#allocation12 + $0x40] sm:$0xff] (!%p7550_p7)  ;;  %v724_v15 = vld [vmem:[#allocation12 + $0x48] sm:$0xff] (!%p7550_p7)  ;;  %v628_v19 = vld [vmem:[#allocation7] sm:$0x3] (!%p7550_p7) }
 0x15b   : > { %5565 = vmatprep.subr.bf16.mxu0 (!%p7550_p7), %v6449_v2  ;;  %v5241_v6 = vcombine.high (!%p7550_p7), %v715_v4, %v723_v5  ;;  %v5240_v7 = vcombine.low (!%p7550_p7), %v715_v4, %v723_v5  ;;  %v731_v8 = vld [vmem:[#allocation12 + $0x80] sm:$0xff] (!%p7550_p7)  ;;  %v5243_v22 = vcombine.high (!%p7550_p7), %v716_v14, %v724_v15  ;;  %v732_v23 = vld [vmem:[#allocation12 + $0x88] sm:$0xff] (!%p7550_p7)  ;;  %v629_v26 = vpack.c.bf16 (!%p7550_p7), %v628_v19, %v628_v19 }
 0x15c   : > { %v739_v10 = vld [vmem:[#allocation12 + $0xc0] sm:$0xff] (!%p7550_p7)  ;;  %v740_v24 = vld [vmem:[#allocation12 + $0xc8] sm:$0xff] (!%p7550_p7)  ;;  %v5242_v28 = vcombine.low (!%p7550_p7), %v716_v14, %v724_v15 }
 0x15d   : > { %1567 = vmatprep.subr.bf16.mxu1 (!%p7550_p7), %v5241_v6  ;;  %v5257_v11 = vcombine.high (!%p7550_p7), %v731_v8, %v739_v10  ;;  %v747_v12 = vld [vmem:[#allocation12 + $0x100] sm:$0xff] (!%p7550_p7)  ;;  %v5256_v16 = vcombine.low (!%p7550_p7), %v731_v8, %v739_v10  ;;  %v5259_v31 = vcombine.high (!%p7550_p7), %v732_v23, %v740_v24  ;;  %v748_v32 = vld [vmem:[#allocation12 + $0x108] sm:$0xff] (!%p7550_p7)  ;;  %v5258_v36 = vcombine.low (!%p7550_p7), %v732_v23, %v740_v24  ;;  %v717_v8 = vld [vmem:[#allocation12 + $0x10] sm:$0xff] (!%p7550_p7) }
 0x15e   : > { %5566 = vmatpush3.bf16.msra.mxu0 (!%p7550_p7), %v5832_v3  ;;  %v755_v13 = vld [vmem:[#allocation12 + $0x140] sm:$0xff] (!%p7550_p7)  ;;  %1568 = vmatpush1.bf16.msra.mxu1 (!%p7550_p7), %v5240_v7  ;;  %v756_v33 = vld [vmem:[#allocation12 + $0x148] sm:$0xff] (!%p7550_p7)  ;;  %v718_v10 = vld [vmem:[#allocation12 + $0x18] sm:$0xff] (!%p7550_p7) }
 0x15f   : > { %5567 = vmatprep.subr.bf16.mxu0 (!%p7550_p7), %v6449_v2  ;;  %1569 = vmatprep.subr.bf16.mxu1 (!%p7550_p7), %v5257_v11  ;;  %v5273_v18 = vcombine.high (!%p7550_p7), %v747_v12, %v755_v13  ;;  %v763_v20 = vld [vmem:[#allocation12 + $0x180] sm:$0xff] (!%p7550_p7)  ;;  %v5272_v25 = vcombine.low (!%p7550_p7), %v747_v12, %v755_v13  ;;  %v5275_v39 = vcombine.high (!%p7550_p7), %v748_v32, %v756_v33  ;;  %v764_v40 = vld [vmem:[#allocation12 + $0x188] sm:$0xff] (!%p7550_p7)  ;;  %v726_v12 = vld [vmem:[#allocation12 + $0x58] sm:$0xff] (!%p7550_p7) }
 0x160   : > { %v771_v21 = vld [vmem:[#allocation12 + $0x1c0] sm:$0xff]  ;;  %v772_v41 = vld [vmem:[#allocation12 + $0x1c8] sm:$0xff]  ;;  %v5274_v44 = vcombine.low %v748_v32, %v756_v33  ;;  %v5246_v14 = vcombine.low %v718_v10, %v726_v12  ;;  %v5247_v15 = vcombine.high %v718_v10, %v726_v12  ;;  %v741_v23 = vld [vmem:[#allocation12 + $0xd0] sm:$0xff] }
 0x161   : > { %v5289_v27 = vcombine.high %v763_v20, %v771_v21  ;;  %v779_v29 = vld [vmem:[#allocation12 + $0x200] sm:$0xff]  ;;  %v5288_v34 = vcombine.low %v763_v20, %v771_v21  ;;  %v5291_v47 = vcombine.high %v764_v40, %v772_v41  ;;  %v780_v48 = vld [vmem:[#allocation12 + $0x208] sm:$0xff]  ;;  %v5290_v52 = vcombine.low %v764_v40, %v772_v41  ;;  %v733_v21 = vld [vmem:[#allocation12 + $0x90] sm:$0xff] }
 0x162   : > { %5568 = vmatpush3.bf16.msra.mxu0 %v5833_v9  ;;  %1570 = vmatpush1.bf16.msra.mxu1 %v5256_v16  ;;  %v787_v30 = vld [vmem:[#allocation12 + $0x240] sm:$0xff]  ;;  %v788_v49 = vld [vmem:[#allocation12 + $0x248] sm:$0xff]  ;;  %v725_v9 = vld [vmem:[#allocation12 + $0x50] sm:$0xff]  ;;  %v6451_v16 = vmov 0  }
 0x163   : > { %5569 = vmatprep.subr.bf16.mxu0 %v6449_v2  ;;  %1571 = vmatprep.subr.bf16.mxu1 %v5273_v18  ;;  %v5305_v35 = vcombine.high %v779_v29, %v787_v30  ;;  %v795_v37 = vld [vmem:[#allocation12 + $0x280] sm:$0xff]  ;;  %v5304_v42 = vcombine.low %v779_v29, %v787_v30  ;;  %v5307_v53 = vcombine.high %v780_v48, %v788_v49  ;;  %v796_v54 = vld [vmem:[#allocation12 + $0x288] sm:$0xff]  ;;  %v734_v24 = vld [vmem:[#allocation12 + $0x98] sm:$0xff] }
 0x164   : > { %v803_v38 = vld [vmem:[#allocation12 + $0x2c0] sm:$0xff]  ;;  %v804_v55 = vld [vmem:[#allocation12 + $0x2c8] sm:$0xff]  ;;  %v5306_v57 = vcombine.low %v780_v48, %v788_v49  ;;  %v5245_v11 = vcombine.high %v717_v8, %v725_v9  ;;  %v5244_v13 = vcombine.low %v717_v8, %v725_v9  ;;  %1599 = vmatprep.mubr.bf16.mxu1 %v6451_v16  ;;  %v5261_v29 = vcombine.high %v733_v21, %v741_v23  ;;  %v757_v32 = vld [vmem:[#allocation12 + $0x150] sm:$0xff] }
 0x165   : > { %v5321_v43 = vcombine.high %v795_v37, %v803_v38  ;;  %v811_v45 = vld [vmem:[#allocation12 + $0x300] sm:$0xff]  ;;  %v5320_v50 = vcombine.low %v795_v37, %v803_v38  ;;  %v5323_v58 = vcombine.high %v796_v54, %v804_v55  ;;  %v812_v59 = vld [vmem:[#allocation12 + $0x308] sm:$0xff]  ;;  %v5322_v61 = vcombine.low %v796_v54, %v804_v55  ;;  %v750_v33 = vld [vmem:[#allocation12 + $0x118] sm:$0xff] }
 0x166   : > { %5570 = vmatpush3.bf16.msra.mxu0 %v5834_v17  ;;  %1572 = vmatpush1.bf16.msra.mxu1 %v5272_v25  ;;  %v819_v46 = vld [vmem:[#allocation12 + $0x340] sm:$0xff]  ;;  %v820_v60 = vld [vmem:[#allocation12 + $0x348] sm:$0xff]  ;;  %v5234_v17 = vld [vmem:[#allocation10] ss:$0 sm:$0xff] }
 0x167   : > { %1608 = vmatprep.subr.bf16.mxu0 %v5243_v22  ;;  %1573 = vmatprep.subr.bf16.mxu1 %v5289_v27  ;;  %v5337_v51 = vcombine.high %v811_v45, %v819_v46  ;;  %v5336_v56 = vcombine.low %v811_v45, %v819_v46  ;;  %v5339_v62 = vcombine.high %v812_v59, %v820_v60  ;;  %v827_v0 = vld [vmem:[#allocation12 + $0x380] sm:$0xff]  ;;  %v828_v2 = vld [vmem:[#allocation12 + $0x388] sm:$0xff]  ;;  %v742_v25 = vld [vmem:[#allocation12 + $0xd8] sm:$0xff] }
 0x168   : > { %v5338_v63 = vcombine.low %v812_v59, %v820_v60  ;;  %v835_v1 = vld [vmem:[#allocation12 + $0x3c0] sm:$0xff]  ;;  %v836_v4 = vld [vmem:[#allocation12 + $0x3c8] sm:$0xff]  ;;  %v5263_v30 = vcombine.high %v734_v24, %v742_v25  ;;  %v773_v40 = vld [vmem:[#allocation12 + $0x1d0] sm:$0xff] }
 0x169   : > { %5572 = vmatmul.mubr.msk.bf16.vlgmr.msra.gmra.mrb[0].mxu0 %vm669_vm1, %v629_v26  ;;  %v5353_v3 = vcombine.high %v827_v0, %v835_v1  ;;  %v5354_v5 = vcombine.low %v828_v2, %v836_v4  ;;  %v5355_v6 = vcombine.high %v828_v2, %v836_v4  ;;  %v5352_v7 = vcombine.low %v827_v0, %v835_v1  ;;  %v766_v41 = vld [vmem:[#allocation12 + $0x198] sm:$0xff]  ;;  %v789_v48 = vld [vmem:[#allocation12 + $0x250] sm:$0xff] }
 0x16a   : > { %1609 = vmatpush1.bf16.msra.mxu0 %v5242_v28  ;;  %1574 = vmatpush1.bf16.msra.mxu1 %v5288_v34  ;;  %v758_v34 = vld [vmem:[#allocation12 + $0x158] sm:$0xff]  ;;  %v797_v55 = vld [vmem:[#allocation12 + $0x290] sm:$0xff] }
 0x16b   : > { %1610 = vmatprep.subr.bf16.mxu0 %v5259_v31  ;;  %1575 = vmatprep.subr.bf16.mxu1 %v5305_v35  ;;  %v749_v31 = vld [vmem:[#allocation12 + $0x110] sm:$0xff]  ;;  %v5260_v35 = vcombine.low %v733_v21, %v741_v23  ;;  %v5279_v38 = vcombine.high %v750_v33, %v758_v34  ;;  %v782_v49 = vld [vmem:[#allocation12 + $0x218] sm:$0xff] }
 0x16c   : > { %1640 = vmatprep.mubr.bf16.mxu0 %v6451_v16  ;;  %v5277_v37 = vcombine.high %v749_v31, %v757_v32  ;;  %v821_v0 = vld [vmem:[#allocation12 + $0x350] sm:$0xff]  ;;  %v814_v1 = vld [vmem:[#allocation12 + $0x318] sm:$0xff] }
 0x16d   : > { %v822_v2 = vld [vmem:[#allocation12 + $0x358] sm:$0xff]  ;;  %v837_v8 = vld [vmem:[#allocation12 + $0x3d0] sm:$0xff] }
 0x16e   : > { %1611 = vmatpush1.bf16.msra.mxu0 %v5258_v36  ;;  %1576 = vmatpush1.bf16.msra.mxu1 %v5304_v42  ;;  %v5262_v36 = vcombine.low %v734_v24, %v742_v25  ;;  %v774_v42 = vld [vmem:[#allocation12 + $0x1d8] sm:$0xff]  ;;  %v5342_v12 = vcombine.low %v814_v1, %v822_v2  ;;  %v735_v24 = vld [vmem:[#allocation12 + $0xa0] sm:$0xff] }
 0x16f   : > { %1612 = vmatprep.subr.bf16.mxu0 %v5275_v39  ;;  %1577 = vmatprep.subr.bf16.mxu1 %v5321_v43  ;;  %v765_v39 = vld [vmem:[#allocation12 + $0x190] sm:$0xff]  ;;  %v5276_v43 = vcombine.low %v749_v31, %v757_v32  ;;  %v5295_v46 = vcombine.high %v766_v41, %v774_v42  ;;  %v830_v9 = vld [vmem:[#allocation12 + $0x398] sm:$0xff]  ;;  %v743_v25 = vld [vmem:[#allocation12 + $0xe0] sm:$0xff] }
 0x170   : > { %v5293_v45 = vcombine.high %v765_v39, %v773_v40  ;;  %v838_v10 = vld [vmem:[#allocation12 + $0x3d8] sm:$0xff]  ;;  %v5265_v31 = vcombine.high %v735_v24, %v743_v25 }
 0x171   : > { %v5358_v21 = vcombine.low %v830_v9, %v838_v10 }
 0x172   : > { %1613 = vmatpush1.bf16.msra.mxu0 %v5274_v44  ;;  %1578 = vmatpush1.bf16.msra.mxu1 %v5320_v50  ;;  %v5278_v44 = vcombine.low %v750_v33, %v758_v34  ;;  %v790_v50 = vld [vmem:[#allocation12 + $0x258] sm:$0xff]  ;;  %v751_v33 = vld [vmem:[#allocation12 + $0x120] sm:$0xff] }
 0x173   : > { %1614 = vmatprep.subr.bf16.mxu0 %v5291_v47  ;;  %1579 = vmatprep.subr.bf16.mxu1 %v5337_v51  ;;  %v781_v47 = vld [vmem:[#allocation12 + $0x210] sm:$0xff]  ;;  %v5292_v51 = vcombine.low %v765_v39, %v773_v40  ;;  %v5311_v54 = vcombine.high %v782_v49, %v790_v50  ;;  %v5310_v60 = vcombine.low %v782_v49, %v790_v50  ;;  %v759_v34 = vld [vmem:[#allocation12 + $0x160] sm:$0xff] }
 0x174   : > { %v5308_v59 = vcombine.low %v781_v47, %v789_v48  ;;  %v5281_v39 = vcombine.high %v751_v33, %v759_v34  ;;  %v783_v49 = vld [vmem:[#allocation12 + $0x220] sm:$0xff] }
 0x175   : > { %v791_v50 = vld [vmem:[#allocation12 + $0x260] sm:$0xff] }
 0x176   : > { %1615 = vmatpush1.bf16.msra.mxu0 %v5290_v52  ;;  %1580 = vmatpush1.bf16.msra.mxu1 %v5336_v56  ;;  %v5294_v52 = vcombine.low %v766_v41, %v774_v42  ;;  %v805_v56 = vld [vmem:[#allocation12 + $0x2d0] sm:$0xff]  ;;  %v767_v41 = vld [vmem:[#allocation12 + $0x1a0] sm:$0xff] }
 0x177   : > { %1616 = vmatprep.subr.bf16.mxu0 %v5307_v53  ;;  %1581 = vmatprep.subr.bf16.mxu1 %v5353_v3  ;;  %v5309_v53 = vcombine.high %v781_v47, %v789_v48  ;;  %v5324_v3 = vcombine.low %v797_v55, %v805_v56  ;;  %v775_v42 = vld [vmem:[#allocation12 + $0x1e0] sm:$0xff] }
 0x178   : > { %v5297_v47 = vcombine.high %v767_v41, %v775_v42 }
 0x17a   : > { %1617 = vmatpush1.bf16.msra.mxu0 %v5306_v57  ;;  %1582 = vmatpush1.bf16.msra.mxu1 %v5352_v7  ;;  %v798_v57 = vld [vmem:[#allocation12 + $0x298] sm:$0xff]  ;;  %v829_v7 = vld [vmem:[#allocation12 + $0x390] sm:$0xff] }
 0x17b   : > { %1618 = vmatprep.subr.bf16.mxu0 %v5323_v58  ;;  %1649 = vmatprep.subr.bf16.mxu1 %v5245_v11  ;;  %v806_v58 = vld [vmem:[#allocation12 + $0x2d8] sm:$0xff] }
 0x17c   : > { %v5326_v4 = vcombine.low %v798_v57, %v806_v58 }
 0x17e   : > { %1619 = vmatpush1.bf16.msra.mxu0 %v5322_v61  ;;  %v5325_v61 = vcombine.high %v797_v55, %v805_v56  ;;  %v5313_v55 = vcombine.high %v783_v49, %v791_v50 }
 0x17f   : > { %1620 = vmatprep.subr.bf16.mxu0 %v5339_v62  ;;  %v5327_v62 = vcombine.high %v798_v57, %v806_v58  ;;  %v799_v57 = vld [vmem:[#allocation12 + $0x2a0] sm:$0xff] }
 0x180   : > { %v807_v58 = vld [vmem:[#allocation12 + $0x2e0] sm:$0xff] }
 0x182   : > { %1621 = vmatpush1.bf16.msra.mxu0 %v5338_v63  ;;  %v813_v63 = vld [vmem:[#allocation12 + $0x310] sm:$0xff] }
 0x183   : > { %1622 = vmatprep.subr.bf16.mxu0 %v5355_v6  ;;  %v5343_v6 = vcombine.high %v814_v1, %v822_v2  ;;  %v5340_v11 = vcombine.low %v813_v63, %v821_v0  ;;  %v815_v1 = vld [vmem:[#allocation12 + $0x320] sm:$0xff] }
 0x184   : > { %v823_v2 = vld [vmem:[#allocation12 + $0x360] sm:$0xff] }
 0x186   : > { %1623 = vmatpush1.bf16.msra.mxu0 %v5354_v5  ;;  %v5341_v5 = vcombine.high %v813_v63, %v821_v0  ;;  %v5329_v63 = vcombine.high %v799_v57, %v807_v58 }
 0x187   : > { %1690 = vmatprep.subr.bf16.mxu0 %v5247_v15  ;;  %v719_v15 = vld [vmem:[#allocation12 + $0x20] sm:$0xff] }
 0x23c   : > { %v707_v18 = vpop.f32.mrb[0].mxu0 }
 0x23d   : > { %v708_v19 = vadd.f32 %v5234_v17, %v707_v18  ;;  %v5573_v20 = vpop.f32.mrb[1].mxu0  ;;  %v727_v17 = vld [vmem:[#allocation12 + $0x60] sm:$0xff]  ;;  %v720_v18 = vld [vmem:[#allocation12 + $0x28] sm:$0xff] }
 0x23e   : > { %v710_v22 = vpop.f32.mrb[2].mxu0  ;;  %v5356_v20 = vcombine.low %v829_v7, %v837_v8 }
 0x23f   : > { %v713_v26 = vmax.f32 %v708_v19, 0.0  ;;  %v5574_v27 = vpop.f32.mrb[3].mxu0  ;;  %v728_v19 = vld [vmem:[#allocation12 + $0x68] sm:$0xff]  ;;  %v5249_v22 = vcombine.high %v719_v15, %v727_v17 }
 0x240   : > { %v5251_v23 = vcombine.high %v720_v18, %v728_v19  ;;  %v744_v27 = vld [vmem:[#allocation12 + $0xe8] sm:$0xff] }
 0x241   : > { %v6915_v28 = vpack.c.bf16 %v713_v26, %v713_v26  ;;  %v736_v26 = vld [vmem:[#allocation12 + $0xa8] sm:$0xff] }
 0x242   : > { %v5267_v32 = vcombine.high %v736_v26, %v744_v27 }
 0x243   : > { %1600 = vmatmul.mubr.bf16.vlgmr.msra.gmra.mrb[0].mxu1 %v6915_v28  ;;  %1641 = vmatmul.mubr.bf16.vlgmr.msra.gmra.mrb[4].mxu0 %v6915_v28 }
 0x244   : > { %1650 = vmatpush1.bf16.msra.mxu1 %v5244_v13  ;;  %1691 = vmatpush1.bf16.msra.mxu0 %v5246_v14  ;;  %v5357_v13 = vcombine.high %v829_v7, %v837_v8  ;;  %v5359_v14 = vcombine.high %v830_v9, %v838_v10  ;;  %v5345_v7 = vcombine.high %v815_v1, %v823_v2  ;;  %v831_v9 = vld [vmem:[#allocation12 + $0x3a0] sm:$0xff] }
 0x245   : > { %1651 = vmatprep.subr.bf16.mxu1 %v5261_v29  ;;  %1692 = vmatprep.subr.bf16.mxu0 %v5263_v30  ;;  %v5248_v29 = vcombine.low %v719_v15, %v727_v17  ;;  %v5250_v30 = vcombine.low %v720_v18, %v728_v19  ;;  %v839_v10 = vld [vmem:[#allocation12 + $0x3e0] sm:$0xff]  ;;  %v721_v18 = vld [vmem:[#allocation12 + $0x30] sm:$0xff] }
 0x246   : > { %1681 = vmatprep.mubr.bf16.mxu1 %v6451_v16  ;;  %1722 = vmatprep.mubr.bf16.mxu0 %v6451_v16  ;;  %v5361_v15 = vcombine.high %v831_v9, %v839_v10  ;;  %v729_v19 = vld [vmem:[#allocation12 + $0x70] sm:$0xff] }
 0x248   : > { %1652 = vmatpush1.bf16.msra.mxu1 %v5260_v35  ;;  %1693 = vmatpush1.bf16.msra.mxu0 %v5262_v36  ;;  %v752_v35 = vld [vmem:[#allocation12 + $0x128] sm:$0xff] }
 0x249   : > { %1653 = vmatprep.subr.bf16.mxu1 %v5277_v37  ;;  %1694 = vmatprep.subr.bf16.mxu0 %v5279_v38  ;;  %v760_v36 = vld [vmem:[#allocation12 + $0x168] sm:$0xff]  ;;  %v5264_v37 = vcombine.low %v735_v24, %v743_v25  ;;  %v5266_v38 = vcombine.low %v736_v26, %v744_v27  ;;  %v5253_v24 = vcombine.high %v721_v18, %v729_v19  ;;  %v737_v26 = vld [vmem:[#allocation12 + $0xb0] sm:$0xff] }
 0x24a   : > { %v5283_v40 = vcombine.high %v752_v35, %v760_v36  ;;  %v745_v27 = vld [vmem:[#allocation12 + $0xf0] sm:$0xff] }
 0x24c   : > { %1654 = vmatpush1.bf16.msra.mxu1 %v5276_v43  ;;  %1695 = vmatpush1.bf16.msra.mxu0 %v5278_v44  ;;  %v768_v43 = vld [vmem:[#allocation12 + $0x1a8] sm:$0xff] }
 0x24d   : > { %1655 = vmatprep.subr.bf16.mxu1 %v5293_v45  ;;  %1696 = vmatprep.subr.bf16.mxu0 %v5295_v46  ;;  %v776_v44 = vld [vmem:[#allocation12 + $0x1e8] sm:$0xff]  ;;  %v5280_v45 = vcombine.low %v751_v33, %v759_v34  ;;  %v5282_v46 = vcombine.low %v752_v35, %v760_v36  ;;  %v5269_v33 = vcombine.high %v737_v26, %v745_v27  ;;  %v753_v35 = vld [vmem:[#allocation12 + $0x130] sm:$0xff] }
 0x24e   : > { %v5299_v48 = vcombine.high %v768_v43, %v776_v44  ;;  %v761_v36 = vld [vmem:[#allocation12 + $0x170] sm:$0xff] }
 0x250   : > { %1656 = vmatpush1.bf16.msra.mxu1 %v5292_v51  ;;  %1697 = vmatpush1.bf16.msra.mxu0 %v5294_v52  ;;  %v784_v51 = vld [vmem:[#allocation12 + $0x228] sm:$0xff] }
 0x251   : > { %1657 = vmatprep.subr.bf16.mxu1 %v5309_v53  ;;  %1698 = vmatprep.subr.bf16.mxu0 %v5311_v54  ;;  %v792_v52 = vld [vmem:[#allocation12 + $0x268] sm:$0xff]  ;;  %v5296_v53 = vcombine.low %v767_v41, %v775_v42  ;;  %v5298_v54 = vcombine.low %v768_v43, %v776_v44  ;;  %v5285_v41 = vcombine.high %v753_v35, %v761_v36  ;;  %v769_v43 = vld [vmem:[#allocation12 + $0x1b0] sm:$0xff] }
 0x252   : > { %v5315_v56 = vcombine.high %v784_v51, %v792_v52  ;;  %v777_v44 = vld [vmem:[#allocation12 + $0x1f0] sm:$0xff] }
 0x254   : > { %1658 = vmatpush1.bf16.msra.mxu1 %v5308_v59  ;;  %1699 = vmatpush1.bf16.msra.mxu0 %v5310_v60  ;;  %v800_v59 = vld [vmem:[#allocation12 + $0x2a8] sm:$0xff] }
 0x255   : > { %1659 = vmatprep.subr.bf16.mxu1 %v5325_v61  ;;  %1700 = vmatprep.subr.bf16.mxu0 %v5327_v62  ;;  %v808_v60 = vld [vmem:[#allocation12 + $0x2e8] sm:$0xff]  ;;  %v5312_v61 = vcombine.low %v783_v49, %v791_v50  ;;  %v5314_v62 = vcombine.low %v784_v51, %v792_v52  ;;  %v5301_v49 = vcombine.high %v769_v43, %v777_v44  ;;  %v785_v51 = vld [vmem:[#allocation12 + $0x230] sm:$0xff] }
 0x256   : > { %v5331_v0 = vcombine.high %v800_v59, %v808_v60  ;;  %v793_v52 = vld [vmem:[#allocation12 + $0x270] sm:$0xff] }
 0x258   : > { %1660 = vmatpush1.bf16.msra.mxu1 %v5324_v3  ;;  %1701 = vmatpush1.bf16.msra.mxu0 %v5326_v4  ;;  %v816_v3 = vld [vmem:[#allocation12 + $0x328] sm:$0xff] }
 0x259   : > { %1661 = vmatprep.subr.bf16.mxu1 %v5341_v5  ;;  %1702 = vmatprep.subr.bf16.mxu0 %v5343_v6  ;;  %v824_v4 = vld [vmem:[#allocation12 + $0x368] sm:$0xff]  ;;  %v5328_v5 = vcombine.low %v799_v57, %v807_v58  ;;  %v5330_v6 = vcombine.low %v800_v59, %v808_v60  ;;  %v5317_v57 = vcombine.high %v785_v51, %v793_v52  ;;  %v801_v59 = vld [vmem:[#allocation12 + $0x2b0] sm:$0xff] }
 0x25a   : > { %v5347_v8 = vcombine.high %v816_v3, %v824_v4  ;;  %v809_v60 = vld [vmem:[#allocation12 + $0x2f0] sm:$0xff] }
 0x25c   : > { %1662 = vmatpush1.bf16.msra.mxu1 %v5340_v11  ;;  %1703 = vmatpush1.bf16.msra.mxu0 %v5342_v12  ;;  %v832_v11 = vld [vmem:[#allocation12 + $0x3a8] sm:$0xff] }
 0x25d   : > { %1663 = vmatprep.subr.bf16.mxu1 %v5357_v13  ;;  %1704 = vmatprep.subr.bf16.mxu0 %v5359_v14  ;;  %v840_v12 = vld [vmem:[#allocation12 + $0x3e8] sm:$0xff]  ;;  %v5344_v13 = vcombine.low %v815_v1, %v823_v2  ;;  %v5346_v14 = vcombine.low %v816_v3, %v824_v4  ;;  %v5333_v1 = vcombine.high %v801_v59, %v809_v60  ;;  %v817_v3 = vld [vmem:[#allocation12 + $0x330] sm:$0xff] }
 0x25e   : > { %v5363_v17 = vcombine.high %v832_v11, %v840_v12  ;;  %v825_v4 = vld [vmem:[#allocation12 + $0x370] sm:$0xff] }
 0x260   : > { %1664 = vmatpush1.bf16.msra.mxu1 %v5356_v20  ;;  %1705 = vmatpush1.bf16.msra.mxu0 %v5358_v21  ;;  %v722_v20 = vld [vmem:[#allocation12 + $0x38] sm:$0xff] }
 0x261   : > { %1731 = vmatprep.subr.bf16.mxu1 %v5249_v22  ;;  %1772 = vmatprep.subr.bf16.mxu0 %v5251_v23  ;;  %v730_v21 = vld [vmem:[#allocation12 + $0x78] sm:$0xff]  ;;  %v5360_v22 = vcombine.low %v831_v9, %v839_v10  ;;  %v5362_v23 = vcombine.low %v832_v11, %v840_v12  ;;  %v5349_v9 = vcombine.high %v817_v3, %v825_v4  ;;  %v833_v11 = vld [vmem:[#allocation12 + $0x3b0] sm:$0xff] }
 0x262   : > { %v5255_v25 = vcombine.high %v722_v20, %v730_v21  ;;  %v841_v12 = vld [vmem:[#allocation12 + $0x3f0] sm:$0xff] }
 0x263   : > { %1682 = vmatmul.mubr.bf16.vlgmr.msra.gmra.mrb[4].mxu1 %v6915_v28  ;;  %1723 = vmatmul.mubr.bf16.vlgmr.msra.gmra.mrb[8].mxu0 %v6915_v28 }
 0x264   : > { %1732 = vmatpush1.bf16.msra.mxu1 %v5248_v29  ;;  %1773 = vmatpush1.bf16.msra.mxu0 %v5250_v30  ;;  %v738_v29 = vld [vmem:[#allocation12 + $0xb8] sm:$0xff] }
 0x265   : > { %1733 = vmatprep.subr.bf16.mxu1 %v5265_v31  ;;  %1774 = vmatprep.subr.bf16.mxu0 %v5267_v32  ;;  %v746_v30 = vld [vmem:[#allocation12 + $0xf8] sm:$0xff]  ;;  %v5252_v31 = vcombine.low %v721_v18, %v729_v19  ;;  %v5254_v32 = vcombine.low %v722_v20, %v730_v21  ;;  %v5365_v18 = vcombine.high %v833_v11, %v841_v12  ;;  %v2047_v20 = vld [vmem:[#allocation15] sm:$0xff] }
 0x266   : > { %1763 = vmatprep.mubr.bf16.mxu1 %v6451_v16  ;;  %1804 = vmatprep.mubr.bf16.mxu0 %v6451_v16  ;;  %v5271_v34 = vcombine.high %v738_v29, %v746_v30  ;;  %v2051_v21 = vld [vmem:[#allocation15 + $0x20] sm:$0xff] }
 0x268   : > { %1734 = vmatpush1.bf16.msra.mxu1 %v5264_v37  ;;  %1775 = vmatpush1.bf16.msra.mxu0 %v5266_v38  ;;  %v754_v37 = vld [vmem:[#allocation12 + $0x138] sm:$0xff] }
 0x269   : > { %1735 = vmatprep.subr.bf16.mxu1 %v5281_v39  ;;  %1776 = vmatprep.subr.bf16.mxu0 %v5283_v40  ;;  %v762_v38 = vld [vmem:[#allocation12 + $0x178] sm:$0xff]  ;;  %v5268_v39 = vcombine.low %v737_v26, %v745_v27  ;;  %v5270_v40 = vcombine.low %v738_v29, %v746_v30  ;;  %v5377_v26 = vcombine.high %v2047_v20, %v2051_v21 }
 0x26a   : > { %v5287_v42 = vcombine.high %v754_v37, %v762_v38  ;;  %v2048_v29 = vld [vmem:[#allocation15 + $0x8] sm:$0xff] }
 0x26b   : > { %v2052_v30 = vld [vmem:[#allocation15 + $0x28] sm:$0xff] }
 0x26c   : > { %1736 = vmatpush1.bf16.msra.mxu1 %v5280_v45  ;;  %1777 = vmatpush1.bf16.msra.mxu0 %v5282_v46  ;;  %v770_v45 = vld [vmem:[#allocation12 + $0x1b8] sm:$0xff] }
 0x26d   : > { %1737 = vmatprep.subr.bf16.mxu1 %v5297_v47  ;;  %1778 = vmatprep.subr.bf16.mxu0 %v5299_v48  ;;  %v778_v46 = vld [vmem:[#allocation12 + $0x1f8] sm:$0xff]  ;;  %v5284_v47 = vcombine.low %v753_v35, %v761_v36  ;;  %v5286_v48 = vcombine.low %v754_v37, %v762_v38  ;;  %v2050_v35 = vld [vmem:[#allocation15 + $0x18] sm:$0xff]  ;;  %v5378_v38 = vcombine.low %v2048_v29, %v2052_v30 }
 0x26e   : > { %v5303_v50 = vcombine.high %v770_v45, %v778_v46  ;;  %v2054_v36 = vld [vmem:[#allocation15 + $0x38] sm:$0xff] }
 0x270   : > { %1738 = vmatpush1.bf16.msra.mxu1 %v5296_v53  ;;  %1779 = vmatpush1.bf16.msra.mxu0 %v5298_v54  ;;  %v786_v53 = vld [vmem:[#allocation12 + $0x238] sm:$0xff] }
 0x271   : > { %1739 = vmatprep.subr.bf16.mxu1 %v5313_v55  ;;  %1780 = vmatprep.subr.bf16.mxu0 %v5315_v56  ;;  %v794_v54 = vld [vmem:[#allocation12 + $0x278] sm:$0xff]  ;;  %v5300_v55 = vcombine.low %v769_v43, %v777_v44  ;;  %v5302_v56 = vcombine.low %v770_v45, %v778_v46  ;;  %v843_v44 = vld [vmem:[#allocation13] sm:$0xff] }
 0x272   : > { %v5319_v58 = vcombine.high %v786_v53, %v794_v54 }
 0x274   : > { %1740 = vmatpush1.bf16.msra.mxu1 %v5312_v61  ;;  %1781 = vmatpush1.bf16.msra.mxu0 %v5314_v62  ;;  %v802_v61 = vld [vmem:[#allocation12 + $0x2b8] sm:$0xff] }
 0x275   : > { %1741 = vmatprep.subr.bf16.mxu1 %v5329_v63  ;;  %1782 = vmatprep.subr.bf16.mxu0 %v5331_v0  ;;  %v810_v62 = vld [vmem:[#allocation12 + $0x2f8] sm:$0xff]  ;;  %v5316_v63 = vcombine.low %v785_v51, %v793_v52  ;;  %v5318_v0 = vcombine.low %v786_v53, %v794_v54 }
 0x276   : > { %v5335_v2 = vcombine.high %v802_v61, %v810_v62 }
 0x278   : > { %1742 = vmatpush1.bf16.msra.mxu1 %v5328_v5  ;;  %1783 = vmatpush1.bf16.msra.mxu0 %v5330_v6  ;;  %v818_v5 = vld [vmem:[#allocation12 + $0x338] sm:$0xff] }
 0x279   : > { %1743 = vmatprep.subr.bf16.mxu1 %v5345_v7  ;;  %1784 = vmatprep.subr.bf16.mxu0 %v5347_v8  ;;  %v826_v6 = vld [vmem:[#allocation12 + $0x378] sm:$0xff]  ;;  %v5332_v7 = vcombine.low %v801_v59, %v809_v60  ;;  %v5334_v8 = vcombine.low %v802_v61, %v810_v62 }
 0x27a   : > { %v5351_v10 = vcombine.high %v818_v5, %v826_v6 }
 0x27c   : > { %1744 = vmatpush1.bf16.msra.mxu1 %v5344_v13  ;;  %1785 = vmatpush1.bf16.msra.mxu0 %v5346_v14  ;;  %v834_v13 = vld [vmem:[#allocation12 + $0x3b8] sm:$0xff] }
 0x27d   : > { %1745 = vmatprep.subr.bf16.mxu1 %v5361_v15  ;;  %1786 = vmatprep.subr.bf16.mxu0 %v5363_v17  ;;  %v842_v14 = vld [vmem:[#allocation12 + $0x3f8] sm:$0xff]  ;;  %v5348_v15 = vcombine.low %v817_v3, %v825_v4  ;;  %v5350_v17 = vcombine.low %v818_v5, %v826_v6 }
 0x27e   : > { %v5367_v19 = vcombine.high %v834_v13, %v842_v14 }
 0x280   : > { %1746 = vmatpush1.bf16.msra.mxu1 %v5360_v22  ;;  %1787 = vmatpush1.bf16.msra.mxu0 %v5362_v23  ;;  %v2049_v22 = vld [vmem:[#allocation15 + $0x10] sm:$0xff] }
 0x281   : > { %1813 = vmatprep.subr.bf16.mxu1 %v5253_v24  ;;  %1854 = vmatprep.subr.bf16.mxu0 %v5255_v25  ;;  %v2053_v23 = vld [vmem:[#allocation15 + $0x30] sm:$0xff]  ;;  %v5364_v24 = vcombine.low %v833_v11, %v841_v12  ;;  %v5366_v25 = vcombine.low %v834_v13, %v842_v14 }
 0x282   : > { %v5381_v27 = vcombine.high %v2049_v22, %v2053_v23 }
 0x283   : > { %1764 = vmatmul.mubr.bf16.vlgmr.msra.gmra.mrb[8].mxu1 %v6915_v28  ;;  %1805 = vmatmul.mubr.bf16.vlgmr.msra.gmra.mrb[12].mxu0 %v6915_v28 }
 0x284   : > { %1814 = vmatpush1.bf16.msra.mxu1 %v5252_v31  ;;  %1855 = vmatpush1.bf16.msra.mxu0 %v5254_v32  ;;  %v5376_v31 = vcombine.low %v2047_v20, %v2051_v21  ;;  %v5379_v32 = vcombine.high %v2048_v29, %v2052_v30 }
 0x285   : > { %1815 = vmatprep.subr.bf16.mxu1 %v5269_v33  ;;  %1856 = vmatprep.subr.bf16.mxu0 %v5271_v34  ;;  %v5380_v33 = vcombine.low %v2049_v22, %v2053_v23  ;;  %v2045_v34 = vld [vmem:[#allocation5] sm:$0x3] }
 0x286   : > { %1845 = vmatprep.mubr.bf16.mxu1 %v6451_v16  ;;  %1886 = vmatprep.mubr.bf16.mxu0 %v6451_v16  ;;  %v2046_v37 = vpack.c.bf16 %v2045_v34, %v2045_v34 }
 0x288   : > { %1816 = vmatpush1.bf16.msra.mxu1 %v5268_v39  ;;  %1857 = vmatpush1.bf16.msra.mxu0 %v5270_v40  ;;  %v5383_v39 = vcombine.high %v2050_v35, %v2054_v36  ;;  %v847_v40 = vlaneseq }
 0x289   : > { %1817 = vmatprep.subr.bf16.mxu1 %v5285_v41  ;;  %1858 = vmatprep.subr.bf16.mxu0 %v5287_v42 }
 0x28a   : > { %v6935_v41 = vshrl.u32 %v847_v40, 7 }
 0x28c   : > { %1818 = vmatpush1.bf16.msra.mxu1 %v5284_v47  ;;  %1859 = vmatpush1.bf16.msra.mxu0 %v5286_v48  ;;  %v6938_v42 = vsub.s32 0, %v6935_v41  ;;  %v6941_v43 = vsub.s32 2, %v6935_v41  ;;  %v6944_v45 = vsub.s32 1, %v6935_v41  ;;  %v6947_v46 = vsub.s32 3, %v6935_v41 }
 0x28d   : > { %1819 = vmatprep.subr.bf16.mxu1 %v5301_v49  ;;  %1860 = vmatprep.subr.bf16.mxu0 %v5303_v50  ;;  %v6452_v47 = vmov 1966171168   ;;  %v6959_v11 = vsub.s32 4, %v6935_v41  ;;  %v6962_v12 = vsub.s32 6, %v6935_v41  ;;  %v6965_v13 = vsub.s32 5, %v6935_v41 }
 0x28e   : > { %v1948_v48 = vunpack.c.l.s4 %v6452_v47  ;;  %v858_v49 = vrot.slane %v843_v44, %v6941_v43  ;;  %v854_v50 = vrot.slane %v843_v44, %v6944_v45  ;;  %v862_v51 = vrot.slane %v843_v44, %v6947_v46 }
 0x28f   : > { %v6968_v14 = vsub.s32 7, %v6935_v41 }
 0x290   : > { %1820 = vmatpush1.bf16.msra.mxu1 %v5300_v55  ;;  %1861 = vmatpush1.bf16.msra.mxu0 %v5302_v56  ;;  %v1949_v54 = vunpack.c.0.s8 %v1948_v48 }
 0x291   : > { %1821 = vmatprep.subr.bf16.mxu1 %v5317_v57  ;;  %1862 = vmatprep.subr.bf16.mxu0 %v5319_v58 }
 0x292   : > { %v6954_v4 = vsub.s32 %v1949_v54, %v6935_v41 }
 0x294   : > { %1822 = vmatpush1.bf16.msra.mxu1 %v5316_v63  ;;  %1863 = vmatpush1.bf16.msra.mxu0 %v5318_v0 }
 0x295   : > { %1823 = vmatprep.subr.bf16.mxu1 %v5333_v1  ;;  %1864 = vmatprep.subr.bf16.mxu0 %v5335_v2 }
 0x298   : > { %1824 = vmatpush1.bf16.msra.mxu1 %v5332_v7  ;;  %1865 = vmatpush1.bf16.msra.mxu0 %v5334_v8 }
 0x299   : > { %1825 = vmatprep.subr.bf16.mxu1 %v5349_v9  ;;  %1866 = vmatprep.subr.bf16.mxu0 %v5351_v10 }
 0x29c   : > { %1826 = vmatpush1.bf16.msra.mxu1 %v5348_v15  ;;  %1867 = vmatpush1.bf16.msra.mxu0 %v5350_v17  ;;  %v866_v15 = vrot.slane %v843_v44, %v6959_v11  ;;  %v874_v17 = vrot.slane %v843_v44, %v6962_v12 }
 0x29d   : > { %1827 = vmatprep.subr.bf16.mxu1 %v5365_v18  ;;  %1868 = vmatprep.subr.bf16.mxu0 %v5367_v19  ;;  %v870_v18 = vrot.slane %v843_v44, %v6965_v13  ;;  %v878_v19 = vrot.slane %v843_v44, %v6968_v14 }
 0x2a0   : > { %1828 = vmatpush1.bf16.msra.mxu1 %v5364_v24  ;;  %1869 = vmatpush1.bf16.msra.mxu0 %v5366_v25 }
 0x2a1   : > { %2141 = vmatprep.subr.bf16.mxu1 %v5377_v26  ;;  %2223 = vmatprep.subr.bf16.mxu0 %v5381_v27 }
 0x2a3   : > { %1846 = vmatmul.mubr.bf16.vlgmr.msra.gmra.mrb[12].mxu1 %v6915_v28  ;;  %1887 = vmatmul.mubr.bf16.vlgmr.msra.gmra.mrb[16].mxu0 %v6915_v28  ;;  %v5382_v28 = vcombine.low %v2050_v35, %v2054_v36 }
 0x2a4   : > { %2142 = vmatpush1.bf16.msra.mxu1 %v5376_v31  ;;  %2173 = vmatprep.mubr.bf16.mxu1 %v6451_v16 }
 0x2a5   : > { %2182 = vmatprep.subr.bf16.mxu1 %v5379_v32  ;;  %2224 = vmatpush1.bf16.msra.mxu0 %v5380_v33 }
 0x2a6   : > { %2255 = vmatprep.mubr.bf16.mxu0 %v6451_v16 }
 0x2ab   : > { %5384 = vmatmul.mubr.msk.bf16.vlgmr.msra.gmra.mrb[16].mxu1 %vm2137_vm2, %v2046_v37  ;;  %5386 = vmatmul.mubr.msk.bf16.vlgmr.msra.gmra.mrb[20].mxu0 %vm2137_vm2, %v2046_v37 }
 0x2ac   : > { %2183 = vmatpush1.bf16.msra.mxu1 %v5378_v38  ;;  %2214 = vmatprep.mubr.bf16.mxu1 %v6451_v16 }
 0x2ad   : > { %2264 = vmatprep.subr.bf16.mxu1 %v5383_v39 }
 0x2b3   : > { %5385 = vmatmul.mubr.msk.bf16.vlgmr.msra.gmra.mrb[20].mxu1 %vm2137_vm2, %v2046_v37 }
 0x2b4   : > { %2265 = vmatpush1.bf16.msra.mxu1 %v5382_v28  ;;  %2296 = vmatprep.mubr.bf16.mxu1 %v6451_v16  ;;  %v850_v16 = vrot.slane %v843_v44, %v6938_v42 }
 0x2bb   : > { %5387 = vmatmul.mubr.msk.bf16.vlgmr.msra.gmra.mrb[24].mxu1 %vm2137_vm2, %v2046_v37 }
 0x316   : > { %v1601_v52 = vpop.f32.mrb[0].mxu1  ;;  %v1642_v53 = vpop.f32.mrb[4].mxu0 }
 0x317   : > { %v1602_v55 = vadd.f32 %v1601_v52, %v850_v16  ;;  %v1643_v56 = vadd.f32 %v1642_v53, %v858_v49  ;;  %v1603_v57 = vpop.f32.mrb[1].mxu1  ;;  %v1644_v58 = vpop.f32.mrb[5].mxu0  ;;  %v844_v16 = vld [vmem:[#allocation13 + $0x8] sm:$0xff] }
 0x318   : > { %v1604_v59 = vadd.f32 %v1603_v57, %v854_v50  ;;  %v1645_v60 = vadd.f32 %v1644_v58, %v862_v51  ;;  %v1605_v61 = vpop.f32.mrb[2].mxu1  ;;  %v1646_v62 = vpop.f32.mrb[6].mxu0  ;;  %v882_v49 = vrot.slane %v844_v16, %v6938_v42  ;;  %v890_v50 = vrot.slane %v844_v16, %v6941_v43 }
 0x319   : > { %v1895_v63 = vmax.f32 %v1602_v55, 0.0  ;;  %v1897_v0 = vmax.f32 %v1643_v56, 0.0  ;;  %v1606_v1 = vpop.f32.mrb[3].mxu1  ;;  %v1647_v2 = vpop.f32.mrb[7].mxu0  ;;  %v886_v51 = vrot.slane %v844_v16, %v6944_v45  ;;  %v894_v52 = vrot.slane %v844_v16, %v6947_v46 }
 0x31a   : > { %v1896_v3 = vmax.f32 %v1604_v59, 0.0  ;;  %v1898_v5 = vmax.f32 %v1645_v60, 0.0 }
 0x31c   : > { %v5368_v6 = vpack.c.bf16 %v1896_v3, %v1895_v63  ;;  %v5369_v7 = vpack.c.bf16 %v1898_v5, %v1897_v0 }
 0x31e   : > { %v1953_v8 = vrot.slane %v5368_v6, %v6954_v4  ;;  %v1960_v9 = vrot.slane %v5369_v7, %v6954_v4 }
 0x320   : > { %v1975_v10 = vcombine.low %v1953_v8, %v1960_v9 }
 0x322   : > { %v1983_v44 = vrot.slane %v1975_v10, %v6954_v4 }
 0x336   : > { %v1683_v20 = vpop.f32.mrb[4].mxu1  ;;  %v1724_v21 = vpop.f32.mrb[8].mxu0 }
 0x337   : > { %v1684_v22 = vadd.f32 %v1683_v20, %v866_v15  ;;  %v1725_v23 = vadd.f32 %v1724_v21, %v874_v17  ;;  %v1685_v24 = vpop.f32.mrb[5].mxu1  ;;  %v1726_v25 = vpop.f32.mrb[9].mxu0  ;;  %v898_v15 = vrot.slane %v844_v16, %v6959_v11  ;;  %v906_v17 = vrot.slane %v844_v16, %v6962_v12 }
 0x338   : > { %v1686_v26 = vadd.f32 %v1685_v24, %v870_v18  ;;  %v1727_v27 = vadd.f32 %v1726_v25, %v878_v19  ;;  %v1687_v29 = vpop.f32.mrb[6].mxu1  ;;  %v1728_v30 = vpop.f32.mrb[10].mxu0  ;;  %v902_v18 = vrot.slane %v844_v16, %v6965_v13  ;;  %v910_v19 = vrot.slane %v844_v16, %v6968_v14 }
 0x339   : > { %v1899_v31 = vmax.f32 %v1684_v22, 0.0  ;;  %v1901_v32 = vmax.f32 %v1725_v23, 0.0  ;;  %v1688_v33 = vpop.f32.mrb[7].mxu1  ;;  %v1729_v34 = vpop.f32.mrb[11].mxu0 }
 0x33a   : > { %v1900_v35 = vmax.f32 %v1686_v26, 0.0  ;;  %v1902_v36 = vmax.f32 %v1727_v27, 0.0 }
 0x33c   : > { %v5370_v37 = vpack.c.bf16 %v1900_v35, %v1899_v31  ;;  %v5371_v38 = vpack.c.bf16 %v1902_v36, %v1901_v32  ;;  %v2055_v31 = vld [vmem:[#allocation19] sm:$0xff] }
 0x33e   : > { %v1967_v39 = vrot.slane %v5370_v37, %v6954_v4  ;;  %v1974_v28 = vrot.slane %v5371_v38, %v6954_v4  ;;  %v2060_v38 = vrot.slane %v2055_v31, %v6938_v42 }
 0x340   : > { %v1976_v40 = vcombine.low %v1967_v39, %v1974_v28  ;;  %v2076_v39 = vrot.slane %v2055_v31, %v6959_v11 }
 0x342   : > { %v1990_v47 = vrot.slane %v1976_v40, %v6954_v4 }
 0x344   : > { %v1991_v48 = vcombine.low %v1983_v44, %v1990_v47  ;;  %v2064_v44 = vrot.slane %v2055_v31, %v6944_v45  ;;  %v2080_v47 = vrot.slane %v2055_v31, %v6965_v13 }
 0x346   : > { %2043 = vst [vmem:[#allocation2] sm:$0xff] %v1991_v48 }
 0x356   : > { %v1765_v53 = vpop.f32.mrb[8].mxu1  ;;  %v1806_v54 = vpop.f32.mrb[12].mxu0 }
 0x357   : > { %v1766_v55 = vadd.f32 %v1765_v53, %v882_v49  ;;  %v1807_v56 = vadd.f32 %v1806_v54, %v890_v50  ;;  %v1767_v57 = vpop.f32.mrb[9].mxu1  ;;  %v1808_v58 = vpop.f32.mrb[13].mxu0 }
 0x358   : > { %v1768_v59 = vadd.f32 %v1767_v57, %v886_v51  ;;  %v1809_v60 = vadd.f32 %v1808_v58, %v894_v52  ;;  %v1769_v61 = vpop.f32.mrb[10].mxu1  ;;  %v1810_v62 = vpop.f32.mrb[14].mxu0 }
 0x359   : > { %v1903_v63 = vmax.f32 %v1766_v55, 0.0  ;;  %v1905_v0 = vmax.f32 %v1807_v56, 0.0  ;;  %v1770_v1 = vpop.f32.mrb[11].mxu1  ;;  %v1811_v2 = vpop.f32.mrb[15].mxu0  ;;  %v6453_v56 = vmov 1983009808  }
 0x35a   : > { %v1904_v3 = vmax.f32 %v1768_v59, 0.0  ;;  %v1906_v5 = vmax.f32 %v1809_v60, 0.0  ;;  %v2316_v11 = vunpack.c.l.s4 %v6453_v56 }
 0x35c   : > { %v5372_v6 = vpack.c.bf16 %v1904_v3, %v1903_v63  ;;  %v5373_v7 = vpack.c.bf16 %v1906_v5, %v1905_v0  ;;  %v2068_v0 = vrot.slane %v2055_v31, %v6941_v43  ;;  %v2317_v2 = vunpack.c.0.s8 %v2316_v11 }
 0x35d   : > { %v2072_v3 = vrot.slane %v2055_v31, %v6947_v46  ;;  %v2088_v43 = vrot.slane %v2055_v31, %v6968_v14 }
 0x35e   : > { %v2002_v8 = vrot.slane %v5372_v6, %v6954_v4  ;;  %v2009_v9 = vrot.slane %v5373_v7, %v6954_v4 }
 0x360   : > { %v2024_v10 = vcombine.low %v2002_v8, %v2009_v9  ;;  %v2320_v8 = vsub.s32 %v2317_v2, %v6935_v41 }
 0x362   : > { %v2032_v13 = vrot.slane %v2024_v10, %v6954_v4 }
 0x376   : > { %v1847_v20 = vpop.f32.mrb[12].mxu1  ;;  %v1888_v21 = vpop.f32.mrb[16].mxu0 }
 0x377   : > { %v1848_v22 = vadd.f32 %v1847_v20, %v898_v15  ;;  %v1889_v23 = vadd.f32 %v1888_v21, %v906_v17  ;;  %v1849_v24 = vpop.f32.mrb[13].mxu1  ;;  %v1890_v25 = vpop.f32.mrb[17].mxu0 }
 0x378   : > { %v1850_v26 = vadd.f32 %v1849_v24, %v902_v18  ;;  %v1891_v27 = vadd.f32 %v1890_v25, %v910_v19  ;;  %v1851_v29 = vpop.f32.mrb[14].mxu1  ;;  %v1892_v30 = vpop.f32.mrb[18].mxu0 }
 0x379   : > { %v1907_v32 = vmax.f32 %v1848_v22, 0.0  ;;  %v1909_v33 = vmax.f32 %v1889_v23, 0.0  ;;  %v1852_v34 = vpop.f32.mrb[15].mxu1  ;;  %v1893_v35 = vpop.f32.mrb[19].mxu0 }
 0x37a   : > { %v1908_v36 = vmax.f32 %v1850_v26, 0.0  ;;  %v1910_v37 = vmax.f32 %v1891_v27, 0.0 }
 0x37c   : > { %v5374_v28 = vpack.c.bf16 %v1908_v36, %v1907_v32  ;;  %v5375_v40 = vpack.c.bf16 %v1910_v37, %v1909_v33 }
 0x37e   : > { %v2016_v48 = vrot.slane %v5374_v28, %v6954_v4  ;;  %v2023_v16 = vrot.slane %v5375_v40, %v6954_v4  ;;  %v2175_v49 = vpop.f32.mrb[16].mxu1  ;;  %v2257_v50 = vpop.f32.mrb[20].mxu0 }
 0x37f   : > { %v2176_v51 = vadd.f32 %v2175_v49, %v2060_v38  ;;  %v2177_v52 = vpop.f32.mrb[17].mxu1  ;;  %v2258_v53 = vadd.f32 %v2257_v50, %v2076_v39  ;;  %v2259_v54 = vpop.f32.mrb[21].mxu0 }
 0x380   : > { %v2025_v55 = vcombine.low %v2016_v48, %v2023_v16  ;;  %v2178_v42 = vadd.f32 %v2177_v52, %v2064_v44  ;;  %v2179_v57 = vpop.f32.mrb[18].mxu1  ;;  %v2260_v58 = vadd.f32 %v2259_v54, %v2080_v47  ;;  %v2261_v59 = vpop.f32.mrb[22].mxu0 }
 0x381   : > { %v2180_v45 = vpop.f32.mrb[19].mxu1  ;;  %v2262_v60 = vpop.f32.mrb[23].mxu0 }
 0x382   : > { %v2039_v61 = vrot.slane %v2025_v55, %v6954_v4  ;;  %v2313_v62 = vcombine.low %v2176_v51, %v2178_v42  ;;  %v2330_v63 = vcombine.low %v2258_v53, %v2260_v58  ;;  %v2084_v4 = vrot.slane %v2055_v31, %v6962_v12 }
 0x384   : > { %v2040_v1 = vcombine.low %v2032_v13, %v2039_v61  ;;  %v2321_v18 = vrot.slane %v2313_v62, %v2320_v8  ;;  %v2338_v26 = vrot.slane %v2330_v63, %v2320_v8 }
 0x386   : > { %2044 = vst [vmem:[#allocation2 + $0x8] sm:$0xff] %v2040_v1  ;;  %v2216_v5 = vpop.f32.mrb[20].mxu1 }
 0x387   : > { %v2217_v6 = vadd.f32 %v2216_v5, %v2068_v0  ;;  %v2218_v7 = vpop.f32.mrb[21].mxu1 }
 0x388   : > { %v2219_v9 = vadd.f32 %v2218_v7, %v2072_v3  ;;  %v2220_v15 = vpop.f32.mrb[22].mxu1 }
 0x389   : > { %v2221_v17 = vpop.f32.mrb[23].mxu1 }
 0x38a   : > { %v2314_v10 = vcombine.low %v2217_v6, %v2219_v9 }
 0x38c   : > { %v2328_v19 = vrot.slane %v2314_v10, %v2320_v8 }
 0x38e   : > { %v2329_v20 = vcombine.low %v2321_v18, %v2328_v19  ;;  %v2298_v21 = vpop.f32.mrb[24].mxu1 }
 0x38f   : > { %v2299_v22 = vadd.f32 %v2298_v21, %v2084_v4  ;;  %v2300_v46 = vpop.f32.mrb[25].mxu1 }
 0x390   : > { %2349 = vst [vmem:[#allocation3] sm:$0xff] %v2329_v20  ;;  %v2301_v23 = vadd.f32 %v2300_v46, %v2088_v43  ;;  %v2302_v24 = vpop.f32.mrb[26].mxu1 }
 0x391   : > { %v2303_v25 = vpop.f32.mrb[27].mxu1 }
 0x392   : > { %v2331_v41 = vcombine.low %v2299_v22, %v2301_v23 }
 0x394   : > { %v2345_v27 = vrot.slane %v2331_v41, %v2320_v8 }
 0x396   : > { %v2346_v29 = vcombine.low %v2338_v26, %v2345_v27 }
 0x398   : > { %2350 = vst [vmem:[#allocation3 + $0x8] sm:$0xff] %v2346_v29 }
 0x399 PF: > { %v2357_v12 = vld [vmem:[%s6893_s22 + $0x8] sm:$0xff]  ;;  %v2359_v14 = vld [vmem:[%s6893_s22 + $0x18] sm:$0xff]  ;;  %v2356_v30 = vld [vmem:[%s6893_s22] sm:$0xff]  ;;  %s5388_s21 = sshll.u32 %s6555_s20, 10  ;;  %v3131_v59 = vlaneseq  ;;  %v6454_v62 = vmov 1966171168  }
 0x39a   : > { %v2613_v31 = vunpack.c.l.s8.bf16 %v2357_v12  ;;  %v2621_v32 = vunpack.c.h.s8.bf16 %v2357_v12  ;;  %v2615_v33 = vunpack.c.l.s8.bf16 %v2359_v14  ;;  %v2623_v34 = vunpack.c.h.s8.bf16 %v2359_v14  ;;  %v2358_v35 = vld [vmem:[%s6893_s22 + $0x10] sm:$0xff]  ;;  %v2365_v38 = vld [vmem:[%s6893_s22 + $0x48] sm:$0xff]  ;;  %v2367_v39 = vld [vmem:[%s6893_s22 + $0x58] sm:$0xff]  ;;  %s2352_s19 = sshra.s32 %s5388_s21, 7  ;;  %p5389_p0 = scmp.ne.s32.totalorder %s6555_s20, 1 }
 0x39b   : > { %v2612_v36 = vunpack.c.l.s8.bf16 %v2356_v30  ;;  %v2614_v37 = vunpack.c.l.s8.bf16 %v2358_v35  ;;  %v2620_v28 = vunpack.c.h.s8.bf16 %v2356_v30  ;;  %v2622_v40 = vunpack.c.h.s8.bf16 %v2358_v35  ;;  %v2364_v48 = vld [vmem:[%s6893_s22 + $0x40] sm:$0xff]  ;;  %v2366_v16 = vld [vmem:[%s6893_s22 + $0x50] sm:$0xff]  ;;  %v2373_v53 = vld [vmem:[%s6893_s22 + $0x88] sm:$0xff]  ;;  %s2354_s23 = scalar_lea.vmem [#allocation2], %s2352_s19  ;;  %s7551_s28 = sld [smem:[#allocation35_spill]] (!%p5389_p0) }
 0x39c   : > { %3184 = vmatprep.subr.bf16.mxu0 %v2613_v31  ;;  %3348 = vmatprep.subr.bf16.mxu1 %v2615_v33  ;;  %v2629_v44 = vunpack.c.l.s8.bf16 %v2365_v38  ;;  %v2631_v47 = vunpack.c.l.s8.bf16 %v2367_v39  ;;  %v2628_v49 = vunpack.c.l.s8.bf16 %v2364_v48  ;;  %v2630_v50 = vunpack.c.l.s8.bf16 %v2366_v16  ;;  %v2375_v54 = vld [vmem:[%s6893_s22 + $0x98] sm:$0xff]  ;;  %v2372_v57 = vld [vmem:[%s6893_s22 + $0x80] sm:$0xff]  ;;  %v2374_v58 = vld [vmem:[%s6893_s22 + $0x90] sm:$0xff]  ;;  %s7552_s7 = sld [smem:[#allocation36_spill]] (!%p5389_p0) }
 0x39d   : > { %3185 = vmatpush1.bf16.msra.mxu0 %v2612_v36  ;;  %3349 = vmatpush1.bf16.msra.mxu1 %v2614_v37  ;;  %v2637_v51 = vunpack.c.h.s8.bf16 %v2365_v38  ;;  %v2639_v52 = vunpack.c.h.s8.bf16 %v2367_v39  ;;  %v2636_v55 = vunpack.c.h.s8.bf16 %v2364_v48  ;;  %v2638_v42 = vunpack.c.h.s8.bf16 %v2366_v16  ;;  %v2381_v1 = vld [vmem:[%s6893_s22 + $0xc8] sm:$0xff]  ;;  %v2383_v2 = vld [vmem:[%s6893_s22 + $0xd8] sm:$0xff]  ;;  %v2380_v15 = vld [vmem:[%s6893_s22 + $0xc0] sm:$0xff] }
 0x39e   : > { %3186 = vmatprep.subr.bf16.mxu0 %v2621_v32  ;;  %3350 = vmatprep.subr.bf16.mxu1 %v2623_v34  ;;  %v2645_v56 = vunpack.c.l.s8.bf16 %v2373_v53  ;;  %v2647_v11 = vunpack.c.l.s8.bf16 %v2375_v54  ;;  %v2644_v45 = vunpack.c.l.s8.bf16 %v2372_v57  ;;  %v2646_v60 = vunpack.c.l.s8.bf16 %v2374_v58  ;;  %v7018_v7 = vld [vmem:[%s2354_s23] sm:$0xff]  ;;  %v2391_v46 = vld [vmem:[%s6893_s22 + $0x118] sm:$0xff]  ;;  %v2388_v27 = vld [vmem:[%s6893_s22 + $0x100] sm:$0xff] }
 0x39f   : > { %v2653_v13 = vunpack.c.h.s8.bf16 %v2373_v53  ;;  %v2655_v61 = vunpack.c.h.s8.bf16 %v2375_v54  ;;  %v3129_v63 = vunpack.c.l.s4 %v6454_v62  ;;  %v7014_v0 = vshrl.u32 %v3131_v59, 7  ;;  %v2382_v17 = vld [vmem:[%s6893_s22 + $0xd0] sm:$0xff]  ;;  %v2389_v22 = vld [vmem:[%s6893_s22 + $0x108] sm:$0xff]  ;;  %v2399_v33 = vld [vmem:[%s6893_s22 + $0x158] sm:$0xff] }
 0x3a0   : > { %v2652_v5 = vunpack.c.h.s8.bf16 %v2372_v57  ;;  %v2654_v6 = vunpack.c.h.s8.bf16 %v2374_v58  ;;  %v2661_v8 = vunpack.c.l.s8.bf16 %v2381_v1  ;;  %v2663_v9 = vunpack.c.l.s8.bf16 %v2383_v2  ;;  %v2390_v29 = vld [vmem:[%s6893_s22 + $0x110] sm:$0xff]  ;;  %v2397_v32 = vld [vmem:[%s6893_s22 + $0x148] sm:$0xff]  ;;  %v2396_v38 = vld [vmem:[%s6893_s22 + $0x140] sm:$0xff] }
 0x3a1   : > { %3187 = vmatpush1.bf16.msra.mxu0 %v2620_v28  ;;  %3351 = vmatpush1.bf16.msra.mxu1 %v2622_v40  ;;  %v3130_v3 = vunpack.c.0.s8 %v3129_v63  ;;  %v2660_v18 = vunpack.c.l.s8.bf16 %v2380_v15  ;;  %v2662_v19 = vunpack.c.l.s8.bf16 %v2382_v17  ;;  %v2669_v43 = vunpack.c.h.s8.bf16 %v2381_v1  ;;  %v2398_v39 = vld [vmem:[%s6893_s22 + $0x150] sm:$0xff]  ;;  %v2405_v48 = vld [vmem:[%s6893_s22 + $0x188] sm:$0xff]  ;;  %v2407_v16 = vld [vmem:[%s6893_s22 + $0x198] sm:$0xff] }
 0x3a2   : > { %3188 = vmatprep.subr.bf16.mxu0 %v2629_v44  ;;  %3352 = vmatprep.subr.bf16.mxu1 %v2631_v47  ;;  %v2671_v20 = vunpack.c.h.s8.bf16 %v2383_v2  ;;  %v2668_v24 = vunpack.c.h.s8.bf16 %v2380_v15  ;;  %v2670_v25 = vunpack.c.h.s8.bf16 %v2382_v17  ;;  %v2677_v26 = vunpack.c.l.s8.bf16 %v2389_v22  ;;  %v2404_v53 = vld [vmem:[%s6893_s22 + $0x180] sm:$0xff]  ;;  %v2406_v54 = vld [vmem:[%s6893_s22 + $0x190] sm:$0xff]  ;;  %v2413_v57 = vld [vmem:[%s6893_s22 + $0x1c8] sm:$0xff] }
 0x3a3   : > { %v7023_v10 = vsub.s32 %v3130_v3, %v7014_v0  ;;  %v2679_v41 = vunpack.c.l.s8.bf16 %v2391_v46  ;;  %v2676_v12 = vunpack.c.l.s8.bf16 %v2388_v27  ;;  %v2678_v14 = vunpack.c.l.s8.bf16 %v2390_v29  ;;  %v2415_v58 = vld [vmem:[%s6893_s22 + $0x1d8] sm:$0xff]  ;;  %v2414_v62 = vld [vmem:[%s6893_s22 + $0x1d0] sm:$0xff] }
 0x3a4   : > { %v2685_v30 = vunpack.c.h.s8.bf16 %v2389_v22  ;;  %v2687_v31 = vunpack.c.h.s8.bf16 %v2391_v46  ;;  %v2684_v34 = vunpack.c.h.s8.bf16 %v2388_v27  ;;  %v2686_v35 = vunpack.c.h.s8.bf16 %v2390_v29  ;;  %v2429_v27 = vld [vmem:[%s6893_s22 + $0x248] sm:$0xff] }
 0x3a5   : > { %3189 = vmatpush1.bf16.msra.mxu0 %v2628_v49  ;;  %3353 = vmatpush1.bf16.msra.mxu1 %v2630_v50  ;;  %v7027_v4 = vrot.slane %v7018_v7, %v7023_v10  ;;  %v2693_v36 = vunpack.c.l.s8.bf16 %v2397_v32  ;;  %v2695_v37 = vunpack.c.l.s8.bf16 %v2399_v33  ;;  %v2692_v28 = vunpack.c.l.s8.bf16 %v2396_v38 }
 0x3a6   : > { %3190 = vmatprep.subr.bf16.mxu0 %v2637_v51  ;;  %3354 = vmatprep.subr.bf16.mxu1 %v2639_v52  ;;  %v2694_v40 = vunpack.c.l.s8.bf16 %v2398_v39  ;;  %v2701_v44 = vunpack.c.h.s8.bf16 %v2397_v32  ;;  %v2703_v47 = vunpack.c.h.s8.bf16 %v2399_v33  ;;  %v2700_v49 = vunpack.c.h.s8.bf16 %v2396_v38  ;;  %v2430_v32 = vld [vmem:[%s6893_s22 + $0x250] sm:$0xff]  ;;  %v2439_v38 = vld [vmem:[%s6893_s22 + $0x298] sm:$0xff] }
 0x3a7   : > { %v3142_v21 = vcombine.high %v7027_v4, %v7027_v4  ;;  %v2702_v50 = vunpack.c.h.s8.bf16 %v2398_v39  ;;  %v2709_v51 = vunpack.c.l.s8.bf16 %v2405_v48  ;;  %v2711_v52 = vunpack.c.l.s8.bf16 %v2407_v16 }
 0x3a8   : > { %v2716_v59 = vunpack.c.h.s8.bf16 %v2404_v53  ;;  %v2726_v1 = vunpack.c.l.s8.bf16 %v2414_v62  ;;  %v2733_v2 = vunpack.c.h.s8.bf16 %v2413_v57  ;;  %v2735_v3 = vunpack.c.h.s8.bf16 %v2415_v58 }
 0x3a9   : > { %3191 = vmatpush1.bf16.msra.mxu0 %v2636_v55  ;;  %3355 = vmatpush1.bf16.msra.mxu1 %v2638_v42  ;;  %v7034_v23 = vrot.slane %v3142_v21, %v7023_v10  ;;  %v2708_v55 = vunpack.c.l.s8.bf16 %v2404_v53  ;;  %v2710_v42 = vunpack.c.l.s8.bf16 %v2406_v54  ;;  %v2734_v15 = vunpack.c.h.s8.bf16 %v2414_v62  ;;  %v2447_v53 = vld [vmem:[%s6893_s22 + $0x2d8] sm:$0xff] }
 0x3aa   : > { %3192 = vmatprep.subr.bf16.mxu0 %v2645_v56  ;;  %3356 = vmatprep.subr.bf16.mxu1 %v2647_v11  ;;  %v2717_v56 = vunpack.c.h.s8.bf16 %v2405_v48  ;;  %v2719_v11 = vunpack.c.h.s8.bf16 %v2407_v16  ;;  %v7061_v21 = vrot.slane %v7027_v4, %v7023_v10  ;;  %v2431_v4 = vld [vmem:[%s6893_s22 + $0x258] sm:$0xff]  ;;  %v2438_v48 = vld [vmem:[%s6893_s22 + $0x290] sm:$0xff]  ;;  %vm5053_vm3 = vcmask (!%p5389_p0), 1024  }
 0x3ab   : > { %3216 = vmatprep.mubr.bf16.mxu0 %v7034_v23  ;;  %3380 = vmatprep.mubr.bf16.mxu1 %v7034_v23  ;;  %v7073_v29 = vcombine.high %v7034_v23, %v7034_v23 }
 0x3ad   : > { %3193 = vmatpush1.bf16.msra.mxu0 %v2644_v45  ;;  %3357 = vmatpush1.bf16.msra.mxu1 %v2646_v60  ;;  %v2718_v45 = vunpack.c.h.s8.bf16 %v2406_v54  ;;  %v2725_v60 = vunpack.c.l.s8.bf16 %v2413_v57  ;;  %v2446_v57 = vld [vmem:[%s6893_s22 + $0x2d0] sm:$0xff] }
 0x3ae   : > { %3194 = vmatprep.subr.bf16.mxu0 %v2653_v13  ;;  %3358 = vmatprep.subr.bf16.mxu1 %v2655_v61  ;;  %v2727_v13 = vunpack.c.l.s8.bf16 %v2415_v58  ;;  %v2412_v61 = vld [vmem:[%s6893_s22 + $0x1c0] sm:$0xff] }
 0x3af   : > { %v2724_v63 = vunpack.c.l.s8.bf16 %v2412_v61 }
 0x3b1   : > { %3195 = vmatpush1.bf16.msra.mxu0 %v2652_v5  ;;  %3359 = vmatpush1.bf16.msra.mxu1 %v2654_v6  ;;  %v2421_v5 = vld [vmem:[%s6893_s22 + $0x208] sm:$0xff]  ;;  %v2423_v6 = vld [vmem:[%s6893_s22 + $0x218] sm:$0xff] }
 0x3b2   : > { %3196 = vmatprep.subr.bf16.mxu0 %v2661_v8  ;;  %3360 = vmatprep.subr.bf16.mxu1 %v2663_v9  ;;  %v3127_v8 = vcombine.high %v7018_v7, %v7018_v7  ;;  %v2732_v9 = vunpack.c.h.s8.bf16 %v2412_v61  ;;  %v2741_v17 = vunpack.c.l.s8.bf16 %v2421_v5  ;;  %v2455_v61 = vld [vmem:[%s6893_s22 + $0x318] sm:$0xff] }
 0x3b5   : > { %3197 = vmatpush1.bf16.msra.mxu0 %v2660_v18  ;;  %3361 = vmatpush1.bf16.msra.mxu1 %v2662_v19  ;;  %v2743_v18 = vunpack.c.l.s8.bf16 %v2423_v6  ;;  %v2420_v19 = vld [vmem:[%s6893_s22 + $0x200] sm:$0xff] }
 0x3b6   : > { %3198 = vmatprep.subr.bf16.mxu0 %v2669_v43  ;;  %3362 = vmatprep.subr.bf16.mxu1 %v2671_v20  ;;  %v2422_v43 = vld [vmem:[%s6893_s22 + $0x210] sm:$0xff]  ;;  %v3141_v20 = vrot.slane %v3127_v8, %v7023_v10  ;;  %v2740_v7 = vunpack.c.l.s8.bf16 %v2420_v19 }
 0x3b7   : > { %v2742_v46 = vunpack.c.l.s8.bf16 %v2422_v43 }
 0x3b8   : > { %v3143_v22 = vcombine.high %v3141_v20, %v3141_v20 }
 0x3b9   : > { %3199 = vmatpush1.bf16.msra.mxu0 %v2668_v24  ;;  %3363 = vmatpush1.bf16.msra.mxu1 %v2670_v25  ;;  %v2749_v24 = vunpack.c.h.s8.bf16 %v2421_v5  ;;  %v2751_v25 = vunpack.c.h.s8.bf16 %v2423_v6  ;;  %v2454_v5 = vld [vmem:[%s6893_s22 + $0x310] sm:$0xff] }
 0x3ba   : > { %3200 = vmatprep.subr.bf16.mxu0 %v2677_v26  ;;  %3364 = vmatprep.subr.bf16.mxu1 %v2679_v41  ;;  %v7064_v26 = vrot.slane %v3143_v22, %v7023_v10  ;;  %v7067_v41 = vrot.slane %v3141_v20, %v7023_v10  ;;  %v2757_v10 = vunpack.c.l.s8.bf16 %v2429_v27  ;;  %v2806_v8 = vunpack.c.l.s8.bf16 %v2454_v5 }
 0x3bd   : > { %3201 = vmatpush1.bf16.msra.mxu0 %v2676_v12  ;;  %3365 = vmatpush1.bf16.msra.mxu1 %v2678_v14  ;;  %v2748_v12 = vunpack.c.h.s8.bf16 %v2420_v19  ;;  %v2750_v14 = vunpack.c.h.s8.bf16 %v2422_v43  ;;  %v2814_v43 = vunpack.c.h.s8.bf16 %v2454_v5 }
 0x3be   : > { %3202 = vmatprep.subr.bf16.mxu0 %v2685_v30  ;;  %3366 = vmatprep.subr.bf16.mxu1 %v2687_v31  ;;  %v2759_v30 = vunpack.c.l.s8.bf16 %v2431_v4  ;;  %v2428_v31 = vld [vmem:[%s6893_s22 + $0x240] sm:$0xff] }
 0x3bf   : > { %v2756_v33 = vunpack.c.l.s8.bf16 %v2428_v31  ;;  %v2764_v39 = vunpack.c.h.s8.bf16 %v2428_v31 }
 0x3c1   : > { %3203 = vmatpush1.bf16.msra.mxu0 %v2684_v34  ;;  %3367 = vmatpush1.bf16.msra.mxu1 %v2686_v35  ;;  %v2758_v34 = vunpack.c.l.s8.bf16 %v2430_v32  ;;  %v2765_v35 = vunpack.c.h.s8.bf16 %v2429_v27 }
 0x3c2   : > { %3204 = vmatprep.subr.bf16.mxu0 %v2693_v36  ;;  %3368 = vmatprep.subr.bf16.mxu1 %v2695_v37  ;;  %v2767_v36 = vunpack.c.h.s8.bf16 %v2431_v4  ;;  %v2437_v37 = vld [vmem:[%s6893_s22 + $0x288] sm:$0xff] }
 0x3c5   : > { %3205 = vmatpush1.bf16.msra.mxu0 %v2692_v28  ;;  %3369 = vmatpush1.bf16.msra.mxu1 %v2694_v40  ;;  %v2766_v28 = vunpack.c.h.s8.bf16 %v2430_v32  ;;  %v2773_v40 = vunpack.c.l.s8.bf16 %v2437_v37 }
 0x3c6   : > { %3206 = vmatprep.subr.bf16.mxu0 %v2701_v44  ;;  %3370 = vmatprep.subr.bf16.mxu1 %v2703_v47  ;;  %v2775_v44 = vunpack.c.l.s8.bf16 %v2439_v38  ;;  %v2436_v47 = vld [vmem:[%s6893_s22 + $0x280] sm:$0xff] }
 0x3c7   : > { %v2772_v16 = vunpack.c.l.s8.bf16 %v2436_v47  ;;  %v2780_v54 = vunpack.c.h.s8.bf16 %v2436_v47 }
 0x3c9   : > { %3207 = vmatpush1.bf16.msra.mxu0 %v2700_v49  ;;  %3371 = vmatpush1.bf16.msra.mxu1 %v2702_v50  ;;  %v2774_v49 = vunpack.c.l.s8.bf16 %v2438_v48  ;;  %v2781_v50 = vunpack.c.h.s8.bf16 %v2437_v37 }
 0x3ca   : > { %3208 = vmatprep.subr.bf16.mxu0 %v2709_v51  ;;  %3372 = vmatprep.subr.bf16.mxu1 %v2711_v52  ;;  %v2783_v51 = vunpack.c.h.s8.bf16 %v2439_v38  ;;  %v2445_v52 = vld [vmem:[%s6893_s22 + $0x2c8] sm:$0xff] }
 0x3cd   : > { %3209 = vmatpush1.bf16.msra.mxu0 %v2708_v55  ;;  %3373 = vmatpush1.bf16.msra.mxu1 %v2710_v42  ;;  %v2782_v55 = vunpack.c.h.s8.bf16 %v2438_v48  ;;  %v2789_v42 = vunpack.c.l.s8.bf16 %v2445_v52 }
 0x3ce   : > { %3210 = vmatprep.subr.bf16.mxu0 %v2717_v56  ;;  %3374 = vmatprep.subr.bf16.mxu1 %v2719_v11  ;;  %v2791_v56 = vunpack.c.l.s8.bf16 %v2447_v53  ;;  %v2444_v11 = vld [vmem:[%s6893_s22 + $0x2c0] sm:$0xff] }
 0x3cf   : > { %v2788_v58 = vunpack.c.l.s8.bf16 %v2444_v11  ;;  %v2796_v62 = vunpack.c.h.s8.bf16 %v2444_v11 }
 0x3d1   : > { %3211 = vmatpush1.bf16.msra.mxu0 %v2716_v59  ;;  %3375 = vmatpush1.bf16.msra.mxu1 %v2718_v45  ;;  %v2790_v59 = vunpack.c.l.s8.bf16 %v2446_v57  ;;  %v2797_v45 = vunpack.c.h.s8.bf16 %v2445_v52 }
 0x3d2   : > { %3212 = vmatprep.subr.bf16.mxu0 %v2725_v60  ;;  %3376 = vmatprep.subr.bf16.mxu1 %v2727_v13  ;;  %v2799_v60 = vunpack.c.h.s8.bf16 %v2447_v53  ;;  %v2453_v13 = vld [vmem:[%s6893_s22 + $0x308] sm:$0xff] }
 0x3d5   : > { %3213 = vmatpush1.bf16.msra.mxu0 %v2724_v63  ;;  %3377 = vmatpush1.bf16.msra.mxu1 %v2726_v1  ;;  %v2798_v63 = vunpack.c.h.s8.bf16 %v2446_v57  ;;  %v2805_v1 = vunpack.c.l.s8.bf16 %v2453_v13 }
 0x3d6   : > { %3214 = vmatprep.subr.bf16.mxu0 %v2733_v2  ;;  %3378 = vmatprep.subr.bf16.mxu1 %v2735_v3  ;;  %v2807_v2 = vunpack.c.l.s8.bf16 %v2455_v61  ;;  %v2452_v3 = vld [vmem:[%s6893_s22 + $0x300] sm:$0xff] }
 0x3d7   : > { %v2804_v6 = vunpack.c.l.s8.bf16 %v2452_v3  ;;  %v2812_v19 = vunpack.c.h.s8.bf16 %v2452_v3 }
 0x3d9   : > { %3215 = vmatpush1.bf16.msra.mxu0 %v2732_v9  ;;  %3379 = vmatpush1.bf16.msra.mxu1 %v2734_v15  ;;  %v2813_v9 = vunpack.c.h.s8.bf16 %v2453_v13  ;;  %v2815_v15 = vunpack.c.h.s8.bf16 %v2455_v61 }
 0x3da   : > { %3225 = vmatprep.subr.bf16.mxu0 %v2741_v17  ;;  %3389 = vmatprep.subr.bf16.mxu1 %v2743_v18  ;;  %v2461_v17 = vld [vmem:[%s6893_s22 + $0x348] sm:$0xff]  ;;  %v2463_v18 = vld [vmem:[%s6893_s22 + $0x358] sm:$0xff] }
 0x3db   : > { %v2821_v20 = vunpack.c.l.s8.bf16 %v2461_v17  ;;  %v2823_v22 = vunpack.c.l.s8.bf16 %v2463_v18  ;;  %v2829_v27 = vunpack.c.h.s8.bf16 %v2461_v17  ;;  %v2831_v4 = vunpack.c.h.s8.bf16 %v2463_v18 }
 0x3dc   : > { %3217 = vmatmul.mubr.bf16.vlgmr.msra.gmra.mrb[0].mxu0 %v7061_v21  ;;  %3381 = vmatmul.mubr.bf16.vlgmr.msra.gmra.mrb[0].mxu1 %v7061_v21 }
 0x3dd   : > { %3226 = vmatpush1.bf16.msra.mxu0 %v2740_v7  ;;  %3390 = vmatpush1.bf16.msra.mxu1 %v2742_v46  ;;  %v2460_v7 = vld [vmem:[%s6893_s22 + $0x340] sm:$0xff]  ;;  %v2462_v46 = vld [vmem:[%s6893_s22 + $0x350] sm:$0xff] }
 0x3de   : > { %3227 = vmatprep.subr.bf16.mxu0 %v2749_v24  ;;  %3391 = vmatprep.subr.bf16.mxu1 %v2751_v25  ;;  %v2820_v24 = vunpack.c.l.s8.bf16 %v2460_v7  ;;  %v2822_v25 = vunpack.c.l.s8.bf16 %v2462_v46 }
 0x3df   : > { %3257 = vmatprep.mubr.bf16.mxu0 %v7073_v29  ;;  %3421 = vmatprep.mubr.bf16.mxu1 %v7073_v29 }
 0x3e1   : > { %3228 = vmatpush1.bf16.msra.mxu0 %v2748_v12  ;;  %3392 = vmatpush1.bf16.msra.mxu1 %v2750_v14  ;;  %v2469_v12 = vld [vmem:[%s6893_s22 + $0x388] sm:$0xff]  ;;  %v2471_v14 = vld [vmem:[%s6893_s22 + $0x398] sm:$0xff] }
 0x3e2   : > { %3229 = vmatprep.subr.bf16.mxu0 %v2757_v10  ;;  %3393 = vmatprep.subr.bf16.mxu1 %v2759_v30  ;;  %v2828_v10 = vunpack.c.h.s8.bf16 %v2460_v7  ;;  %v2830_v30 = vunpack.c.h.s8.bf16 %v2462_v46  ;;  %v2837_v31 = vunpack.c.l.s8.bf16 %v2469_v12  ;;  %v2839_v32 = vunpack.c.l.s8.bf16 %v2471_v14 }
 0x3e3   : > { %v2845_v37 = vunpack.c.h.s8.bf16 %v2469_v12  ;;  %v2847_v38 = vunpack.c.h.s8.bf16 %v2471_v14 }
 0x3e5   : > { %3230 = vmatpush1.bf16.msra.mxu0 %v2756_v33  ;;  %3394 = vmatpush1.bf16.msra.mxu1 %v2758_v34  ;;  %v2468_v33 = vld [vmem:[%s6893_s22 + $0x380] sm:$0xff]  ;;  %v2470_v34 = vld [vmem:[%s6893_s22 + $0x390] sm:$0xff] }
 0x3e6   : > { %3231 = vmatprep.subr.bf16.mxu0 %v2765_v35  ;;  %3395 = vmatprep.subr.bf16.mxu1 %v2767_v36  ;;  %v2836_v35 = vunpack.c.l.s8.bf16 %v2468_v33  ;;  %v2838_v36 = vunpack.c.l.s8.bf16 %v2470_v34 }
 0x3e9   : > { %3232 = vmatpush1.bf16.msra.mxu0 %v2764_v39  ;;  %3396 = vmatpush1.bf16.msra.mxu1 %v2766_v28  ;;  %v2477_v39 = vld [vmem:[%s6893_s22 + $0x3c8] sm:$0xff]  ;;  %v2479_v28 = vld [vmem:[%s6893_s22 + $0x3d8] sm:$0xff] }
 0x3ea   : > { %3233 = vmatprep.subr.bf16.mxu0 %v2773_v40  ;;  %3397 = vmatprep.subr.bf16.mxu1 %v2775_v44  ;;  %v2844_v40 = vunpack.c.h.s8.bf16 %v2468_v33  ;;  %v2846_v44 = vunpack.c.h.s8.bf16 %v2470_v34  ;;  %v2853_v47 = vunpack.c.l.s8.bf16 %v2477_v39  ;;  %v2855_v48 = vunpack.c.l.s8.bf16 %v2479_v28 }
 0x3eb   : > { %v2861_v52 = vunpack.c.h.s8.bf16 %v2477_v39  ;;  %v2863_v53 = vunpack.c.h.s8.bf16 %v2479_v28 }
 0x3ed   : > { %3234 = vmatpush1.bf16.msra.mxu0 %v2772_v16  ;;  %3398 = vmatpush1.bf16.msra.mxu1 %v2774_v49  ;;  %v2476_v16 = vld [vmem:[%s6893_s22 + $0x3c0] sm:$0xff]  ;;  %v2478_v49 = vld [vmem:[%s6893_s22 + $0x3d0] sm:$0xff] }
 0x3ee   : > { %3235 = vmatprep.subr.bf16.mxu0 %v2781_v50  ;;  %3399 = vmatprep.subr.bf16.mxu1 %v2783_v51  ;;  %v2852_v50 = vunpack.c.l.s8.bf16 %v2476_v16  ;;  %v2854_v51 = vunpack.c.l.s8.bf16 %v2478_v49 }
 0x3f1   : > { %3236 = vmatpush1.bf16.msra.mxu0 %v2780_v54  ;;  %3400 = vmatpush1.bf16.msra.mxu1 %v2782_v55  ;;  %v2485_v54 = vld [vmem:[%s6893_s22 + $0x408] sm:$0xff]  ;;  %v2487_v55 = vld [vmem:[%s6893_s22 + $0x418] sm:$0xff] }
 0x3f2   : > { %3237 = vmatprep.subr.bf16.mxu0 %v2789_v42  ;;  %3401 = vmatprep.subr.bf16.mxu1 %v2791_v56  ;;  %v2860_v42 = vunpack.c.h.s8.bf16 %v2476_v16  ;;  %v2862_v56 = vunpack.c.h.s8.bf16 %v2478_v49  ;;  %v2869_v11 = vunpack.c.l.s8.bf16 %v2485_v54  ;;  %v2871_v57 = vunpack.c.l.s8.bf16 %v2487_v55 }
 0x3f3   : > { %v2877_v61 = vunpack.c.h.s8.bf16 %v2485_v54 }
 0x3f5   : > { %3238 = vmatpush1.bf16.msra.mxu0 %v2788_v58  ;;  %3402 = vmatpush1.bf16.msra.mxu1 %v2790_v59  ;;  %v2484_v58 = vld [vmem:[%s6893_s22 + $0x400] sm:$0xff]  ;;  %v2486_v59 = vld [vmem:[%s6893_s22 + $0x410] sm:$0xff] }
 0x3f6   : > { %3239 = vmatprep.subr.bf16.mxu0 %v2797_v45  ;;  %3403 = vmatprep.subr.bf16.mxu1 %v2799_v60  ;;  %v7111_v45 = vcombine.high %v7061_v21, %v7061_v21  ;;  %v2868_v60 = vunpack.c.l.s8.bf16 %v2484_v58  ;;  %v2870_v13 = vunpack.c.l.s8.bf16 %v2486_v59  ;;  %v2878_v3 = vunpack.c.h.s8.bf16 %v2486_v59 }
 0x3f9   : > { %3240 = vmatpush1.bf16.msra.mxu0 %v2796_v62  ;;  %3404 = vmatpush1.bf16.msra.mxu1 %v2798_v63  ;;  %v2879_v62 = vunpack.c.h.s8.bf16 %v2487_v55  ;;  %v2493_v63 = vld [vmem:[%s6893_s22 + $0x448] sm:$0xff] }
 0x3fa   : > { %3241 = vmatprep.subr.bf16.mxu0 %v2805_v1  ;;  %3405 = vmatprep.subr.bf16.mxu1 %v2807_v2  ;;  %v2495_v1 = vld [vmem:[%s6893_s22 + $0x458] sm:$0xff]  ;;  %v2876_v2 = vunpack.c.h.s8.bf16 %v2484_v58  ;;  %v2885_v5 = vunpack.c.l.s8.bf16 %v2493_v63  ;;  %v2893_v18 = vunpack.c.h.s8.bf16 %v2493_v63 }
 0x3fd   : > { %3242 = vmatpush1.bf16.msra.mxu0 %v2804_v6  ;;  %3406 = vmatpush1.bf16.msra.mxu1 %v2806_v8  ;;  %v2887_v6 = vunpack.c.l.s8.bf16 %v2495_v1  ;;  %v2492_v8 = vld [vmem:[%s6893_s22 + $0x440] sm:$0xff] }
 0x3fe   : > { %3243 = vmatprep.subr.bf16.mxu0 %v2813_v9  ;;  %3407 = vmatprep.subr.bf16.mxu1 %v2815_v15  ;;  %v2494_v9 = vld [vmem:[%s6893_s22 + $0x450] sm:$0xff]  ;;  %v2884_v15 = vunpack.c.l.s8.bf16 %v2492_v8 }
 0x3ff   : > { %v2886_v17 = vunpack.c.l.s8.bf16 %v2494_v9  ;;  %v2894_v7 = vunpack.c.h.s8.bf16 %v2494_v9 }
 0x401   : > { %3244 = vmatpush1.bf16.msra.mxu0 %v2812_v19  ;;  %3408 = vmatpush1.bf16.msra.mxu1 %v2814_v43  ;;  %v2895_v19 = vunpack.c.h.s8.bf16 %v2495_v1  ;;  %v2501_v43 = vld [vmem:[%s6893_s22 + $0x488] sm:$0xff] }
 0x402   : > { %3245 = vmatprep.subr.bf16.mxu0 %v2821_v20  ;;  %3409 = vmatprep.subr.bf16.mxu1 %v2823_v22  ;;  %v2503_v20 = vld [vmem:[%s6893_s22 + $0x498] sm:$0xff]  ;;  %v2892_v22 = vunpack.c.h.s8.bf16 %v2492_v8  ;;  %v2901_v46 = vunpack.c.l.s8.bf16 %v2501_v43  ;;  %v2909_v14 = vunpack.c.h.s8.bf16 %v2501_v43 }
 0x405   : > { %3246 = vmatpush1.bf16.msra.mxu0 %v2820_v24  ;;  %3410 = vmatpush1.bf16.msra.mxu1 %v2822_v25  ;;  %v2903_v24 = vunpack.c.l.s8.bf16 %v2503_v20  ;;  %v2500_v25 = vld [vmem:[%s6893_s22 + $0x480] sm:$0xff] }
 0x406   : > { %3247 = vmatprep.subr.bf16.mxu0 %v2829_v27  ;;  %3411 = vmatprep.subr.bf16.mxu1 %v2831_v4  ;;  %v2502_v27 = vld [vmem:[%s6893_s22 + $0x490] sm:$0xff]  ;;  %v2900_v4 = vunpack.c.l.s8.bf16 %v2500_v25 }
 0x407   : > { %v2902_v12 = vunpack.c.l.s8.bf16 %v2502_v27  ;;  %v2910_v33 = vunpack.c.h.s8.bf16 %v2502_v27 }
 0x409   : > { %3248 = vmatpush1.bf16.msra.mxu0 %v2828_v10  ;;  %3412 = vmatpush1.bf16.msra.mxu1 %v2830_v30  ;;  %v2911_v10 = vunpack.c.h.s8.bf16 %v2503_v20  ;;  %v2509_v30 = vld [vmem:[%s6893_s22 + $0x4c8] sm:$0xff] }
 0x40a   : > { %3249 = vmatprep.subr.bf16.mxu0 %v2837_v31  ;;  %3413 = vmatprep.subr.bf16.mxu1 %v2839_v32  ;;  %v2511_v31 = vld [vmem:[%s6893_s22 + $0x4d8] sm:$0xff]  ;;  %v2908_v32 = vunpack.c.h.s8.bf16 %v2500_v25  ;;  %v2917_v34 = vunpack.c.l.s8.bf16 %v2509_v30  ;;  %v2925_v28 = vunpack.c.h.s8.bf16 %v2509_v30 }
 0x40d   : > { %3250 = vmatpush1.bf16.msra.mxu0 %v2836_v35  ;;  %3414 = vmatpush1.bf16.msra.mxu1 %v2838_v36  ;;  %v2919_v35 = vunpack.c.l.s8.bf16 %v2511_v31  ;;  %v2508_v36 = vld [vmem:[%s6893_s22 + $0x4c0] sm:$0xff] }
 0x40e   : > { %3251 = vmatprep.subr.bf16.mxu0 %v2845_v37  ;;  %3415 = vmatprep.subr.bf16.mxu1 %v2847_v38  ;;  %v2510_v37 = vld [vmem:[%s6893_s22 + $0x4d0] sm:$0xff]  ;;  %v2916_v38 = vunpack.c.l.s8.bf16 %v2508_v36 }
 0x40f   : > { %v2918_v39 = vunpack.c.l.s8.bf16 %v2510_v37  ;;  %v2926_v16 = vunpack.c.h.s8.bf16 %v2510_v37 }
 0x411   : > { %3252 = vmatpush1.bf16.msra.mxu0 %v2844_v40  ;;  %3416 = vmatpush1.bf16.msra.mxu1 %v2846_v44  ;;  %v2927_v40 = vunpack.c.h.s8.bf16 %v2511_v31  ;;  %v2517_v44 = vld [vmem:[%s6893_s22 + $0x508] sm:$0xff] }
 0x412   : > { %3253 = vmatprep.subr.bf16.mxu0 %v2853_v47  ;;  %3417 = vmatprep.subr.bf16.mxu1 %v2855_v48  ;;  %v2519_v47 = vld [vmem:[%s6893_s22 + $0x518] sm:$0xff]  ;;  %v2924_v48 = vunpack.c.h.s8.bf16 %v2508_v36  ;;  %v2933_v49 = vunpack.c.l.s8.bf16 %v2517_v44  ;;  %v2941_v55 = vunpack.c.h.s8.bf16 %v2517_v44 }
 0x415   : > { %3254 = vmatpush1.bf16.msra.mxu0 %v2852_v50  ;;  %3418 = vmatpush1.bf16.msra.mxu1 %v2854_v51  ;;  %v2935_v50 = vunpack.c.l.s8.bf16 %v2519_v47  ;;  %v2516_v51 = vld [vmem:[%s6893_s22 + $0x500] sm:$0xff] }
 0x416   : > { %3255 = vmatprep.subr.bf16.mxu0 %v2861_v52  ;;  %3419 = vmatprep.subr.bf16.mxu1 %v2863_v53  ;;  %v2518_v52 = vld [vmem:[%s6893_s22 + $0x510] sm:$0xff]  ;;  %v2932_v53 = vunpack.c.l.s8.bf16 %v2516_v51 }
 0x417   : > { %v2934_v54 = vunpack.c.l.s8.bf16 %v2518_v52  ;;  %v2942_v58 = vunpack.c.h.s8.bf16 %v2518_v52 }
 0x419   : > { %3256 = vmatpush1.bf16.msra.mxu0 %v2860_v42  ;;  %3420 = vmatpush1.bf16.msra.mxu1 %v2862_v56  ;;  %v2943_v42 = vunpack.c.h.s8.bf16 %v2519_v47  ;;  %v2525_v56 = vld [vmem:[%s6893_s22 + $0x548] sm:$0xff] }
 0x41a   : > { %3266 = vmatprep.subr.bf16.mxu0 %v2869_v11  ;;  %3430 = vmatprep.subr.bf16.mxu1 %v2871_v57  ;;  %v2527_v11 = vld [vmem:[%s6893_s22 + $0x558] sm:$0xff]  ;;  %v2940_v57 = vunpack.c.h.s8.bf16 %v2516_v51  ;;  %v2949_v59 = vunpack.c.l.s8.bf16 %v2525_v56  ;;  %v2957_v1 = vunpack.c.h.s8.bf16 %v2525_v56 }
 0x41c   : > { %3258 = vmatmul.mubr.bf16.vlgmr.msra.gmra.mrb[0].mxu0 %v7111_v45  ;;  %3422 = vmatmul.mubr.bf16.vlgmr.msra.gmra.mrb[0].mxu1 %v7111_v45 }
 0x41d   : > { %3267 = vmatpush1.bf16.msra.mxu0 %v2868_v60  ;;  %3431 = vmatpush1.bf16.msra.mxu1 %v2870_v13  ;;  %v2951_v60 = vunpack.c.l.s8.bf16 %v2527_v11  ;;  %v2524_v13 = vld [vmem:[%s6893_s22 + $0x540] sm:$0xff] }
 0x41e   : > { %3268 = vmatprep.subr.bf16.mxu0 %v2877_v61  ;;  %3432 = vmatprep.subr.bf16.mxu1 %v2879_v62  ;;  %v2526_v61 = vld [vmem:[%s6893_s22 + $0x550] sm:$0xff]  ;;  %v2948_v62 = vunpack.c.l.s8.bf16 %v2524_v13 }
 0x41f   : > { %3298 = vmatprep.mubr.bf16.mxu0 %v7064_v26  ;;  %3462 = vmatprep.mubr.bf16.mxu1 %v7064_v26  ;;  %v2950_v63 = vunpack.c.l.s8.bf16 %v2526_v61  ;;  %v2958_v8 = vunpack.c.h.s8.bf16 %v2526_v61 }
 0x421   : > { %3269 = vmatpush1.bf16.msra.mxu0 %v2876_v2  ;;  %3433 = vmatpush1.bf16.msra.mxu1 %v2878_v3  ;;  %v2959_v2 = vunpack.c.h.s8.bf16 %v2527_v11  ;;  %v2533_v3 = vld [vmem:[%s6893_s22 + $0x588] sm:$0xff] }
 0x422   : > { %3270 = vmatprep.subr.bf16.mxu0 %v2885_v5  ;;  %3434 = vmatprep.subr.bf16.mxu1 %v2887_v6  ;;  %v2535_v5 = vld [vmem:[%s6893_s22 + $0x598] sm:$0xff]  ;;  %v2956_v6 = vunpack.c.h.s8.bf16 %v2524_v13  ;;  %v2965_v9 = vunpack.c.l.s8.bf16 %v2533_v3  ;;  %v2973_v20 = vunpack.c.h.s8.bf16 %v2533_v3 }
 0x425   : > { %3271 = vmatpush1.bf16.msra.mxu0 %v2884_v15  ;;  %3435 = vmatpush1.bf16.msra.mxu1 %v2886_v17  ;;  %v2967_v15 = vunpack.c.l.s8.bf16 %v2535_v5  ;;  %v2532_v17 = vld [vmem:[%s6893_s22 + $0x580] sm:$0xff] }
 0x426   : > { %3272 = vmatprep.subr.bf16.mxu0 %v2893_v18  ;;  %3436 = vmatprep.subr.bf16.mxu1 %v2895_v19  ;;  %v2534_v18 = vld [vmem:[%s6893_s22 + $0x590] sm:$0xff]  ;;  %v2964_v19 = vunpack.c.l.s8.bf16 %v2532_v17 }
 0x427   : > { %v2966_v43 = vunpack.c.l.s8.bf16 %v2534_v18  ;;  %v2974_v25 = vunpack.c.h.s8.bf16 %v2534_v18 }
 0x429   : > { %3273 = vmatpush1.bf16.msra.mxu0 %v2892_v22  ;;  %3437 = vmatpush1.bf16.msra.mxu1 %v2894_v7  ;;  %v2975_v22 = vunpack.c.h.s8.bf16 %v2535_v5  ;;  %v2541_v7 = vld [vmem:[%s6893_s22 + $0x5c8] sm:$0xff] }
 0x42a   : > { %3274 = vmatprep.subr.bf16.mxu0 %v2901_v46  ;;  %3438 = vmatprep.subr.bf16.mxu1 %v2903_v24  ;;  %v2543_v46 = vld [vmem:[%s6893_s22 + $0x5d8] sm:$0xff]  ;;  %v2972_v24 = vunpack.c.h.s8.bf16 %v2532_v17  ;;  %v2981_v27 = vunpack.c.l.s8.bf16 %v2541_v7  ;;  %v2989_v31 = vunpack.c.h.s8.bf16 %v2541_v7 }
 0x42d   : > { %3275 = vmatpush1.bf16.msra.mxu0 %v2900_v4  ;;  %3439 = vmatpush1.bf16.msra.mxu1 %v2902_v12  ;;  %v2983_v4 = vunpack.c.l.s8.bf16 %v2543_v46  ;;  %v2540_v12 = vld [vmem:[%s6893_s22 + $0x5c0] sm:$0xff] }
 0x42e   : > { %3276 = vmatprep.subr.bf16.mxu0 %v2909_v14  ;;  %3440 = vmatprep.subr.bf16.mxu1 %v2911_v10  ;;  %v2542_v14 = vld [vmem:[%s6893_s22 + $0x5d0] sm:$0xff]  ;;  %v2980_v10 = vunpack.c.l.s8.bf16 %v2540_v12 }
 0x42f   : > { %v2982_v30 = vunpack.c.l.s8.bf16 %v2542_v14  ;;  %v2990_v36 = vunpack.c.h.s8.bf16 %v2542_v14 }
 0x431   : > { %3277 = vmatpush1.bf16.msra.mxu0 %v2908_v32  ;;  %3441 = vmatpush1.bf16.msra.mxu1 %v2910_v33  ;;  %v2991_v32 = vunpack.c.h.s8.bf16 %v2543_v46  ;;  %v2549_v33 = vld [vmem:[%s6893_s22 + $0x608] sm:$0xff] }
 0x432   : > { %3278 = vmatprep.subr.bf16.mxu0 %v2917_v34  ;;  %3442 = vmatprep.subr.bf16.mxu1 %v2919_v35  ;;  %v2551_v34 = vld [vmem:[%s6893_s22 + $0x618] sm:$0xff]  ;;  %v2988_v35 = vunpack.c.h.s8.bf16 %v2540_v12  ;;  %v2997_v37 = vunpack.c.l.s8.bf16 %v2549_v33  ;;  %v3005_v47 = vunpack.c.h.s8.bf16 %v2549_v33 }
 0x435   : > { %3279 = vmatpush1.bf16.msra.mxu0 %v2916_v38  ;;  %3443 = vmatpush1.bf16.msra.mxu1 %v2918_v39  ;;  %v2999_v38 = vunpack.c.l.s8.bf16 %v2551_v34  ;;  %v2548_v39 = vld [vmem:[%s6893_s22 + $0x600] sm:$0xff] }
 0x436   : > { %3280 = vmatprep.subr.bf16.mxu0 %v2925_v28  ;;  %3444 = vmatprep.subr.bf16.mxu1 %v2927_v40  ;;  %v2550_v28 = vld [vmem:[%s6893_s22 + $0x610] sm:$0xff]  ;;  %v2996_v40 = vunpack.c.l.s8.bf16 %v2548_v39  ;;  %v3004_v51 = vunpack.c.h.s8.bf16 %v2548_v39 }
 0x437   : > { %v2998_v44 = vunpack.c.l.s8.bf16 %v2550_v28  ;;  %v3006_v52 = vunpack.c.h.s8.bf16 %v2550_v28 }
 0x439   : > { %3281 = vmatpush1.bf16.msra.mxu0 %v2924_v48  ;;  %3445 = vmatpush1.bf16.msra.mxu1 %v2926_v16  ;;  %v3007_v48 = vunpack.c.h.s8.bf16 %v2551_v34  ;;  %v2557_v16 = vld [vmem:[%s6893_s22 + $0x648] sm:$0xff] }
 0x43a   : > { %3282 = vmatprep.subr.bf16.mxu0 %v2933_v49  ;;  %3446 = vmatprep.subr.bf16.mxu1 %v2935_v50  ;;  %v2559_v49 = vld [vmem:[%s6893_s22 + $0x658] sm:$0xff]  ;;  %v7153_v50 = vcombine.high %v7064_v26, %v7064_v26 }
 0x43d   : > { %3283 = vmatpush1.bf16.msra.mxu0 %v2932_v53  ;;  %3447 = vmatpush1.bf16.msra.mxu1 %v2934_v54  ;;  %v3013_v53 = vunpack.c.l.s8.bf16 %v2557_v16  ;;  %v3015_v54 = vunpack.c.l.s8.bf16 %v2559_v49 }
 0x43e   : > { %3284 = vmatprep.subr.bf16.mxu0 %v2941_v55  ;;  %3448 = vmatprep.subr.bf16.mxu1 %v2943_v42  ;;  %v2556_v55 = vld [vmem:[%s6893_s22 + $0x640] sm:$0xff]  ;;  %v2558_v42 = vld [vmem:[%s6893_s22 + $0x650] sm:$0xff] }
 0x43f   : > { %v3012_v56 = vunpack.c.l.s8.bf16 %v2556_v55  ;;  %v3014_v11 = vunpack.c.l.s8.bf16 %v2558_v42  ;;  %v3020_v13 = vunpack.c.h.s8.bf16 %v2556_v55  ;;  %v3022_v61 = vunpack.c.h.s8.bf16 %v2558_v42 }
 0x441   : > { %3285 = vmatpush1.bf16.msra.mxu0 %v2940_v57  ;;  %3449 = vmatpush1.bf16.msra.mxu1 %v2942_v58  ;;  %v3021_v57 = vunpack.c.h.s8.bf16 %v2557_v16  ;;  %v3023_v58 = vunpack.c.h.s8.bf16 %v2559_v49 }
 0x442   : > { %3286 = vmatprep.subr.bf16.mxu0 %v2949_v59  ;;  %3450 = vmatprep.subr.bf16.mxu1 %v2951_v60  ;;  %v2565_v59 = vld [vmem:[%s6893_s22 + $0x688] sm:$0xff]  ;;  %v2567_v60 = vld [vmem:[%s6893_s22 + $0x698] sm:$0xff] }
 0x445   : > { %3287 = vmatpush1.bf16.msra.mxu0 %v2948_v62  ;;  %3451 = vmatpush1.bf16.msra.mxu1 %v2950_v63  ;;  %v3029_v62 = vunpack.c.l.s8.bf16 %v2565_v59  ;;  %v3031_v63 = vunpack.c.l.s8.bf16 %v2567_v60 }
 0x446   : > { %3288 = vmatprep.subr.bf16.mxu0 %v2957_v1  ;;  %3452 = vmatprep.subr.bf16.mxu1 %v2959_v2  ;;  %v2564_v1 = vld [vmem:[%s6893_s22 + $0x680] sm:$0xff]  ;;  %v2566_v2 = vld [vmem:[%s6893_s22 + $0x690] sm:$0xff] }
 0x447   : > { %v3028_v3 = vunpack.c.l.s8.bf16 %v2564_v1  ;;  %v3030_v5 = vunpack.c.l.s8.bf16 %v2566_v2  ;;  %v3036_v17 = vunpack.c.h.s8.bf16 %v2564_v1  ;;  %v3038_v18 = vunpack.c.h.s8.bf16 %v2566_v2 }
 0x449   : > { %3289 = vmatpush1.bf16.msra.mxu0 %v2956_v6  ;;  %3453 = vmatpush1.bf16.msra.mxu1 %v2958_v8  ;;  %v3037_v6 = vunpack.c.h.s8.bf16 %v2565_v59  ;;  %v3039_v8 = vunpack.c.h.s8.bf16 %v2567_v60 }
 0x44a   : > { %3290 = vmatprep.subr.bf16.mxu0 %v2965_v9  ;;  %3454 = vmatprep.subr.bf16.mxu1 %v2967_v15  ;;  %v2573_v9 = vld [vmem:[%s6893_s22 + $0x6c8] sm:$0xff]  ;;  %v2575_v15 = vld [vmem:[%s6893_s22 + $0x6d8] sm:$0xff] }
 0x44d   : > { %3291 = vmatpush1.bf16.msra.mxu0 %v2964_v19  ;;  %3455 = vmatpush1.bf16.msra.mxu1 %v2966_v43  ;;  %v3045_v19 = vunpack.c.l.s8.bf16 %v2573_v9  ;;  %v3047_v43 = vunpack.c.l.s8.bf16 %v2575_v15 }
 0x44e   : > { %3292 = vmatprep.subr.bf16.mxu0 %v2973_v20  ;;  %3456 = vmatprep.subr.bf16.mxu1 %v2975_v22  ;;  %v2572_v20 = vld [vmem:[%s6893_s22 + $0x6c0] sm:$0xff]  ;;  %v2574_v22 = vld [vmem:[%s6893_s22 + $0x6d0] sm:$0xff] }
 0x44f   : > { %v3044_v7 = vunpack.c.l.s8.bf16 %v2572_v20  ;;  %v3046_v46 = vunpack.c.l.s8.bf16 %v2574_v22  ;;  %v3052_v12 = vunpack.c.h.s8.bf16 %v2572_v20  ;;  %v3054_v14 = vunpack.c.h.s8.bf16 %v2574_v22 }
 0x451   : > { %3293 = vmatpush1.bf16.msra.mxu0 %v2972_v24  ;;  %3457 = vmatpush1.bf16.msra.mxu1 %v2974_v25  ;;  %v3053_v24 = vunpack.c.h.s8.bf16 %v2573_v9  ;;  %v3055_v25 = vunpack.c.h.s8.bf16 %v2575_v15 }
 0x452   : > { %3294 = vmatprep.subr.bf16.mxu0 %v2981_v27  ;;  %3458 = vmatprep.subr.bf16.mxu1 %v2983_v4  ;;  %v2581_v27 = vld [vmem:[%s6893_s22 + $0x708] sm:$0xff]  ;;  %v2583_v4 = vld [vmem:[%s6893_s22 + $0x718] sm:$0xff] }
 0x455   : > { %3295 = vmatpush1.bf16.msra.mxu0 %v2980_v10  ;;  %3459 = vmatpush1.bf16.msra.mxu1 %v2982_v30  ;;  %v3061_v10 = vunpack.c.l.s8.bf16 %v2581_v27  ;;  %v3063_v30 = vunpack.c.l.s8.bf16 %v2583_v4 }
 0x456   : > { %3296 = vmatprep.subr.bf16.mxu0 %v2989_v31  ;;  %3460 = vmatprep.subr.bf16.mxu1 %v2991_v32  ;;  %v2580_v31 = vld [vmem:[%s6893_s22 + $0x700] sm:$0xff]  ;;  %v2582_v32 = vld [vmem:[%s6893_s22 + $0x710] sm:$0xff] }
 0x457   : > { %v3060_v33 = vunpack.c.l.s8.bf16 %v2580_v31  ;;  %v3062_v34 = vunpack.c.l.s8.bf16 %v2582_v32  ;;  %v3068_v39 = vunpack.c.h.s8.bf16 %v2580_v31  ;;  %v3070_v28 = vunpack.c.h.s8.bf16 %v2582_v32  ;;  %v2371_v31 = vld [vmem:[%s6893_s22 + $0x78] sm:$0xff] }
 0x459   : > { %3297 = vmatpush1.bf16.msra.mxu0 %v2988_v35  ;;  %3461 = vmatpush1.bf16.msra.mxu1 %v2990_v36  ;;  %v3069_v35 = vunpack.c.h.s8.bf16 %v2581_v27  ;;  %v3071_v36 = vunpack.c.h.s8.bf16 %v2583_v4  ;;  %v7191_v27 = vcombine.high %v7067_v41, %v7067_v41 }
 0x45a   : > { %3307 = vmatprep.subr.bf16.mxu0 %v2997_v37  ;;  %3471 = vmatprep.subr.bf16.mxu1 %v2999_v38  ;;  %v2589_v37 = vld [vmem:[%s6893_s22 + $0x748] sm:$0xff]  ;;  %v2591_v38 = vld [vmem:[%s6893_s22 + $0x758] sm:$0xff] }
 0x45c   : > { %3299 = vmatmul.mubr.bf16.vlgmr.msra.gmra.mrb[0].mxu0 %v7067_v41  ;;  %3463 = vmatmul.mubr.bf16.vlgmr.msra.gmra.mrb[0].mxu1 %v7067_v41 }
 0x45d   : > { %3308 = vmatpush1.bf16.msra.mxu0 %v2996_v40  ;;  %3472 = vmatpush1.bf16.msra.mxu1 %v2998_v44  ;;  %v3077_v40 = vunpack.c.l.s8.bf16 %v2589_v37  ;;  %v3079_v44 = vunpack.c.l.s8.bf16 %v2591_v38 }
 0x45e   : > { %3309 = vmatprep.subr.bf16.mxu0 %v3005_v47  ;;  %3473 = vmatprep.subr.bf16.mxu1 %v3007_v48  ;;  %v2588_v47 = vld [vmem:[%s6893_s22 + $0x740] sm:$0xff]  ;;  %v2590_v48 = vld [vmem:[%s6893_s22 + $0x750] sm:$0xff] }
 0x45f   : > { %3339 = vmatprep.mubr.bf16.mxu0 %v7153_v50  ;;  %3503 = vmatprep.mubr.bf16.mxu1 %v7153_v50  ;;  %v3076_v16 = vunpack.c.l.s8.bf16 %v2588_v47  ;;  %v3078_v49 = vunpack.c.l.s8.bf16 %v2590_v48  ;;  %v3084_v55 = vunpack.c.h.s8.bf16 %v2588_v47  ;;  %v3086_v42 = vunpack.c.h.s8.bf16 %v2590_v48  ;;  %v2379_v47 = vld [vmem:[%s6893_s22 + $0xb8] sm:$0xff] }
 0x461   : > { %3310 = vmatpush1.bf16.msra.mxu0 %v3004_v51  ;;  %3474 = vmatpush1.bf16.msra.mxu1 %v3006_v52  ;;  %v3085_v51 = vunpack.c.h.s8.bf16 %v2589_v37  ;;  %v3087_v52 = vunpack.c.h.s8.bf16 %v2591_v38  ;;  %v2370_v37 = vld [vmem:[%s6893_s22 + $0x70] sm:$0xff] }
 0x462   : > { %3311 = vmatprep.subr.bf16.mxu0 %v3013_v53  ;;  %3475 = vmatprep.subr.bf16.mxu1 %v3015_v54  ;;  %v2597_v53 = vld [vmem:[%s6893_s22 + $0x788] sm:$0xff]  ;;  %v2599_v54 = vld [vmem:[%s6893_s22 + $0x798] sm:$0xff] }
 0x465   : > { %3312 = vmatpush1.bf16.msra.mxu0 %v3012_v56  ;;  %3476 = vmatpush1.bf16.msra.mxu1 %v3014_v11  ;;  %v3093_v56 = vunpack.c.l.s8.bf16 %v2597_v53  ;;  %v3095_v11 = vunpack.c.l.s8.bf16 %v2599_v54 }
 0x466   : > { %3313 = vmatprep.subr.bf16.mxu0 %v3021_v57  ;;  %3477 = vmatprep.subr.bf16.mxu1 %v3023_v58  ;;  %v2596_v57 = vld [vmem:[%s6893_s22 + $0x780] sm:$0xff]  ;;  %v2598_v58 = vld [vmem:[%s6893_s22 + $0x790] sm:$0xff] }
 0x467   : > { %v3092_v59 = vunpack.c.l.s8.bf16 %v2596_v57  ;;  %v3094_v60 = vunpack.c.l.s8.bf16 %v2598_v58  ;;  %v3100_v1 = vunpack.c.h.s8.bf16 %v2596_v57  ;;  %v3102_v2 = vunpack.c.h.s8.bf16 %v2598_v58 }
 0x469   : > { %3314 = vmatpush1.bf16.msra.mxu0 %v3020_v13  ;;  %3478 = vmatpush1.bf16.msra.mxu1 %v3022_v61  ;;  %v3101_v13 = vunpack.c.h.s8.bf16 %v2597_v53  ;;  %v3103_v61 = vunpack.c.h.s8.bf16 %v2599_v54 }
 0x46a   : > { %3315 = vmatprep.subr.bf16.mxu0 %v3029_v62  ;;  %3479 = vmatprep.subr.bf16.mxu1 %v3031_v63  ;;  %v2605_v62 = vld [vmem:[%s6893_s22 + $0x7c8] sm:$0xff]  ;;  %v2607_v63 = vld [vmem:[%s6893_s22 + $0x7d8] sm:$0xff] }
 0x46d   : > { %3316 = vmatpush1.bf16.msra.mxu0 %v3028_v3  ;;  %3480 = vmatpush1.bf16.msra.mxu1 %v3030_v5  ;;  %v3109_v3 = vunpack.c.l.s8.bf16 %v2605_v62  ;;  %v3111_v5 = vunpack.c.l.s8.bf16 %v2607_v63 }
 0x46e   : > { %3317 = vmatprep.subr.bf16.mxu0 %v3037_v6  ;;  %3481 = vmatprep.subr.bf16.mxu1 %v3039_v8  ;;  %v2604_v6 = vld [vmem:[%s6893_s22 + $0x7c0] sm:$0xff]  ;;  %v2606_v8 = vld [vmem:[%s6893_s22 + $0x7d0] sm:$0xff] }
 0x46f   : > { %v3108_v9 = vunpack.c.l.s8.bf16 %v2604_v6  ;;  %v3110_v15 = vunpack.c.l.s8.bf16 %v2606_v8  ;;  %v3116_v20 = vunpack.c.h.s8.bf16 %v2604_v6  ;;  %v3118_v22 = vunpack.c.h.s8.bf16 %v2606_v8 }
 0x471   : > { %3318 = vmatpush1.bf16.msra.mxu0 %v3036_v17  ;;  %3482 = vmatpush1.bf16.msra.mxu1 %v3038_v18  ;;  %v3117_v17 = vunpack.c.h.s8.bf16 %v2605_v62  ;;  %v3119_v18 = vunpack.c.h.s8.bf16 %v2607_v63 }
 0x472   : > { %3319 = vmatprep.subr.bf16.mxu0 %v3045_v19  ;;  %3483 = vmatprep.subr.bf16.mxu1 %v3047_v43  ;;  %v2361_v19 = vld [vmem:[%s6893_s22 + $0x28] sm:$0xff]  ;;  %v2363_v43 = vld [vmem:[%s6893_s22 + $0x38] sm:$0xff] }
 0x475   : > { %3320 = vmatpush1.bf16.msra.mxu0 %v3044_v7  ;;  %3484 = vmatpush1.bf16.msra.mxu1 %v3046_v46  ;;  %v2617_v7 = vunpack.c.l.s8.bf16 %v2361_v19  ;;  %v2619_v46 = vunpack.c.l.s8.bf16 %v2363_v43 }
 0x476   : > { %3321 = vmatprep.subr.bf16.mxu0 %v3053_v24  ;;  %3485 = vmatprep.subr.bf16.mxu1 %v3055_v25  ;;  %v2360_v24 = vld [vmem:[%s6893_s22 + $0x20] sm:$0xff]  ;;  %v2362_v25 = vld [vmem:[%s6893_s22 + $0x30] sm:$0xff] }
 0x477   : > { %v2616_v4 = vunpack.c.l.s8.bf16 %v2360_v24  ;;  %v2624_v32 = vunpack.c.h.s8.bf16 %v2360_v24 }
 0x479   : > { %3322 = vmatpush1.bf16.msra.mxu0 %v3052_v12  ;;  %3486 = vmatpush1.bf16.msra.mxu1 %v3054_v14  ;;  %v2618_v12 = vunpack.c.l.s8.bf16 %v2362_v25  ;;  %v2625_v14 = vunpack.c.h.s8.bf16 %v2361_v19 }
 0x47a   : > { %3323 = vmatprep.subr.bf16.mxu0 %v3061_v10  ;;  %3487 = vmatprep.subr.bf16.mxu1 %v3063_v30  ;;  %v2627_v10 = vunpack.c.h.s8.bf16 %v2363_v43  ;;  %v2369_v30 = vld [vmem:[%s6893_s22 + $0x68] sm:$0xff] }
 0x47d   : > { %3324 = vmatpush1.bf16.msra.mxu0 %v3060_v33  ;;  %3488 = vmatpush1.bf16.msra.mxu1 %v3062_v34  ;;  %v2626_v33 = vunpack.c.h.s8.bf16 %v2362_v25  ;;  %v2633_v34 = vunpack.c.l.s8.bf16 %v2369_v30 }
 0x47e   : > { %3325 = vmatprep.subr.bf16.mxu0 %v3069_v35  ;;  %3489 = vmatprep.subr.bf16.mxu1 %v3071_v36  ;;  %v2635_v35 = vunpack.c.l.s8.bf16 %v2371_v31  ;;  %v2368_v36 = vld [vmem:[%s6893_s22 + $0x60] sm:$0xff] }
 0x47f   : > { %v2632_v38 = vunpack.c.l.s8.bf16 %v2368_v36  ;;  %v2640_v48 = vunpack.c.h.s8.bf16 %v2368_v36 }
 0x481   : > { %3326 = vmatpush1.bf16.msra.mxu0 %v3068_v39  ;;  %3490 = vmatpush1.bf16.msra.mxu1 %v3070_v28  ;;  %v2634_v39 = vunpack.c.l.s8.bf16 %v2370_v37  ;;  %v2641_v28 = vunpack.c.h.s8.bf16 %v2369_v30 }
 0x482   : > { %3327 = vmatprep.subr.bf16.mxu0 %v3077_v40  ;;  %3491 = vmatprep.subr.bf16.mxu1 %v3079_v44  ;;  %v2643_v40 = vunpack.c.h.s8.bf16 %v2371_v31  ;;  %v2377_v44 = vld [vmem:[%s6893_s22 + $0xa8] sm:$0xff] }
 0x485   : > { %3328 = vmatpush1.bf16.msra.mxu0 %v3076_v16  ;;  %3492 = vmatpush1.bf16.msra.mxu1 %v3078_v49  ;;  %v2642_v16 = vunpack.c.h.s8.bf16 %v2370_v37  ;;  %v2651_v49 = vunpack.c.l.s8.bf16 %v2379_v47 }
 0x486   : > { %3329 = vmatprep.subr.bf16.mxu0 %v3085_v51  ;;  %3493 = vmatprep.subr.bf16.mxu1 %v3087_v52  ;;  %v2376_v51 = vld [vmem:[%s6893_s22 + $0xa0] sm:$0xff]  ;;  %v2378_v52 = vld [vmem:[%s6893_s22 + $0xb0] sm:$0xff] }
 0x487   : > { %v2648_v53 = vunpack.c.l.s8.bf16 %v2376_v51  ;;  %v2650_v54 = vunpack.c.l.s8.bf16 %v2378_v52  ;;  %v2656_v57 = vunpack.c.h.s8.bf16 %v2376_v51  ;;  %v2658_v58 = vunpack.c.h.s8.bf16 %v2378_v52 }
 0x489   : > { %3330 = vmatpush1.bf16.msra.mxu0 %v3084_v55  ;;  %3494 = vmatpush1.bf16.msra.mxu1 %v3086_v42  ;;  %v2657_v55 = vunpack.c.h.s8.bf16 %v2377_v44  ;;  %v2659_v42 = vunpack.c.h.s8.bf16 %v2379_v47 }
 0x48a   : > { %3331 = vmatprep.subr.bf16.mxu0 %v3093_v56  ;;  %3495 = vmatprep.subr.bf16.mxu1 %v3095_v11  ;;  %v2385_v56 = vld [vmem:[%s6893_s22 + $0xe8] sm:$0xff]  ;;  %v2387_v11 = vld [vmem:[%s6893_s22 + $0xf8] sm:$0xff] }
 0x48d   : > { %3332 = vmatpush1.bf16.msra.mxu0 %v3092_v59  ;;  %3496 = vmatpush1.bf16.msra.mxu1 %v3094_v60  ;;  %v2665_v59 = vunpack.c.l.s8.bf16 %v2385_v56  ;;  %v2667_v60 = vunpack.c.l.s8.bf16 %v2387_v11 }
 0x48e   : > { %3333 = vmatprep.subr.bf16.mxu0 %v3101_v13  ;;  %3497 = vmatprep.subr.bf16.mxu1 %v3103_v61  ;;  %v2384_v13 = vld [vmem:[%s6893_s22 + $0xe0] sm:$0xff]  ;;  %v2386_v61 = vld [vmem:[%s6893_s22 + $0xf0] sm:$0xff] }
 0x48f   : > { %v2664_v62 = vunpack.c.l.s8.bf16 %v2384_v13  ;;  %v2666_v63 = vunpack.c.l.s8.bf16 %v2386_v61  ;;  %v2672_v6 = vunpack.c.h.s8.bf16 %v2384_v13  ;;  %v2674_v8 = vunpack.c.h.s8.bf16 %v2386_v61 }
 0x491   : > { %3334 = vmatpush1.bf16.msra.mxu0 %v3100_v1  ;;  %3498 = vmatpush1.bf16.msra.mxu1 %v3102_v2  ;;  %v2673_v1 = vunpack.c.h.s8.bf16 %v2385_v56  ;;  %v2675_v2 = vunpack.c.h.s8.bf16 %v2387_v11 }
 0x492   : > { %3335 = vmatprep.subr.bf16.mxu0 %v3109_v3  ;;  %3499 = vmatprep.subr.bf16.mxu1 %v3111_v5  ;;  %v2393_v3 = vld [vmem:[%s6893_s22 + $0x128] sm:$0xff]  ;;  %v2395_v5 = vld [vmem:[%s6893_s22 + $0x138] sm:$0xff] }
 0x495   : > { %3336 = vmatpush1.bf16.msra.mxu0 %v3108_v9  ;;  %3500 = vmatpush1.bf16.msra.mxu1 %v3110_v15  ;;  %v2681_v9 = vunpack.c.l.s8.bf16 %v2393_v3  ;;  %v2683_v15 = vunpack.c.l.s8.bf16 %v2395_v5 }
 0x496   : > { %3337 = vmatprep.subr.bf16.mxu0 %v3117_v17  ;;  %3501 = vmatprep.subr.bf16.mxu1 %v3119_v18  ;;  %v2392_v17 = vld [vmem:[%s6893_s22 + $0x120] sm:$0xff]  ;;  %v2394_v18 = vld [vmem:[%s6893_s22 + $0x130] sm:$0xff] }
 0x497   : > { %v2680_v19 = vunpack.c.l.s8.bf16 %v2392_v17  ;;  %v2682_v43 = vunpack.c.l.s8.bf16 %v2394_v18  ;;  %v2688_v24 = vunpack.c.h.s8.bf16 %v2392_v17  ;;  %v2690_v25 = vunpack.c.h.s8.bf16 %v2394_v18 }
 0x499   : > { %3338 = vmatpush1.bf16.msra.mxu0 %v3116_v20  ;;  %3502 = vmatpush1.bf16.msra.mxu1 %v3118_v22  ;;  %v2689_v20 = vunpack.c.h.s8.bf16 %v2393_v3  ;;  %v2691_v22 = vunpack.c.h.s8.bf16 %v2395_v5 }
 0x49a   : > { %3512 = vmatprep.subr.bf16.mxu0 %v2617_v7  ;;  %3676 = vmatprep.subr.bf16.mxu1 %v2619_v46  ;;  %v2401_v7 = vld [vmem:[%s6893_s22 + $0x168] sm:$0xff]  ;;  %v2403_v46 = vld [vmem:[%s6893_s22 + $0x178] sm:$0xff] }
 0x49c   : > { %3340 = vmatmul.mubr.bf16.vlgmr.msra.gmra.mrb[0].mxu0 %v7191_v27  ;;  %3504 = vmatmul.mubr.bf16.vlgmr.msra.gmra.mrb[0].mxu1 %v7191_v27 }
 0x49d   : > { %3513 = vmatpush1.bf16.msra.mxu0 %v2616_v4  ;;  %3677 = vmatpush1.bf16.msra.mxu1 %v2618_v12  ;;  %v2697_v4 = vunpack.c.l.s8.bf16 %v2401_v7  ;;  %v2699_v12 = vunpack.c.l.s8.bf16 %v2403_v46 }
 0x49e   : > { %3514 = vmatprep.subr.bf16.mxu0 %v2625_v14  ;;  %3678 = vmatprep.subr.bf16.mxu1 %v2627_v10  ;;  %v2400_v14 = vld [vmem:[%s6893_s22 + $0x160] sm:$0xff]  ;;  %v2402_v10 = vld [vmem:[%s6893_s22 + $0x170] sm:$0xff] }
 0x49f   : > { %3544 = vmatprep.mubr.bf16.mxu0 %v7034_v23  ;;  %3708 = vmatprep.mubr.bf16.mxu1 %v7034_v23  ;;  %v2649_v23 = vunpack.c.l.s8.bf16 %v2377_v44  ;;  %v2696_v30 = vunpack.c.l.s8.bf16 %v2400_v14  ;;  %v2698_v31 = vunpack.c.l.s8.bf16 %v2402_v10  ;;  %v2704_v36 = vunpack.c.h.s8.bf16 %v2400_v14 }
 0x4a0   : > { %v2706_v37 = vunpack.c.h.s8.bf16 %v2402_v10 }
 0x4a1   : > { %3515 = vmatpush1.bf16.msra.mxu0 %v2624_v32  ;;  %3679 = vmatpush1.bf16.msra.mxu1 %v2626_v33  ;;  %v2705_v32 = vunpack.c.h.s8.bf16 %v2401_v7  ;;  %v2707_v33 = vunpack.c.h.s8.bf16 %v2403_v46 }
 0x4a2   : > { %3516 = vmatprep.subr.bf16.mxu0 %v2633_v34  ;;  %3680 = vmatprep.subr.bf16.mxu1 %v2635_v35  ;;  %v2409_v34 = vld [vmem:[%s6893_s22 + $0x1a8] sm:$0xff]  ;;  %v2411_v35 = vld [vmem:[%s6893_s22 + $0x1b8] sm:$0xff] }
 0x4a5   : > { %3517 = vmatpush1.bf16.msra.mxu0 %v2632_v38  ;;  %3681 = vmatpush1.bf16.msra.mxu1 %v2634_v39  ;;  %v2713_v38 = vunpack.c.l.s8.bf16 %v2409_v34  ;;  %v2715_v39 = vunpack.c.l.s8.bf16 %v2411_v35 }
 0x4a6   : > { %3518 = vmatprep.subr.bf16.mxu0 %v2641_v28  ;;  %3682 = vmatprep.subr.bf16.mxu1 %v2643_v40  ;;  %v2408_v28 = vld [vmem:[%s6893_s22 + $0x1a0] sm:$0xff]  ;;  %v2410_v40 = vld [vmem:[%s6893_s22 + $0x1b0] sm:$0xff] }
 0x4a7   : > { %v2712_v44 = vunpack.c.l.s8.bf16 %v2408_v28  ;;  %v2714_v47 = vunpack.c.l.s8.bf16 %v2410_v40  ;;  %v2720_v51 = vunpack.c.h.s8.bf16 %v2408_v28  ;;  %v2722_v52 = vunpack.c.h.s8.bf16 %v2410_v40 }
 0x4a9   : > { %3519 = vmatpush1.bf16.msra.mxu0 %v2640_v48  ;;  %3683 = vmatpush1.bf16.msra.mxu1 %v2642_v16  ;;  %v2721_v48 = vunpack.c.h.s8.bf16 %v2409_v34  ;;  %v2723_v16 = vunpack.c.h.s8.bf16 %v2411_v35 }
 0x4aa   : > { %3520 = vmatprep.subr.bf16.mxu0 %v2649_v23  ;;  %3684 = vmatprep.subr.bf16.mxu1 %v2651_v49  ;;  %v2417_v23 = vld [vmem:[%s6893_s22 + $0x1e8] sm:$0xff]  ;;  %v2419_v49 = vld [vmem:[%s6893_s22 + $0x1f8] sm:$0xff] }
 0x4ad   : > { %3521 = vmatpush1.bf16.msra.mxu0 %v2648_v53  ;;  %3685 = vmatpush1.bf16.msra.mxu1 %v2650_v54  ;;  %v2729_v53 = vunpack.c.l.s8.bf16 %v2417_v23  ;;  %v2731_v54 = vunpack.c.l.s8.bf16 %v2419_v49 }
 0x4ae   : > { %3522 = vmatprep.subr.bf16.mxu0 %v2657_v55  ;;  %3686 = vmatprep.subr.bf16.mxu1 %v2659_v42  ;;  %v2416_v55 = vld [vmem:[%s6893_s22 + $0x1e0] sm:$0xff]  ;;  %v2418_v42 = vld [vmem:[%s6893_s22 + $0x1f0] sm:$0xff] }
 0x4af   : > { %v2728_v56 = vunpack.c.l.s8.bf16 %v2416_v55  ;;  %v2730_v11 = vunpack.c.l.s8.bf16 %v2418_v42  ;;  %v2736_v13 = vunpack.c.h.s8.bf16 %v2416_v55  ;;  %v2738_v61 = vunpack.c.h.s8.bf16 %v2418_v42 }
 0x4b1   : > { %3523 = vmatpush1.bf16.msra.mxu0 %v2656_v57  ;;  %3687 = vmatpush1.bf16.msra.mxu1 %v2658_v58  ;;  %v2737_v57 = vunpack.c.h.s8.bf16 %v2417_v23  ;;  %v2739_v58 = vunpack.c.h.s8.bf16 %v2419_v49 }
 0x4b2   : > { %3524 = vmatprep.subr.bf16.mxu0 %v2665_v59  ;;  %3688 = vmatprep.subr.bf16.mxu1 %v2667_v60  ;;  %v2425_v59 = vld [vmem:[%s6893_s22 + $0x228] sm:$0xff]  ;;  %v2427_v60 = vld [vmem:[%s6893_s22 + $0x238] sm:$0xff] }
 0x4b5   : > { %3525 = vmatpush1.bf16.msra.mxu0 %v2664_v62  ;;  %3689 = vmatpush1.bf16.msra.mxu1 %v2666_v63  ;;  %v2745_v62 = vunpack.c.l.s8.bf16 %v2425_v59  ;;  %v2747_v63 = vunpack.c.l.s8.bf16 %v2427_v60 }
 0x4b6   : > { %3526 = vmatprep.subr.bf16.mxu0 %v2673_v1  ;;  %3690 = vmatprep.subr.bf16.mxu1 %v2675_v2  ;;  %v2424_v1 = vld [vmem:[%s6893_s22 + $0x220] sm:$0xff]  ;;  %v2426_v2 = vld [vmem:[%s6893_s22 + $0x230] sm:$0xff] }
 0x4b7   : > { %v2744_v3 = vunpack.c.l.s8.bf16 %v2424_v1  ;;  %v2746_v5 = vunpack.c.l.s8.bf16 %v2426_v2  ;;  %v2752_v17 = vunpack.c.h.s8.bf16 %v2424_v1  ;;  %v2754_v18 = vunpack.c.h.s8.bf16 %v2426_v2 }
 0x4b9   : > { %3527 = vmatpush1.bf16.msra.mxu0 %v2672_v6  ;;  %3691 = vmatpush1.bf16.msra.mxu1 %v2674_v8  ;;  %v2753_v6 = vunpack.c.h.s8.bf16 %v2425_v59  ;;  %v2755_v8 = vunpack.c.h.s8.bf16 %v2427_v60 }
 0x4ba   : > { %3528 = vmatprep.subr.bf16.mxu0 %v2681_v9  ;;  %3692 = vmatprep.subr.bf16.mxu1 %v2683_v15  ;;  %v2433_v9 = vld [vmem:[%s6893_s22 + $0x268] sm:$0xff]  ;;  %v2435_v15 = vld [vmem:[%s6893_s22 + $0x278] sm:$0xff] }
 0x4bb   : > { %v2769_v46 = vunpack.c.h.s8.bf16 %v2433_v9 }
 0x4bd   : > { %3529 = vmatpush1.bf16.msra.mxu0 %v2680_v19  ;;  %3693 = vmatpush1.bf16.msra.mxu1 %v2682_v43  ;;  %v2761_v19 = vunpack.c.l.s8.bf16 %v2433_v9  ;;  %v2763_v43 = vunpack.c.l.s8.bf16 %v2435_v15 }
 0x4be   : > { %3530 = vmatprep.subr.bf16.mxu0 %v2689_v20  ;;  %3694 = vmatprep.subr.bf16.mxu1 %v2691_v22  ;;  %v2432_v20 = vld [vmem:[%s6893_s22 + $0x260] sm:$0xff]  ;;  %v2434_v22 = vld [vmem:[%s6893_s22 + $0x270] sm:$0xff] }
 0x4bf   : > { %v2760_v7 = vunpack.c.l.s8.bf16 %v2432_v20  ;;  %v2770_v14 = vunpack.c.h.s8.bf16 %v2434_v22 }
 0x4c1   : > { %3531 = vmatpush1.bf16.msra.mxu0 %v2688_v24  ;;  %3695 = vmatpush1.bf16.msra.mxu1 %v2690_v25  ;;  %v2771_v24 = vunpack.c.h.s8.bf16 %v2435_v15  ;;  %v2441_v25 = vld [vmem:[%s6893_s22 + $0x2a8] sm:$0xff] }
 0x4c2   : > { %3532 = vmatprep.subr.bf16.mxu0 %v2697_v4  ;;  %3696 = vmatprep.subr.bf16.mxu1 %v2699_v12  ;;  %v2443_v4 = vld [vmem:[%s6893_s22 + $0x2b8] sm:$0xff]  ;;  %v2768_v12 = vunpack.c.h.s8.bf16 %v2432_v20  ;;  %v2785_v34 = vunpack.c.h.s8.bf16 %v2441_v25 }
 0x4c3   : > { %v2779_v10 = vunpack.c.l.s8.bf16 %v2443_v4  ;;  %v2787_v35 = vunpack.c.h.s8.bf16 %v2443_v4 }
 0x4c5   : > { %3533 = vmatpush1.bf16.msra.mxu0 %v2696_v30  ;;  %3697 = vmatpush1.bf16.msra.mxu1 %v2698_v31  ;;  %v2440_v30 = vld [vmem:[%s6893_s22 + $0x2a0] sm:$0xff]  ;;  %v2442_v31 = vld [vmem:[%s6893_s22 + $0x2b0] sm:$0xff] }
 0x4c6   : > { %3534 = vmatprep.subr.bf16.mxu0 %v2705_v32  ;;  %3698 = vmatprep.subr.bf16.mxu1 %v2707_v33  ;;  %v2776_v32 = vunpack.c.l.s8.bf16 %v2440_v30  ;;  %v2778_v33 = vunpack.c.l.s8.bf16 %v2442_v31 }
 0x4c9   : > { %3535 = vmatpush1.bf16.msra.mxu0 %v2704_v36  ;;  %3699 = vmatpush1.bf16.msra.mxu1 %v2706_v37  ;;  %v2449_v36 = vld [vmem:[%s6893_s22 + $0x2e8] sm:$0xff]  ;;  %v2451_v37 = vld [vmem:[%s6893_s22 + $0x2f8] sm:$0xff] }
 0x4ca   : > { %3536 = vmatprep.subr.bf16.mxu0 %v2713_v38  ;;  %3700 = vmatprep.subr.bf16.mxu1 %v2715_v39  ;;  %v2784_v38 = vunpack.c.h.s8.bf16 %v2440_v30  ;;  %v2786_v39 = vunpack.c.h.s8.bf16 %v2442_v31  ;;  %v2793_v28 = vunpack.c.l.s8.bf16 %v2449_v36  ;;  %v2795_v40 = vunpack.c.l.s8.bf16 %v2451_v37 }
 0x4cb   : > { %v2801_v23 = vunpack.c.h.s8.bf16 %v2449_v36  ;;  %v2803_v49 = vunpack.c.h.s8.bf16 %v2451_v37 }
 0x4cd   : > { %3537 = vmatpush1.bf16.msra.mxu0 %v2712_v44  ;;  %3701 = vmatpush1.bf16.msra.mxu1 %v2714_v47  ;;  %v2448_v44 = vld [vmem:[%s6893_s22 + $0x2e0] sm:$0xff]  ;;  %v2450_v47 = vld [vmem:[%s6893_s22 + $0x2f0] sm:$0xff] }
 0x4ce   : > { %3538 = vmatprep.subr.bf16.mxu0 %v2721_v48  ;;  %3702 = vmatprep.subr.bf16.mxu1 %v2723_v16  ;;  %v2792_v48 = vunpack.c.l.s8.bf16 %v2448_v44  ;;  %v2794_v16 = vunpack.c.l.s8.bf16 %v2450_v47 }
 0x4d1   : > { %3539 = vmatpush1.bf16.msra.mxu0 %v2720_v51  ;;  %3703 = vmatpush1.bf16.msra.mxu1 %v2722_v52  ;;  %v2457_v51 = vld [vmem:[%s6893_s22 + $0x328] sm:$0xff]  ;;  %v2459_v52 = vld [vmem:[%s6893_s22 + $0x338] sm:$0xff] }
 0x4d2   : > { %3540 = vmatprep.subr.bf16.mxu0 %v2729_v53  ;;  %3704 = vmatprep.subr.bf16.mxu1 %v2731_v54  ;;  %v2800_v53 = vunpack.c.h.s8.bf16 %v2448_v44  ;;  %v2802_v54 = vunpack.c.h.s8.bf16 %v2450_v47  ;;  %v2809_v55 = vunpack.c.l.s8.bf16 %v2457_v51  ;;  %v2811_v42 = vunpack.c.l.s8.bf16 %v2459_v52 }
 0x4d3   : > { %v2817_v59 = vunpack.c.h.s8.bf16 %v2457_v51  ;;  %v2819_v60 = vunpack.c.h.s8.bf16 %v2459_v52 }
 0x4d5   : > { %3541 = vmatpush1.bf16.msra.mxu0 %v2728_v56  ;;  %3705 = vmatpush1.bf16.msra.mxu1 %v2730_v11  ;;  %v2456_v56 = vld [vmem:[%s6893_s22 + $0x320] sm:$0xff]  ;;  %v2458_v11 = vld [vmem:[%s6893_s22 + $0x330] sm:$0xff] }
 0x4d6   : > { %3542 = vmatprep.subr.bf16.mxu0 %v2737_v57  ;;  %3706 = vmatprep.subr.bf16.mxu1 %v2739_v58  ;;  %v2808_v57 = vunpack.c.l.s8.bf16 %v2456_v56  ;;  %v2810_v58 = vunpack.c.l.s8.bf16 %v2458_v11 }
 0x4d9   : > { %3543 = vmatpush1.bf16.msra.mxu0 %v2736_v13  ;;  %3707 = vmatpush1.bf16.msra.mxu1 %v2738_v61  ;;  %v2465_v13 = vld [vmem:[%s6893_s22 + $0x368] sm:$0xff]  ;;  %v2467_v61 = vld [vmem:[%s6893_s22 + $0x378] sm:$0xff] }
 0x4da   : > { %3553 = vmatprep.subr.bf16.mxu0 %v2745_v62  ;;  %3717 = vmatprep.subr.bf16.mxu1 %v2747_v63  ;;  %v2816_v62 = vunpack.c.h.s8.bf16 %v2456_v56  ;;  %v2818_v63 = vunpack.c.h.s8.bf16 %v2458_v11  ;;  %v2825_v1 = vunpack.c.l.s8.bf16 %v2465_v13  ;;  %v2827_v2 = vunpack.c.l.s8.bf16 %v2467_v61 }
 0x4db   : > { %v2833_v9 = vunpack.c.h.s8.bf16 %v2465_v13  ;;  %v2835_v15 = vunpack.c.h.s8.bf16 %v2467_v61  ;;  %v2505_v61 = vld [vmem:[%s6893_s22 + $0x4a8] sm:$0xff] }
 0x4dc   : > { %3545 = vmatmul.mubr.bf16.vlgmr.msra.gmra.mrb[4].mxu0 %v7061_v21  ;;  %3709 = vmatmul.mubr.bf16.vlgmr.msra.gmra.mrb[4].mxu1 %v7061_v21  ;;  %v2762_v21 = vunpack.c.l.s8.bf16 %v2434_v22 }
 0x4dd   : > { %3554 = vmatpush1.bf16.msra.mxu0 %v2744_v3  ;;  %3718 = vmatpush1.bf16.msra.mxu1 %v2746_v5  ;;  %v2464_v3 = vld [vmem:[%s6893_s22 + $0x360] sm:$0xff]  ;;  %v2466_v5 = vld [vmem:[%s6893_s22 + $0x370] sm:$0xff] }
 0x4de   : > { %3555 = vmatprep.subr.bf16.mxu0 %v2753_v6  ;;  %3719 = vmatprep.subr.bf16.mxu1 %v2755_v8  ;;  %v2824_v6 = vunpack.c.l.s8.bf16 %v2464_v3  ;;  %v2826_v8 = vunpack.c.l.s8.bf16 %v2466_v5 }
 0x4df   : > { %3585 = vmatprep.mubr.bf16.mxu0 %v7073_v29  ;;  %3749 = vmatprep.mubr.bf16.mxu1 %v7073_v29  ;;  %v2777_v29 = vunpack.c.l.s8.bf16 %v2441_v25 }
 0x4e1   : > { %3556 = vmatpush1.bf16.msra.mxu0 %v2752_v17  ;;  %3720 = vmatpush1.bf16.msra.mxu1 %v2754_v18  ;;  %v2473_v17 = vld [vmem:[%s6893_s22 + $0x3a8] sm:$0xff]  ;;  %v2475_v18 = vld [vmem:[%s6893_s22 + $0x3b8] sm:$0xff] }
 0x4e2   : > { %3557 = vmatprep.subr.bf16.mxu0 %v2761_v19  ;;  %3721 = vmatprep.subr.bf16.mxu1 %v2763_v43  ;;  %v2832_v19 = vunpack.c.h.s8.bf16 %v2464_v3  ;;  %v2834_v43 = vunpack.c.h.s8.bf16 %v2466_v5  ;;  %v2841_v20 = vunpack.c.l.s8.bf16 %v2473_v17  ;;  %v2843_v22 = vunpack.c.l.s8.bf16 %v2475_v18  ;;  %v2504_v3 = vld [vmem:[%s6893_s22 + $0x4a0] sm:$0xff]  ;;  %v2506_v5 = vld [vmem:[%s6893_s22 + $0x4b0] sm:$0xff] }
 0x4e3   : > { %v2849_v25 = vunpack.c.h.s8.bf16 %v2473_v17  ;;  %v2851_v4 = vunpack.c.h.s8.bf16 %v2475_v18  ;;  %v2513_v17 = vld [vmem:[%s6893_s22 + $0x4e8] sm:$0xff]  ;;  %v2515_v18 = vld [vmem:[%s6893_s22 + $0x4f8] sm:$0xff] }
 0x4e5   : > { %3558 = vmatpush1.bf16.msra.mxu0 %v2760_v7  ;;  %3722 = vmatpush1.bf16.msra.mxu1 %v2762_v21  ;;  %v2472_v7 = vld [vmem:[%s6893_s22 + $0x3a0] sm:$0xff]  ;;  %v2474_v21 = vld [vmem:[%s6893_s22 + $0x3b0] sm:$0xff] }
 0x4e6   : > { %3559 = vmatprep.subr.bf16.mxu0 %v2769_v46  ;;  %3723 = vmatprep.subr.bf16.mxu1 %v2771_v24  ;;  %v2840_v46 = vunpack.c.l.s8.bf16 %v2472_v7  ;;  %v2842_v24 = vunpack.c.l.s8.bf16 %v2474_v21 }
 0x4e9   : > { %3560 = vmatpush1.bf16.msra.mxu0 %v2768_v12  ;;  %3724 = vmatpush1.bf16.msra.mxu1 %v2770_v14  ;;  %v2481_v12 = vld [vmem:[%s6893_s22 + $0x3e8] sm:$0xff]  ;;  %v2483_v14 = vld [vmem:[%s6893_s22 + $0x3f8] sm:$0xff] }
 0x4ea   : > { %3561 = vmatprep.subr.bf16.mxu0 %v2777_v29  ;;  %3725 = vmatprep.subr.bf16.mxu1 %v2779_v10  ;;  %v2848_v29 = vunpack.c.h.s8.bf16 %v2472_v7  ;;  %v2850_v10 = vunpack.c.h.s8.bf16 %v2474_v21  ;;  %v2857_v30 = vunpack.c.l.s8.bf16 %v2481_v12  ;;  %v2859_v31 = vunpack.c.l.s8.bf16 %v2483_v14  ;;  %v2512_v7 = vld [vmem:[%s6893_s22 + $0x4e0] sm:$0xff]  ;;  %v2514_v21 = vld [vmem:[%s6893_s22 + $0x4f0] sm:$0xff] }
 0x4eb   : > { %v2865_v36 = vunpack.c.h.s8.bf16 %v2481_v12  ;;  %v2867_v37 = vunpack.c.h.s8.bf16 %v2483_v14  ;;  %v2521_v12 = vld [vmem:[%s6893_s22 + $0x528] sm:$0xff]  ;;  %v2523_v14 = vld [vmem:[%s6893_s22 + $0x538] sm:$0xff] }
 0x4ed   : > { %3562 = vmatpush1.bf16.msra.mxu0 %v2776_v32  ;;  %3726 = vmatpush1.bf16.msra.mxu1 %v2778_v33  ;;  %v2480_v32 = vld [vmem:[%s6893_s22 + $0x3e0] sm:$0xff]  ;;  %v2482_v33 = vld [vmem:[%s6893_s22 + $0x3f0] sm:$0xff] }
 0x4ee   : > { %3563 = vmatprep.subr.bf16.mxu0 %v2785_v34  ;;  %3727 = vmatprep.subr.bf16.mxu1 %v2787_v35  ;;  %v2856_v34 = vunpack.c.l.s8.bf16 %v2480_v32  ;;  %v2858_v35 = vunpack.c.l.s8.bf16 %v2482_v33 }
 0x4f1   : > { %3564 = vmatpush1.bf16.msra.mxu0 %v2784_v38  ;;  %3728 = vmatpush1.bf16.msra.mxu1 %v2786_v39  ;;  %v2489_v38 = vld [vmem:[%s6893_s22 + $0x428] sm:$0xff]  ;;  %v2491_v39 = vld [vmem:[%s6893_s22 + $0x438] sm:$0xff] }
 0x4f2   : > { %3565 = vmatprep.subr.bf16.mxu0 %v2793_v28  ;;  %3729 = vmatprep.subr.bf16.mxu1 %v2795_v40  ;;  %v2864_v28 = vunpack.c.h.s8.bf16 %v2480_v32  ;;  %v2866_v40 = vunpack.c.h.s8.bf16 %v2482_v33  ;;  %v2873_v44 = vunpack.c.l.s8.bf16 %v2489_v38  ;;  %v2875_v47 = vunpack.c.l.s8.bf16 %v2491_v39  ;;  %v2520_v32 = vld [vmem:[%s6893_s22 + $0x520] sm:$0xff]  ;;  %v2522_v33 = vld [vmem:[%s6893_s22 + $0x530] sm:$0xff] }
 0x4f3   : > { %v2881_v51 = vunpack.c.h.s8.bf16 %v2489_v38  ;;  %v2883_v52 = vunpack.c.h.s8.bf16 %v2491_v39  ;;  %v2529_v38 = vld [vmem:[%s6893_s22 + $0x568] sm:$0xff]  ;;  %v2531_v39 = vld [vmem:[%s6893_s22 + $0x578] sm:$0xff] }
 0x4f5   : > { %3566 = vmatpush1.bf16.msra.mxu0 %v2792_v48  ;;  %3730 = vmatpush1.bf16.msra.mxu1 %v2794_v16  ;;  %v2488_v48 = vld [vmem:[%s6893_s22 + $0x420] sm:$0xff]  ;;  %v2490_v16 = vld [vmem:[%s6893_s22 + $0x430] sm:$0xff] }
 0x4f6   : > { %3567 = vmatprep.subr.bf16.mxu0 %v2801_v23  ;;  %3731 = vmatprep.subr.bf16.mxu1 %v2803_v49  ;;  %v2872_v23 = vunpack.c.l.s8.bf16 %v2488_v48  ;;  %v2874_v49 = vunpack.c.l.s8.bf16 %v2490_v16 }
 0x4f9   : > { %3568 = vmatpush1.bf16.msra.mxu0 %v2800_v53  ;;  %3732 = vmatpush1.bf16.msra.mxu1 %v2802_v54  ;;  %v2497_v53 = vld [vmem:[%s6893_s22 + $0x468] sm:$0xff]  ;;  %v2499_v54 = vld [vmem:[%s6893_s22 + $0x478] sm:$0xff] }
 0x4fa   : > { %3569 = vmatprep.subr.bf16.mxu0 %v2809_v55  ;;  %3733 = vmatprep.subr.bf16.mxu1 %v2811_v42  ;;  %v2880_v55 = vunpack.c.h.s8.bf16 %v2488_v48  ;;  %v2882_v42 = vunpack.c.h.s8.bf16 %v2490_v16  ;;  %v2889_v56 = vunpack.c.l.s8.bf16 %v2497_v53  ;;  %v2891_v11 = vunpack.c.l.s8.bf16 %v2499_v54  ;;  %v2528_v48 = vld [vmem:[%s6893_s22 + $0x560] sm:$0xff]  ;;  %v2530_v16 = vld [vmem:[%s6893_s22 + $0x570] sm:$0xff] }
 0x4fb   : > { %v2899_v13 = vunpack.c.h.s8.bf16 %v2499_v54  ;;  %v2539_v54 = vld [vmem:[%s6893_s22 + $0x5b8] sm:$0xff] }
 0x4fd   : > { %3570 = vmatpush1.bf16.msra.mxu0 %v2808_v57  ;;  %3734 = vmatpush1.bf16.msra.mxu1 %v2810_v58  ;;  %v2496_v57 = vld [vmem:[%s6893_s22 + $0x460] sm:$0xff]  ;;  %v2498_v58 = vld [vmem:[%s6893_s22 + $0x470] sm:$0xff] }
 0x4fe   : > { %3571 = vmatprep.subr.bf16.mxu0 %v2817_v59  ;;  %3735 = vmatprep.subr.bf16.mxu1 %v2819_v60  ;;  %v2888_v59 = vunpack.c.l.s8.bf16 %v2496_v57  ;;  %v2897_v60 = vunpack.c.h.s8.bf16 %v2497_v53  ;;  %v2537_v53 = vld [vmem:[%s6893_s22 + $0x5a8] sm:$0xff] }
 0x501   : > { %3572 = vmatpush1.bf16.msra.mxu0 %v2816_v62  ;;  %3736 = vmatpush1.bf16.msra.mxu1 %v2818_v63  ;;  %v2507_v62 = vld [vmem:[%s6893_s22 + $0x4b8] sm:$0xff]  ;;  %v2896_v63 = vunpack.c.h.s8.bf16 %v2496_v57  ;;  %v2536_v57 = vld [vmem:[%s6893_s22 + $0x5a0] sm:$0xff] }
 0x502   : > { %3573 = vmatprep.subr.bf16.mxu0 %v2825_v1  ;;  %3737 = vmatprep.subr.bf16.mxu1 %v2827_v2  ;;  %v2898_v1 = vunpack.c.h.s8.bf16 %v2498_v58  ;;  %v2907_v2 = vunpack.c.l.s8.bf16 %v2507_v62 }
 0x505   : > { %3574 = vmatpush1.bf16.msra.mxu0 %v2824_v6  ;;  %3738 = vmatpush1.bf16.msra.mxu1 %v2826_v8  ;;  %v2904_v6 = vunpack.c.l.s8.bf16 %v2504_v3  ;;  %v2906_v8 = vunpack.c.l.s8.bf16 %v2506_v5 }
 0x506   : > { %3575 = vmatprep.subr.bf16.mxu0 %v2833_v9  ;;  %3739 = vmatprep.subr.bf16.mxu1 %v2835_v15  ;;  %v2913_v9 = vunpack.c.h.s8.bf16 %v2505_v61  ;;  %v2915_v15 = vunpack.c.h.s8.bf16 %v2507_v62  ;;  %v2547_v62 = vld [vmem:[%s6893_s22 + $0x5f8] sm:$0xff] }
 0x509   : > { %3576 = vmatpush1.bf16.msra.mxu0 %v2832_v19  ;;  %3740 = vmatpush1.bf16.msra.mxu1 %v2834_v43  ;;  %v2912_v19 = vunpack.c.h.s8.bf16 %v2504_v3  ;;  %v2914_v43 = vunpack.c.h.s8.bf16 %v2506_v5  ;;  %v2544_v3 = vld [vmem:[%s6893_s22 + $0x5e0] sm:$0xff]  ;;  %v2546_v5 = vld [vmem:[%s6893_s22 + $0x5f0] sm:$0xff] }
 0x50a   : > { %3577 = vmatprep.subr.bf16.mxu0 %v2841_v20  ;;  %3741 = vmatprep.subr.bf16.mxu1 %v2843_v22  ;;  %v2921_v20 = vunpack.c.l.s8.bf16 %v2513_v17  ;;  %v2923_v22 = vunpack.c.l.s8.bf16 %v2515_v18 }
 0x50d   : > { %3578 = vmatpush1.bf16.msra.mxu0 %v2840_v46  ;;  %3742 = vmatpush1.bf16.msra.mxu1 %v2842_v24  ;;  %v2920_v46 = vunpack.c.l.s8.bf16 %v2512_v7  ;;  %v2922_v24 = vunpack.c.l.s8.bf16 %v2514_v21 }
 0x50e   : > { %3579 = vmatprep.subr.bf16.mxu0 %v2849_v25  ;;  %3743 = vmatprep.subr.bf16.mxu1 %v2851_v4  ;;  %v2929_v25 = vunpack.c.h.s8.bf16 %v2513_v17  ;;  %v2931_v4 = vunpack.c.h.s8.bf16 %v2515_v18  ;;  %v2553_v17 = vld [vmem:[%s6893_s22 + $0x628] sm:$0xff]  ;;  %v2555_v18 = vld [vmem:[%s6893_s22 + $0x638] sm:$0xff] }
 0x511   : > { %3580 = vmatpush1.bf16.msra.mxu0 %v2848_v29  ;;  %3744 = vmatpush1.bf16.msra.mxu1 %v2850_v10  ;;  %v2928_v29 = vunpack.c.h.s8.bf16 %v2512_v7  ;;  %v2930_v10 = vunpack.c.h.s8.bf16 %v2514_v21  ;;  %v2552_v7 = vld [vmem:[%s6893_s22 + $0x620] sm:$0xff]  ;;  %v2554_v21 = vld [vmem:[%s6893_s22 + $0x630] sm:$0xff] }
 0x512   : > { %3581 = vmatprep.subr.bf16.mxu0 %v2857_v30  ;;  %3745 = vmatprep.subr.bf16.mxu1 %v2859_v31  ;;  %v2937_v30 = vunpack.c.l.s8.bf16 %v2521_v12  ;;  %v2939_v31 = vunpack.c.l.s8.bf16 %v2523_v14 }
 0x515   : > { %3582 = vmatpush1.bf16.msra.mxu0 %v2856_v34  ;;  %3746 = vmatpush1.bf16.msra.mxu1 %v2858_v35  ;;  %v2936_v34 = vunpack.c.l.s8.bf16 %v2520_v32  ;;  %v2938_v35 = vunpack.c.l.s8.bf16 %v2522_v33 }
 0x516   : > { %3583 = vmatprep.subr.bf16.mxu0 %v2865_v36  ;;  %3747 = vmatprep.subr.bf16.mxu1 %v2867_v37  ;;  %v2945_v36 = vunpack.c.h.s8.bf16 %v2521_v12  ;;  %v2947_v37 = vunpack.c.h.s8.bf16 %v2523_v14  ;;  %v2561_v12 = vld [vmem:[%s6893_s22 + $0x668] sm:$0xff]  ;;  %v2563_v14 = vld [vmem:[%s6893_s22 + $0x678] sm:$0xff] }
 0x519   : > { %3584 = vmatpush1.bf16.msra.mxu0 %v2864_v28  ;;  %3748 = vmatpush1.bf16.msra.mxu1 %v2866_v40  ;;  %v2944_v28 = vunpack.c.h.s8.bf16 %v2520_v32  ;;  %v2946_v40 = vunpack.c.h.s8.bf16 %v2522_v33  ;;  %v2560_v32 = vld [vmem:[%s6893_s22 + $0x660] sm:$0xff]  ;;  %v2562_v33 = vld [vmem:[%s6893_s22 + $0x670] sm:$0xff] }
 0x51a   : > { %3594 = vmatprep.subr.bf16.mxu0 %v2873_v44  ;;  %3758 = vmatprep.subr.bf16.mxu1 %v2875_v47  ;;  %v2953_v44 = vunpack.c.l.s8.bf16 %v2529_v38  ;;  %v2955_v47 = vunpack.c.l.s8.bf16 %v2531_v39 }
 0x51c   : > { %3586 = vmatmul.mubr.bf16.vlgmr.msra.gmra.mrb[4].mxu0 %v7111_v45  ;;  %3750 = vmatmul.mubr.bf16.vlgmr.msra.gmra.mrb[4].mxu1 %v7111_v45  ;;  %v2890_v45 = vunpack.c.l.s8.bf16 %v2498_v58  ;;  %v2538_v58 = vld [vmem:[%s6893_s22 + $0x5b0] sm:$0xff] }
 0x51d   : > { %3595 = vmatpush1.bf16.msra.mxu0 %v2872_v23  ;;  %3759 = vmatpush1.bf16.msra.mxu1 %v2874_v49  ;;  %v2952_v23 = vunpack.c.l.s8.bf16 %v2528_v48  ;;  %v2954_v49 = vunpack.c.l.s8.bf16 %v2530_v16 }
 0x51e   : > { %3596 = vmatprep.subr.bf16.mxu0 %v2881_v51  ;;  %3760 = vmatprep.subr.bf16.mxu1 %v2883_v52  ;;  %v2961_v51 = vunpack.c.h.s8.bf16 %v2529_v38  ;;  %v2963_v52 = vunpack.c.h.s8.bf16 %v2531_v39  ;;  %v2571_v38 = vld [vmem:[%s6893_s22 + $0x6b8] sm:$0xff]  ;;  %v3024_v39 = vunpack.c.h.s8.bf16 %v2560_v32 }
 0x51f   : > { %3626 = vmatprep.mubr.bf16.mxu0 %v7064_v26  ;;  %3790 = vmatprep.mubr.bf16.mxu1 %v7064_v26  ;;  %v2905_v26 = vunpack.c.l.s8.bf16 %v2505_v61  ;;  %v2545_v61 = vld [vmem:[%s6893_s22 + $0x5e8] sm:$0xff] }
 0x521   : > { %3597 = vmatpush1.bf16.msra.mxu0 %v2880_v55  ;;  %3761 = vmatpush1.bf16.msra.mxu1 %v2882_v42  ;;  %v2960_v55 = vunpack.c.h.s8.bf16 %v2528_v48  ;;  %v2962_v42 = vunpack.c.h.s8.bf16 %v2530_v16  ;;  %v3844_v48 = vsub.s32 0, %v7014_v0  ;;  %v3852_v16 = vsub.s32 2, %v7014_v0 }
 0x522   : > { %3598 = vmatprep.subr.bf16.mxu0 %v2889_v56  ;;  %3762 = vmatprep.subr.bf16.mxu1 %v2891_v11  ;;  %v2969_v56 = vunpack.c.l.s8.bf16 %v2537_v53  ;;  %v2971_v11 = vunpack.c.l.s8.bf16 %v2539_v54 }
 0x525   : > { %3599 = vmatpush1.bf16.msra.mxu0 %v2888_v59  ;;  %3763 = vmatpush1.bf16.msra.mxu1 %v2890_v45  ;;  %v2968_v59 = vunpack.c.l.s8.bf16 %v2536_v57  ;;  %v2970_v45 = vunpack.c.l.s8.bf16 %v2538_v58 }
 0x526   : > { %3600 = vmatprep.subr.bf16.mxu0 %v2897_v60  ;;  %3764 = vmatprep.subr.bf16.mxu1 %v2899_v13  ;;  %v2977_v60 = vunpack.c.h.s8.bf16 %v2537_v53  ;;  %v2979_v13 = vunpack.c.h.s8.bf16 %v2539_v54  ;;  %v7315_v53 = vld [vmem:[#allocation18] sm:$0xff]  ;;  %v3848_v54 = vsub.s32 1, %v7014_v0 }
 0x529   : > { %3601 = vmatpush1.bf16.msra.mxu0 %v2896_v63  ;;  %3765 = vmatpush1.bf16.msra.mxu1 %v2898_v1  ;;  %v2976_v63 = vunpack.c.h.s8.bf16 %v2536_v57  ;;  %v2978_v1 = vunpack.c.h.s8.bf16 %v2538_v58  ;;  %v2579_v57 = vld [vmem:[%s6893_s22 + $0x6f8] sm:$0xff]  ;;  %v3845_v58 = vrot.slane %v7315_v53, %v3844_v48 }
 0x52a   : > { %3602 = vmatprep.subr.bf16.mxu0 %v2905_v26  ;;  %3766 = vmatprep.subr.bf16.mxu1 %v2907_v2  ;;  %v2985_v26 = vunpack.c.l.s8.bf16 %v2545_v61  ;;  %v2987_v2 = vunpack.c.l.s8.bf16 %v2547_v62 }
 0x52d   : > { %3603 = vmatpush1.bf16.msra.mxu0 %v2904_v6  ;;  %3767 = vmatpush1.bf16.msra.mxu1 %v2906_v8  ;;  %v2984_v6 = vunpack.c.l.s8.bf16 %v2544_v3  ;;  %v2986_v8 = vunpack.c.l.s8.bf16 %v2546_v5 }
 0x52e   : > { %3604 = vmatprep.subr.bf16.mxu0 %v2913_v9  ;;  %3768 = vmatprep.subr.bf16.mxu1 %v2915_v15  ;;  %v2993_v9 = vunpack.c.h.s8.bf16 %v2545_v61  ;;  %v2995_v15 = vunpack.c.h.s8.bf16 %v2547_v62 }
 0x531   : > { %3605 = vmatpush1.bf16.msra.mxu0 %v2912_v19  ;;  %3769 = vmatpush1.bf16.msra.mxu1 %v2914_v43  ;;  %v2992_v19 = vunpack.c.h.s8.bf16 %v2544_v3  ;;  %v2994_v43 = vunpack.c.h.s8.bf16 %v2546_v5 }
 0x532   : > { %3606 = vmatprep.subr.bf16.mxu0 %v2921_v20  ;;  %3770 = vmatprep.subr.bf16.mxu1 %v2923_v22  ;;  %v3001_v20 = vunpack.c.l.s8.bf16 %v2553_v17  ;;  %v3003_v22 = vunpack.c.l.s8.bf16 %v2555_v18 }
 0x535   : > { %3607 = vmatpush1.bf16.msra.mxu0 %v2920_v46  ;;  %3771 = vmatpush1.bf16.msra.mxu1 %v2922_v24  ;;  %v3000_v46 = vunpack.c.l.s8.bf16 %v2552_v7  ;;  %v3002_v24 = vunpack.c.l.s8.bf16 %v2554_v21 }
 0x536   : > { %3608 = vmatprep.subr.bf16.mxu0 %v2929_v25  ;;  %3772 = vmatprep.subr.bf16.mxu1 %v2931_v4  ;;  %v3009_v25 = vunpack.c.h.s8.bf16 %v2553_v17  ;;  %v3011_v4 = vunpack.c.h.s8.bf16 %v2555_v18 }
 0x539   : > { %3609 = vmatpush1.bf16.msra.mxu0 %v2928_v29  ;;  %3773 = vmatpush1.bf16.msra.mxu1 %v2930_v10  ;;  %v3008_v29 = vunpack.c.h.s8.bf16 %v2552_v7  ;;  %v3010_v10 = vunpack.c.h.s8.bf16 %v2554_v21 }
 0x53a   : > { %3610 = vmatprep.subr.bf16.mxu0 %v2937_v30  ;;  %3774 = vmatprep.subr.bf16.mxu1 %v2939_v31  ;;  %v3017_v30 = vunpack.c.l.s8.bf16 %v2561_v12  ;;  %v3019_v31 = vunpack.c.l.s8.bf16 %v2563_v14 }
 0x53d   : > { %3611 = vmatpush1.bf16.msra.mxu0 %v2936_v34  ;;  %3775 = vmatpush1.bf16.msra.mxu1 %v2938_v35  ;;  %v3016_v34 = vunpack.c.l.s8.bf16 %v2560_v32  ;;  %v3025_v35 = vunpack.c.h.s8.bf16 %v2561_v12 }
 0x53e   : > { %3612 = vmatprep.subr.bf16.mxu0 %v2945_v36  ;;  %3776 = vmatprep.subr.bf16.mxu1 %v2947_v37  ;;  %v3027_v36 = vunpack.c.h.s8.bf16 %v2563_v14  ;;  %v2569_v37 = vld [vmem:[%s6893_s22 + $0x6a8] sm:$0xff] }
 0x53f   : > { %v2585_v14 = vld [vmem:[%s6893_s22 + $0x728] sm:$0xff] }
 0x541   : > { %3613 = vmatpush1.bf16.msra.mxu0 %v2944_v28  ;;  %3777 = vmatpush1.bf16.msra.mxu1 %v2946_v40  ;;  %v3026_v28 = vunpack.c.h.s8.bf16 %v2562_v33  ;;  %v3033_v40 = vunpack.c.l.s8.bf16 %v2569_v37 }
 0x542   : > { %3614 = vmatprep.subr.bf16.mxu0 %v2953_v44  ;;  %3778 = vmatprep.subr.bf16.mxu1 %v2955_v47  ;;  %v2568_v44 = vld [vmem:[%s6893_s22 + $0x6a0] sm:$0xff]  ;;  %v2570_v47 = vld [vmem:[%s6893_s22 + $0x6b0] sm:$0xff] }
 0x543   : > { %v3040_v61 = vunpack.c.h.s8.bf16 %v2568_v44  ;;  %v3042_v62 = vunpack.c.h.s8.bf16 %v2570_v47 }
 0x545   : > { %3615 = vmatpush1.bf16.msra.mxu0 %v2952_v23  ;;  %3779 = vmatpush1.bf16.msra.mxu1 %v2954_v49  ;;  %v6455_v23 = vmov 1983009808  }
 0x546   : > { %3616 = vmatprep.subr.bf16.mxu0 %v2961_v51  ;;  %3780 = vmatprep.subr.bf16.mxu1 %v2963_v52  ;;  %v3901_v49 = vunpack.c.l.s4 %v6455_v23  ;;  %v3032_v51 = vunpack.c.l.s8.bf16 %v2568_v44  ;;  %v3034_v52 = vunpack.c.l.s8.bf16 %v2570_v47  ;;  %v2593_v44 = vld [vmem:[%s6893_s22 + $0x768] sm:$0xff]  ;;  %v2595_v47 = vld [vmem:[%s6893_s22 + $0x778] sm:$0xff] }
 0x549   : > { %3617 = vmatpush1.bf16.msra.mxu0 %v2960_v55  ;;  %3781 = vmatpush1.bf16.msra.mxu1 %v2962_v42  ;;  %v3856_v55 = vsub.s32 3, %v7014_v0  ;;  %v3041_v42 = vunpack.c.h.s8.bf16 %v2569_v37 }
 0x54a   : > { %3618 = vmatprep.subr.bf16.mxu0 %v2969_v56  ;;  %3782 = vmatprep.subr.bf16.mxu1 %v2971_v11  ;;  %v3043_v56 = vunpack.c.h.s8.bf16 %v2571_v38  ;;  %v2577_v11 = vld [vmem:[%s6893_s22 + $0x6e8] sm:$0xff] }
 0x54d   : > { %3619 = vmatpush1.bf16.msra.mxu0 %v2968_v59  ;;  %3783 = vmatpush1.bf16.msra.mxu1 %v2970_v45  ;;  %v3853_v59 = vrot.slane %v7315_v53, %v3852_v16  ;;  %v3902_v45 = vunpack.c.0.s8 %v3901_v49  ;;  %v3081_v49 = vunpack.c.l.s8.bf16 %v2593_v44 }
 0x54e   : > { %3620 = vmatprep.subr.bf16.mxu0 %v2977_v60  ;;  %3784 = vmatprep.subr.bf16.mxu1 %v2979_v13  ;;  %v3849_v60 = vrot.slane %v7315_v53, %v3848_v54  ;;  %v3857_v13 = vrot.slane %v7315_v53, %v3856_v55  ;;  %v2594_v55 = vld [vmem:[%s6893_s22 + $0x770] sm:$0xff] }
 0x551   : > { %3621 = vmatpush1.bf16.msra.mxu0 %v2976_v63  ;;  %3785 = vmatpush1.bf16.msra.mxu1 %v2978_v1  ;;  %v3049_v63 = vunpack.c.l.s8.bf16 %v2577_v11  ;;  %v3051_v1 = vunpack.c.l.s8.bf16 %v2579_v57 }
 0x552   : > { %3622 = vmatprep.subr.bf16.mxu0 %v2985_v26  ;;  %3786 = vmatprep.subr.bf16.mxu1 %v2987_v2  ;;  %v2576_v26 = vld [vmem:[%s6893_s22 + $0x6e0] sm:$0xff]  ;;  %v2578_v2 = vld [vmem:[%s6893_s22 + $0x6f0] sm:$0xff] }
 0x553   : > { %v3050_v7 = vunpack.c.l.s8.bf16 %v2578_v2  ;;  %v3058_v32 = vunpack.c.h.s8.bf16 %v2578_v2 }
 0x555   : > { %3623 = vmatpush1.bf16.msra.mxu0 %v2984_v6  ;;  %3787 = vmatpush1.bf16.msra.mxu1 %v2986_v8 }
 0x556   : > { %3624 = vmatprep.subr.bf16.mxu0 %v2993_v9  ;;  %3788 = vmatprep.subr.bf16.mxu1 %v2995_v15  ;;  %v7332_v15 = vsub.s32 %v3902_v45, %v7014_v0 }
 0x559   : > { %3625 = vmatpush1.bf16.msra.mxu0 %v2992_v19  ;;  %3789 = vmatpush1.bf16.msra.mxu1 %v2994_v43 }
 0x55a   : > { %3635 = vmatprep.subr.bf16.mxu0 %v3001_v20  ;;  %3799 = vmatprep.subr.bf16.mxu1 %v3003_v22  ;;  %v3048_v22 = vunpack.c.l.s8.bf16 %v2576_v26 }
 0x55c   : > { %3627 = vmatmul.mubr.bf16.vlgmr.msra.gmra.mrb[4].mxu0 %v7067_v41  ;;  %3791 = vmatmul.mubr.bf16.vlgmr.msra.gmra.mrb[4].mxu1 %v7067_v41  ;;  %v3018_v41 = vunpack.c.l.s8.bf16 %v2562_v33  ;;  %v3124_v33 = vld [vmem:[#allocation3] sm:$0xff] }
 0x55d   : > { %3636 = vmatpush1.bf16.msra.mxu0 %v3000_v46  ;;  %3800 = vmatpush1.bf16.msra.mxu1 %v3002_v24  ;;  %v3057_v24 = vunpack.c.h.s8.bf16 %v2577_v11  ;;  %v3089_v11 = vunpack.c.h.s8.bf16 %v2593_v44 }
 0x55e   : > { %3637 = vmatprep.subr.bf16.mxu0 %v3009_v25  ;;  %3801 = vmatprep.subr.bf16.mxu1 %v3011_v4  ;;  %v3059_v25 = vunpack.c.h.s8.bf16 %v2579_v57  ;;  %v3091_v57 = vunpack.c.h.s8.bf16 %v2595_v47 }
 0x55f   : > { %3667 = vmatprep.mubr.bf16.mxu0 %v7153_v50  ;;  %3831 = vmatprep.mubr.bf16.mxu1 %v7153_v50  ;;  %v3035_v50 = vunpack.c.l.s8.bf16 %v2571_v38 }
 0x561   : > { %3638 = vmatpush1.bf16.msra.mxu0 %v3008_v29  ;;  %3802 = vmatpush1.bf16.msra.mxu1 %v3010_v10  ;;  %v2587_v29 = vld [vmem:[%s6893_s22 + $0x738] sm:$0xff] }
 0x562   : > { %3639 = vmatprep.subr.bf16.mxu0 %v3017_v30  ;;  %3803 = vmatprep.subr.bf16.mxu1 %v3019_v31  ;;  %v3056_v31 = vunpack.c.h.s8.bf16 %v2576_v26 }
 0x565   : > { %3640 = vmatpush1.bf16.msra.mxu0 %v3016_v34  ;;  %3804 = vmatpush1.bf16.msra.mxu1 %v3018_v41  ;;  %v3065_v34 = vunpack.c.l.s8.bf16 %v2585_v14  ;;  %v3067_v41 = vunpack.c.l.s8.bf16 %v2587_v29 }
 0x566   : > { %3641 = vmatprep.subr.bf16.mxu0 %v3025_v35  ;;  %3805 = vmatprep.subr.bf16.mxu1 %v3027_v36  ;;  %v2584_v35 = vld [vmem:[%s6893_s22 + $0x720] sm:$0xff]  ;;  %v2586_v36 = vld [vmem:[%s6893_s22 + $0x730] sm:$0xff] }
 0x567   : > { %v3072_v16 = vunpack.c.h.s8.bf16 %v2584_v35  ;;  %v3074_v23 = vunpack.c.h.s8.bf16 %v2586_v36 }
 0x569   : > { %3642 = vmatpush1.bf16.msra.mxu0 %v3024_v39  ;;  %3806 = vmatpush1.bf16.msra.mxu1 %v3026_v28  ;;  %v3064_v39 = vunpack.c.l.s8.bf16 %v2584_v35  ;;  %v3066_v28 = vunpack.c.l.s8.bf16 %v2586_v36 }
 0x56a   : > { %3643 = vmatprep.subr.bf16.mxu0 %v3033_v40  ;;  %3807 = vmatprep.subr.bf16.mxu1 %v3035_v50  ;;  %v3073_v40 = vunpack.c.h.s8.bf16 %v2585_v14  ;;  %v3075_v50 = vunpack.c.h.s8.bf16 %v2587_v29  ;;  %v3872_v14 = vsub.s32 7, %v7014_v0 }
 0x56d   : > { %3644 = vmatpush1.bf16.msra.mxu0 %v3032_v51  ;;  %3808 = vmatpush1.bf16.msra.mxu1 %v3034_v52  ;;  %v3083_v51 = vunpack.c.l.s8.bf16 %v2595_v47  ;;  %v2592_v52 = vld [vmem:[%s6893_s22 + $0x760] sm:$0xff] }
 0x56e   : > { %3645 = vmatprep.subr.bf16.mxu0 %v3041_v42  ;;  %3809 = vmatprep.subr.bf16.mxu1 %v3043_v56  ;;  %v3080_v42 = vunpack.c.l.s8.bf16 %v2592_v52  ;;  %v3082_v56 = vunpack.c.l.s8.bf16 %v2594_v55  ;;  %v3088_v45 = vunpack.c.h.s8.bf16 %v2592_v52  ;;  %v5838_v52 = vld [vmem:[#allocation21 + $0x204] ss:$8 sps:$4 sm:$0xff] (!%p5389_p0)  }
 0x56f   : > { %v3341_v3 = vpop.f32.mrb[0].mxu0  ;;  %v3505_v5 = vpop.f32.mrb[0].mxu1 }
 0x570   : > { %v3882_v6 = vmul.f32 %v3845_v58, %v3341_v3  ;;  %v3884_v8 = vmul.f32 %v3853_v59, %v3505_v5  ;;  %v3343_v9 = vpop.f32.mrb[1].mxu0  ;;  %v3507_v17 = vpop.f32.mrb[1].mxu1  ;;  %v2601_v58 = vld [vmem:[%s6893_s22 + $0x7a8] sm:$0xff]  ;;  %v2603_v59 = vld [vmem:[%s6893_s22 + $0x7b8] sm:$0xff] }
 0x571   : > { %v3883_v18 = vmul.f32 %v3849_v60, %v3343_v9  ;;  %v3885_v19 = vmul.f32 %v3857_v13, %v3507_v17  ;;  %v3345_v43 = vpop.f32.mrb[2].mxu0  ;;  %v3509_v20 = vpop.f32.mrb[2].mxu1  ;;  %3646 = vmatpush1.bf16.msra.mxu0 %v3040_v61  ;;  %3810 = vmatpush1.bf16.msra.mxu1 %v3042_v62  ;;  %v3090_v60 = vunpack.c.h.s8.bf16 %v2594_v55  ;;  %v3097_v13 = vunpack.c.l.s8.bf16 %v2601_v58  ;;  %v2600_v62 = vld [vmem:[%s6893_s22 + $0x7a0] sm:$0xff]  ;;  %v2609_v5 = vld [vmem:[%s6893_s22 + $0x7e8] sm:$0xff]  ;;  %v5840_v55 = vld [vmem:[#allocation21] ss:$8 sps:$4 sm:$0xff] (!%p5389_p0)  }
 0x572   : > { %v3346_v21 = vpop.f32.mrb[3].mxu0  ;;  %v3510_v46 = vpop.f32.mrb[3].mxu1  ;;  %3647 = vmatprep.subr.bf16.mxu0 %v3049_v63  ;;  %3811 = vmatprep.subr.bf16.mxu1 %v3051_v1  ;;  %v3099_v61 = vunpack.c.l.s8.bf16 %v2603_v59  ;;  %v2602_v63 = vld [vmem:[%s6893_s22 + $0x7b0] sm:$0xff]  ;;  %v3096_v1 = vunpack.c.l.s8.bf16 %v2600_v62  ;;  %v3105_v2 = vunpack.c.h.s8.bf16 %v2601_v58  ;;  %v3107_v3 = vunpack.c.h.s8.bf16 %v2603_v59  ;;  %v5847_v58 = vld [vmem:[#allocation21 + $0x210] ss:$8 sps:$4 sm:$0xff] (!%p5389_p0)  }
 0x573   : > { %v3898_v4 = vcombine.low %v3882_v6, %v3883_v18  ;;  %v3899_v12 = vcombine.low %v3884_v8, %v3885_v19  ;;  %v3098_v26 = vunpack.c.l.s8.bf16 %v2602_v63  ;;  %v2611_v6 = vld [vmem:[%s6893_s22 + $0x7f8] sm:$0xff]  ;;  %v3104_v8 = vunpack.c.h.s8.bf16 %v2600_v62  ;;  %v2608_v19 = vld [vmem:[%s6893_s22 + $0x7e0] sm:$0xff]  ;;  %v2610_v43 = vld [vmem:[%s6893_s22 + $0x7f0] sm:$0xff] }
 0x574   : > { %v3106_v9 = vunpack.c.h.s8.bf16 %v2602_v63  ;;  %v3113_v17 = vunpack.c.l.s8.bf16 %v2609_v5  ;;  %v3115_v18 = vunpack.c.l.s8.bf16 %v2611_v6  ;;  %v3112_v20 = vunpack.c.l.s8.bf16 %v2608_v19  ;;  %v5848_v59 = vld [vmem:[#allocation21 + $0x24] ss:$8 sps:$4 sm:$0xff] (!%p5389_p0)   ;;  %v5856_v62 = vld [vmem:[#allocation21 + $0x234] ss:$8 sps:$4 sm:$0xff] (!%p5389_p0)   ;;  %v5858_v63 = vld [vmem:[#allocation21 + $0x30] ss:$8 sps:$4 sm:$0xff] (!%p5389_p0)  }
 0x575   : > { %v3906_v10 = vrot.slane %v3898_v4, %v7332_v15  ;;  %v3913_v30 = vrot.slane %v3899_v12, %v7332_v15  ;;  %3648 = vmatpush1.bf16.msra.mxu0 %v3048_v22  ;;  %3812 = vmatpush1.bf16.msra.mxu1 %v3050_v7  ;;  %v3114_v22 = vunpack.c.l.s8.bf16 %v2610_v43  ;;  %v3121_v7 = vunpack.c.h.s8.bf16 %v2609_v5  ;;  %v5865_v5 = vld [vmem:[#allocation21 + $0x240] ss:$8 sps:$4 sm:$0xff] (!%p5389_p0)  }
 0x576   : > { %3649 = vmatprep.subr.bf16.mxu0 %v3057_v24  ;;  %3813 = vmatprep.subr.bf16.mxu1 %v3059_v25  ;;  %v3123_v21 = vunpack.c.h.s8.bf16 %v2611_v6  ;;  %v3120_v46 = vunpack.c.h.s8.bf16 %v2608_v19  ;;  %v3122_v24 = vunpack.c.h.s8.bf16 %v2610_v43  ;;  %v3860_v25 = vsub.s32 4, %v7014_v0  ;;  %v5866_v6 = vld [vmem:[#allocation21 + $0x54] ss:$8 sps:$4 sm:$0xff] (!%p5389_p0)   ;;  %v5874_v19 = vld [vmem:[#allocation21 + $0x264] ss:$8 sps:$4 sm:$0xff] (!%p5389_p0)  }
 0x577   : > { %v3914_v37 = vcombine.low %v3906_v10, %v3913_v30  ;;  %v3868_v4 = vsub.s32 6, %v7014_v0  ;;  %v3864_v12 = vsub.s32 5, %v7014_v0  ;;  %v5876_v43 = vld [vmem:[#allocation21 + $0x60] ss:$8 sps:$4 sm:$0xff] (!%p5389_p0)  }
 0x578   : > { %v3861_v29 = vrot.slane %v7315_v53, %v3860_v25  ;;  %v5886_v25 = vld [vmem:[#allocation21 + $0x284] ss:$8 sps:$4 sm:$0xff] (!%p5389_p0)  }
 0x579   : > { %v3934_v38 = vadd.f32 %v3914_v37, %v3124_v33  ;;  %3650 = vmatpush1.bf16.msra.mxu0 %v3056_v31  ;;  %3814 = vmatpush1.bf16.msra.mxu1 %v3058_v32  ;;  %v3869_v10 = vrot.slane %v7315_v53, %v3868_v4  ;;  %v3865_v30 = vrot.slane %v7315_v53, %v3864_v12  ;;  %v5888_v4 = vld [vmem:[#allocation21 + $0x80] ss:$8 sps:$4 sm:$0xff] (!%p5389_p0)  }
 0x57a   : > { %3651 = vmatprep.subr.bf16.mxu0 %v3065_v34  ;;  %3815 = vmatprep.subr.bf16.mxu1 %v3067_v41  ;;  %v3873_v31 = vrot.slane %v7315_v53, %v3872_v14  ;;  %v5889_v12 = vld [vmem:[#allocation21 + $0x280] ss:$8 sps:$4 sm:$0xff] (!%p5389_p0)   ;;  %v5890_v14 = vld [vmem:[#allocation21 + $0x94] ss:$8 sps:$4 sm:$0xff] (!%p5389_p0)  }
 0x57b   : > { %3936 = vst [vmem:[#allocation3] sm:$0xff] %v3934_v38 }
 0x57d   : > { %3652 = vmatpush1.bf16.msra.mxu0 %v3064_v39  ;;  %3816 = vmatpush1.bf16.msra.mxu1 %v3066_v28 }
 0x57e   : > { %3653 = vmatprep.subr.bf16.mxu0 %v3073_v40  ;;  %3817 = vmatprep.subr.bf16.mxu1 %v3075_v50 }
 0x581   : > { %3654 = vmatpush1.bf16.msra.mxu0 %v3072_v16  ;;  %3818 = vmatpush1.bf16.msra.mxu1 %v3074_v23  ;;  %v3125_v23 = vld [vmem:[#allocation3 + $0x8] sm:$0xff] }
 0x582   : > { %3655 = vmatprep.subr.bf16.mxu0 %v3081_v49  ;;  %3819 = vmatprep.subr.bf16.mxu1 %v3083_v51  ;;  %v5836_v51 = vld [vmem:[#allocation21 + $0x4] ss:$8 sps:$4 sm:$0xff] (!%p5389_p0)  }
 0x585   : > { %3656 = vmatpush1.bf16.msra.mxu0 %v3080_v42  ;;  %3820 = vmatpush1.bf16.msra.mxu1 %v3082_v56  ;;  %v5841_v42 = vld [vmem:[#allocation21 + $0x200] ss:$8 sps:$4 sm:$0xff] (!%p5389_p0)   ;;  %v5842_v56 = vld [vmem:[#allocation21 + $0x14] ss:$8 sps:$4 sm:$0xff] (!%p5389_p0)  }
 0x586   : > { %3657 = vmatprep.subr.bf16.mxu0 %v3089_v11  ;;  %3821 = vmatprep.subr.bf16.mxu1 %v3091_v57  ;;  %v5844_v11 = vld [vmem:[#allocation21 + $0x214] ss:$8 sps:$4 sm:$0xff] (!%p5389_p0)   ;;  %v5846_v57 = vld [vmem:[#allocation21 + $0x10] ss:$8 sps:$4 sm:$0xff] (!%p5389_p0)  }
 0x589   : > { %3658 = vmatpush1.bf16.msra.mxu0 %v3088_v45  ;;  %3822 = vmatpush1.bf16.msra.mxu1 %v3090_v60  ;;  %v5850_v45 = vld [vmem:[#allocation21 + $0x224] ss:$8 sps:$4 sm:$0xff] (!%p5389_p0)   ;;  %v5852_v60 = vld [vmem:[#allocation21 + $0x20] ss:$8 sps:$4 sm:$0xff] (!%p5389_p0)  }
 0x58a   : > { %3659 = vmatprep.subr.bf16.mxu0 %v3097_v13  ;;  %3823 = vmatprep.subr.bf16.mxu1 %v3099_v61  ;;  %v5853_v13 = vld [vmem:[#allocation21 + $0x220] ss:$8 sps:$4 sm:$0xff] (!%p5389_p0)   ;;  %v5854_v61 = vld [vmem:[#allocation21 + $0x34] ss:$8 sps:$4 sm:$0xff] (!%p5389_p0)  }
 0x58d   : > { %3660 = vmatpush1.bf16.msra.mxu0 %v3096_v1  ;;  %3824 = vmatpush1.bf16.msra.mxu1 %v3098_v26  ;;  %v5859_v1 = vld [vmem:[#allocation21 + $0x230] ss:$8 sps:$4 sm:$0xff] (!%p5389_p0)   ;;  %v5860_v26 = vld [vmem:[#allocation21 + $0x44] ss:$8 sps:$4 sm:$0xff] (!%p5389_p0)  }
 0x58e   : > { %3661 = vmatprep.subr.bf16.mxu0 %v3105_v2  ;;  %3825 = vmatprep.subr.bf16.mxu1 %v3107_v3  ;;  %v5862_v2 = vld [vmem:[#allocation21 + $0x244] ss:$8 sps:$4 sm:$0xff] (!%p5389_p0)   ;;  %v5864_v3 = vld [vmem:[#allocation21 + $0x40] ss:$8 sps:$4 sm:$0xff] (!%p5389_p0)  }
 0x591   : > { %3662 = vmatpush1.bf16.msra.mxu0 %v3104_v8  ;;  %3826 = vmatpush1.bf16.msra.mxu1 %v3106_v9  ;;  %v5868_v8 = vld [vmem:[#allocation21 + $0x254] ss:$8 sps:$4 sm:$0xff] (!%p5389_p0)   ;;  %v5870_v9 = vld [vmem:[#allocation21 + $0x50] ss:$8 sps:$4 sm:$0xff] (!%p5389_p0)  }
 0x592   : > { %3663 = vmatprep.subr.bf16.mxu0 %v3113_v17  ;;  %3827 = vmatprep.subr.bf16.mxu1 %v3115_v18  ;;  %v5871_v17 = vld [vmem:[#allocation21 + $0x250] ss:$8 sps:$4 sm:$0xff] (!%p5389_p0)   ;;  %v5872_v18 = vld [vmem:[#allocation21 + $0x64] ss:$8 sps:$4 sm:$0xff] (!%p5389_p0)  }
 0x595   : > { %3664 = vmatpush1.bf16.msra.mxu0 %v3112_v20  ;;  %3828 = vmatpush1.bf16.msra.mxu1 %v3114_v22  ;;  %v5877_v20 = vld [vmem:[#allocation21 + $0x260] ss:$8 sps:$4 sm:$0xff] (!%p5389_p0)   ;;  %v5878_v22 = vld [vmem:[#allocation21 + $0x74] ss:$8 sps:$4 sm:$0xff] (!%p5389_p0)  }
 0x596   : > { %3665 = vmatprep.subr.bf16.mxu0 %v3121_v7  ;;  %3829 = vmatprep.subr.bf16.mxu1 %v3123_v21  ;;  %v5880_v7 = vld [vmem:[#allocation21 + $0x274] ss:$8 sps:$4 sm:$0xff] (!%p5389_p0)   ;;  %v5882_v21 = vld [vmem:[#allocation21 + $0x70] ss:$8 sps:$4 sm:$0xff] (!%p5389_p0)  }
 0x599   : > { %3666 = vmatpush1.bf16.msra.mxu0 %v3120_v46  ;;  %3830 = vmatpush1.bf16.msra.mxu1 %v3122_v24  ;;  %v5883_v46 = vld [vmem:[#allocation21 + $0x270] ss:$8 sps:$4 sm:$0xff] (!%p5389_p0)   ;;  %v5884_v24 = vld [vmem:[#allocation21 + $0x84] ss:$8 sps:$4 sm:$0xff] (!%p5389_p0)  }
 0x59a   : > { %4778 = vmatprep.subr.bf16.mxu1 (!%p5389_p0), %v5836_v51  ;;  %4860 = vmatprep.subr.bf16.mxu0 (!%p5389_p0), %v5838_v52  ;;  %v5916_v51 = vld [vmem:[#allocation21 + $0x2d4] ss:$8 sps:$4 sm:$0xff] (!%p5389_p0)  }
 0x59c   : > { %3668 = vmatmul.mubr.bf16.vlgmr.msra.gmra.mrb[4].mxu0 %v7191_v27  ;;  %3832 = vmatmul.mubr.bf16.vlgmr.msra.gmra.mrb[4].mxu1 %v7191_v27 }
 0x59d   : > { %4779 = vmatpush1.bf16.msra.mxu1 (!%p5389_p0), %v5840_v55  ;;  %4861 = vmatpush1.bf16.msra.mxu0 (!%p5389_p0), %v5841_v42 }
 0x59e   : > { %4780 = vmatprep.subr.bf16.mxu1 (!%p5389_p0), %v5842_v56  ;;  %4862 = vmatprep.subr.bf16.mxu0 (!%p5389_p0), %v5844_v11  ;;  %v5918_v56 = vld [vmem:[#allocation21 + $0xd0] ss:$8 sps:$4 sm:$0xff] (!%p5389_p0)  }
 0x59f   : > { %v5919_v11 = vld [vmem:[#allocation21 + $0x2d0] ss:$8 sps:$4 sm:$0xff] (!%p5389_p0)  }
 0x5a1   : > { %4781 = vmatpush1.bf16.msra.mxu1 (!%p5389_p0), %v5846_v57  ;;  %4863 = vmatpush1.bf16.msra.mxu0 (!%p5389_p0), %v5847_v58  ;;  %v5920_v57 = vld [vmem:[#allocation21 + $0xe4] ss:$8 sps:$4 sm:$0xff] (!%p5389_p0)  }
 0x5a2   : > { %4782 = vmatprep.subr.bf16.mxu1 (!%p5389_p0), %v5848_v59  ;;  %4864 = vmatprep.subr.bf16.mxu0 (!%p5389_p0), %v5850_v45  ;;  %v5922_v58 = vld [vmem:[#allocation21 + $0x2e4] ss:$8 sps:$4 sm:$0xff] (!%p5389_p0)  }
 0x5a5   : > { %4783 = vmatpush1.bf16.msra.mxu1 (!%p5389_p0), %v5852_v60  ;;  %4865 = vmatpush1.bf16.msra.mxu0 (!%p5389_p0), %v5853_v13  ;;  %v5924_v60 = vld [vmem:[#allocation21 + $0xe0] ss:$8 sps:$4 sm:$0xff] (!%p5389_p0)  }
 0x5a6   : > { %4784 = vmatprep.subr.bf16.mxu1 (!%p5389_p0), %v5854_v61  ;;  %4866 = vmatprep.subr.bf16.mxu0 (!%p5389_p0), %v5856_v62  ;;  %v5925_v13 = vld [vmem:[#allocation21 + $0x2e0] ss:$8 sps:$4 sm:$0xff] (!%p5389_p0)   ;;  %v5926_v61 = vld [vmem:[#allocation21 + $0xf4] ss:$8 sps:$4 sm:$0xff] (!%p5389_p0)  }
 0x5a7   : > { %v5928_v62 = vld [vmem:[#allocation21 + $0x2f4] ss:$8 sps:$4 sm:$0xff] (!%p5389_p0)  }
 0x5a9   : > { %4785 = vmatpush1.bf16.msra.mxu1 (!%p5389_p0), %v5858_v63  ;;  %4867 = vmatpush1.bf16.msra.mxu0 (!%p5389_p0), %v5859_v1 }
 0x5aa   : > { %4786 = vmatprep.subr.bf16.mxu1 (!%p5389_p0), %v5860_v26  ;;  %4868 = vmatprep.subr.bf16.mxu0 (!%p5389_p0), %v5862_v2  ;;  %v5930_v26 = vld [vmem:[#allocation21 + $0xf0] ss:$8 sps:$4 sm:$0xff] (!%p5389_p0)  }
 0x5ab   : > { %v5931_v2 = vld [vmem:[#allocation21 + $0x2f0] ss:$8 sps:$4 sm:$0xff] (!%p5389_p0)  }
 0x5ad   : > { %4787 = vmatpush1.bf16.msra.mxu1 (!%p5389_p0), %v5864_v3  ;;  %4869 = vmatpush1.bf16.msra.mxu0 (!%p5389_p0), %v5865_v5  ;;  %v5934_v3 = vld [vmem:[#allocation21 + $0x104] ss:$8 sps:$4 sm:$0xff] (!%p5389_p0)  }
 0x5ae   : > { %4788 = vmatprep.subr.bf16.mxu1 (!%p5389_p0), %v5866_v6  ;;  %4870 = vmatprep.subr.bf16.mxu0 (!%p5389_p0), %v5868_v8  ;;  %v5937_v5 = vld [vmem:[#allocation21 + $0x304] ss:$8 sps:$4 sm:$0xff] (!%p5389_p0)  }
 0x5b1   : > { %4789 = vmatpush1.bf16.msra.mxu1 (!%p5389_p0), %v5870_v9  ;;  %4871 = vmatpush1.bf16.msra.mxu0 (!%p5389_p0), %v5871_v17 }
 0x5b2   : > { %4790 = vmatprep.subr.bf16.mxu1 (!%p5389_p0), %v5872_v18  ;;  %4872 = vmatprep.subr.bf16.mxu0 (!%p5389_p0), %v5874_v19  ;;  %v5935_v18 = vld [vmem:[#allocation21 + $0x300] ss:$8 sps:$4 sm:$0xff] (!%p5389_p0)   ;;  %v5940_v19 = vld [vmem:[#allocation21 + $0x114] ss:$8 sps:$4 sm:$0xff] (!%p5389_p0)  }
 0x5b5   : > { %4791 = vmatpush1.bf16.msra.mxu1 (!%p5389_p0), %v5876_v43  ;;  %4873 = vmatpush1.bf16.msra.mxu0 (!%p5389_p0), %v5877_v20  ;;  %v5943_v43 = vld [vmem:[#allocation21 + $0x314] ss:$8 sps:$4 sm:$0xff] (!%p5389_p0)  }
 0x5b6   : > { %4792 = vmatprep.subr.bf16.mxu1 (!%p5389_p0), %v5878_v22  ;;  %4874 = vmatprep.subr.bf16.mxu0 (!%p5389_p0), %v5880_v7  ;;  %v5938_v7 = vld [vmem:[#allocation21 + $0x110] ss:$8 sps:$4 sm:$0xff] (!%p5389_p0)  }
 0x5b9   : > { %4793 = vmatpush1.bf16.msra.mxu1 (!%p5389_p0), %v5882_v21  ;;  %4875 = vmatpush1.bf16.msra.mxu0 (!%p5389_p0), %v5883_v46  ;;  %v5941_v21 = vld [vmem:[#allocation21 + $0x310] ss:$8 sps:$4 sm:$0xff] (!%p5389_p0)   ;;  %v5946_v46 = vld [vmem:[#allocation21 + $0x124] ss:$8 sps:$4 sm:$0xff] (!%p5389_p0)  }
 0x5ba   : > { %4794 = vmatprep.subr.bf16.mxu1 (!%p5389_p0), %v5884_v24  ;;  %4876 = vmatprep.subr.bf16.mxu0 (!%p5389_p0), %v5886_v25  ;;  %v5949_v24 = vld [vmem:[#allocation21 + $0x324] ss:$8 sps:$4 sm:$0xff] (!%p5389_p0)   ;;  %v5944_v25 = vld [vmem:[#allocation21 + $0x120] ss:$8 sps:$4 sm:$0xff] (!%p5389_p0)  }
 0x5bd   : > { %4795 = vmatpush1.bf16.msra.mxu1 (!%p5389_p0), %v5888_v4  ;;  %4877 = vmatpush1.bf16.msra.mxu0 (!%p5389_p0), %v5889_v12  ;;  %v5947_v4 = vld [vmem:[#allocation21 + $0x320] ss:$8 sps:$4 sm:$0xff] (!%p5389_p0)   ;;  %v5952_v12 = vld [vmem:[#allocation21 + $0x134] ss:$8 sps:$4 sm:$0xff] (!%p5389_p0)  }
 0x5be   : > { %4796 = vmatprep.subr.bf16.mxu1 (!%p5389_p0), %v5890_v14  ;;  %v5955_v14 = vld [vmem:[#allocation21 + $0x334] ss:$8 sps:$4 sm:$0xff] (!%p5389_p0)  }
 0x66f   : > { %v3669_v32 = vpop.f32.mrb[4].mxu0  ;;  %v3833_v33 = vpop.f32.mrb[4].mxu1 }
 0x670   : > { %v3886_v34 = vmul.f32 %v3861_v29, %v3669_v32  ;;  %v3888_v27 = vmul.f32 %v3869_v10, %v3833_v33  ;;  %v3671_v41 = vpop.f32.mrb[5].mxu0  ;;  %v3835_v35 = vpop.f32.mrb[5].mxu1  ;;  %v5892_v29 = vld [vmem:[#allocation21 + $0x294] ss:$8 sps:$4 sm:$0xff] (!%p5389_p0)   ;;  %v5894_v10 = vld [vmem:[#allocation21 + $0x90] ss:$8 sps:$4 sm:$0xff] (!%p5389_p0)  }
 0x671   : > { %v3887_v36 = vmul.f32 %v3865_v30, %v3671_v41  ;;  %v3889_v37 = vmul.f32 %v3873_v31, %v3835_v35  ;;  %v3673_v38 = vpop.f32.mrb[6].mxu0  ;;  %v3837_v39 = vpop.f32.mrb[6].mxu1  ;;  %v5895_v30 = vld [vmem:[#allocation21 + $0x290] ss:$8 sps:$4 sm:$0xff] (!%p5389_p0)   ;;  %v5896_v31 = vld [vmem:[#allocation21 + $0xa4] ss:$8 sps:$4 sm:$0xff] (!%p5389_p0)   ;;  %4878 = vmatprep.subr.bf16.mxu0 (!%p5389_p0), %v5892_v29  ;;  %4797 = vmatpush1.bf16.msra.mxu1 (!%p5389_p0), %v5894_v10 }
 0x672   : > { %v3674_v28 = vpop.f32.mrb[7].mxu0  ;;  %v3838_v40 = vpop.f32.mrb[7].mxu1  ;;  %v5898_v32 = vld [vmem:[#allocation21 + $0x2a4] ss:$8 sps:$4 sm:$0xff] (!%p5389_p0)   ;;  %v5900_v33 = vld [vmem:[#allocation21 + $0xa0] ss:$8 sps:$4 sm:$0xff] (!%p5389_p0)   ;;  %4879 = vmatpush1.bf16.msra.mxu0 (!%p5389_p0), %v5895_v30  ;;  %4798 = vmatprep.subr.bf16.mxu1 (!%p5389_p0), %v5896_v31 }
 0x673   : > { %v3915_v50 = vcombine.low %v3886_v34, %v3887_v36  ;;  %v3916_v44 = vcombine.low %v3888_v27, %v3889_v37  ;;  %v5901_v34 = vld [vmem:[#allocation21 + $0x2a0] ss:$8 sps:$4 sm:$0xff] (!%p5389_p0)   ;;  %v5902_v27 = vld [vmem:[#allocation21 + $0xb4] ss:$8 sps:$4 sm:$0xff] (!%p5389_p0)   ;;  %4880 = vmatprep.subr.bf16.mxu0 (!%p5389_p0), %v5898_v32  ;;  %v5906_v36 = vld [vmem:[#allocation21 + $0xb0] ss:$8 sps:$4 sm:$0xff] (!%p5389_p0)  }
 0x674   : > { %v5904_v41 = vld [vmem:[#allocation21 + $0x2b4] ss:$8 sps:$4 sm:$0xff] (!%p5389_p0)   ;;  %v3942_v35 = vld [vmem:[#allocation3] sm:$0xff] (!%p5389_p0) }
 0x675   : > { %v3923_v47 = vrot.slane %v3915_v50, %v7332_v15  ;;  %v3930_v16 = vrot.slane %v3916_v44, %v7332_v15  ;;  %3941 = sbr.rel (%p5389_p0) target bundleno = 2178 (0x882), region = 132  ;;  %v3944_v37 = vmax.f32 (!%p5389_p0), %v3942_v35, 0.0  ;;  %4799 = vmatpush1.bf16.msra.mxu1 (!%p5389_p0), %v5900_v33  ;;  %v5907_v38 = vld [vmem:[#allocation21 + $0x2b0] ss:$8 sps:$4 sm:$0xff] (!%p5389_p0)   ;;  %v5908_v28 = vld [vmem:[#allocation21 + $0xc4] ss:$8 sps:$4 sm:$0xff] (!%p5389_p0)  }
 0x676   : > { %4881 = vmatpush1.bf16.msra.mxu0 (!%p5389_p0), %v5901_v34  ;;  %4800 = vmatprep.subr.bf16.mxu1 (!%p5389_p0), %v5902_v27  ;;  %v5910_v40 = vld [vmem:[#allocation21 + $0x2c4] ss:$8 sps:$4 sm:$0xff] (!%p5389_p0)   ;;  %v5950_v29 = vld [vmem:[#allocation21 + $0x130] ss:$8 sps:$4 sm:$0xff] (!%p5389_p0)   ;;  %v5956_v32 = vld [vmem:[#allocation21 + $0x140] ss:$8 sps:$4 sm:$0xff] (!%p5389_p0)  }
 0x677   : > { %v3931_v53 = vcombine.low %v3923_v47, %v3930_v16  ;;  %4882 = vmatprep.subr.bf16.mxu0 (!%p5389_p0), %v5904_v41  ;;  %v3955_v50 = vrot.slane (!%p5389_p0), %v3944_v37, %v7332_v15  ;;  %v3948_v59 = vcombine.high (!%p5389_p0), %v3944_v37, %v3944_v37  ;;  %v5953_v10 = vld [vmem:[#allocation21 + $0x330] ss:$8 sps:$4 sm:$0xff] (!%p5389_p0)   ;;  %v5958_v30 = vld [vmem:[#allocation21 + $0x144] ss:$8 sps:$4 sm:$0xff] (!%p5389_p0)   ;;  %v5959_v33 = vld [vmem:[#allocation21 + $0x340] ss:$8 sps:$4 sm:$0xff] (!%p5389_p0)  }
 0x678   : > { %v5961_v31 = vld [vmem:[#allocation21 + $0x344] ss:$8 sps:$4 sm:$0xff] (!%p5389_p0)   ;;  %v5964_v34 = vld [vmem:[#allocation21 + $0x154] ss:$8 sps:$4 sm:$0xff] (!%p5389_p0)   ;;  %v5962_v41 = vld [vmem:[#allocation21 + $0x150] ss:$8 sps:$4 sm:$0xff] (!%p5389_p0)  }
 0x679   : > { %v3935_v49 = vadd.f32 %v3931_v53, %v3125_v23  ;;  %v3963_v47 = vcombine.high (!%p5389_p0), %v3955_v50, %v3955_v50  ;;  %4801 = vmatpush1.bf16.msra.mxu1 (!%p5389_p0), %v5906_v36  ;;  %v5912_v23 = vld [vmem:[#allocation21 + $0xc0] ss:$8 sps:$4 sm:$0xff] (!%p5389_p0)   ;;  %v7368_v63 = vrot.slane (!%p5389_p0), %v3948_v59, %v7332_v15  ;;  %v3990_v9 = vpack.c.bf16 (!%p5389_p0), %v3955_v50, %v3955_v50  ;;  %v5967_v27 = vld [vmem:[#allocation21 + $0x354] ss:$8 sps:$4 sm:$0xff] (!%p5389_p0)   ;;  %v5965_v35 = vld [vmem:[#allocation21 + $0x350] ss:$8 sps:$4 sm:$0xff] (!%p5389_p0)  }
 0x67a   : > { %4883 = vmatpush1.bf16.msra.mxu0 (!%p5389_p0), %v5907_v38  ;;  %v5913_v53 = vld [vmem:[#allocation21 + $0x2c0] ss:$8 sps:$4 sm:$0xff] (!%p5389_p0)   ;;  %4802 = vmatprep.subr.bf16.mxu1 (!%p5389_p0), %v5908_v28  ;;  %v5970_v36 = vld [vmem:[#allocation21 + $0x164] ss:$8 sps:$4 sm:$0xff] (!%p5389_p0)   ;;  %v5976_v28 = vld [vmem:[#allocation21 + $0x174] ss:$8 sps:$4 sm:$0xff] (!%p5389_p0)  }
 0x67b   : > { %3937 = vst [vmem:[#allocation3 + $0x8] sm:$0xff] %v3935_v49  ;;  %4884 = vmatprep.subr.bf16.mxu0 (!%p5389_p0), %v5910_v40  ;;  %v5914_v49 = vld [vmem:[#allocation21 + $0xd4] ss:$8 sps:$4 sm:$0xff] (!%p5389_p0)   ;;  %v3991_v52 = vpack.c.bf16 (!%p5389_p0), %v3963_v47, %v3963_v47  ;;  %v3964_v6 = vcombine.high (!%p5389_p0), %v7368_v63, %v7368_v63  ;;  %v5973_v37 = vld [vmem:[#allocation21 + $0x364] ss:$8 sps:$4 sm:$0xff] (!%p5389_p0)  }
 0x67c   : > { %v5968_v38 = vld [vmem:[#allocation21 + $0x160] ss:$8 sps:$4 sm:$0xff]   ;;  %v5979_v40 = vld [vmem:[#allocation21 + $0x374] ss:$8 sps:$4 sm:$0xff]   ;;  %v5974_v50 = vld [vmem:[#allocation21 + $0x170] ss:$8 sps:$4 sm:$0xff]  }
 0x67d   : > { %4810 = vmatprep.mubr.bf16.mxu1 %v3991_v52  ;;  %4803 = vmatpush1.bf16.msra.mxu1 %v5912_v23  ;;  %v3993_v20 = vpack.c.bf16 %v3964_v6, %v3964_v6  ;;  %v5982_v47 = vld [vmem:[#allocation21 + $0x184] ss:$8 sps:$4 sm:$0xff]   ;;  %v5980_v23 = vld [vmem:[#allocation21 + $0x180] ss:$8 sps:$4 sm:$0xff]   ;;  %v5986_v52 = vld [vmem:[#allocation21 + $0x190] ss:$8 sps:$4 sm:$0xff]  }
 0x67e   : > { %4885 = vmatpush1.bf16.msra.mxu0 %v5913_v53  ;;  %4804 = vmatprep.subr.bf16.mxu1 %v5914_v49  ;;  %v5983_v53 = vld [vmem:[#allocation21 + $0x380] ss:$8 sps:$4 sm:$0xff]   ;;  %v5988_v49 = vld [vmem:[#allocation21 + $0x194] ss:$8 sps:$4 sm:$0xff]   ;;  %v6013_v6 = vld [vmem:[#allocation21 + $0x3d0] ss:$8 sps:$4 sm:$0xff]  }
 0x67f   : > { %4886 = vmatprep.subr.bf16.mxu0 %v5916_v51  ;;  %v5991_v51 = vld [vmem:[#allocation21 + $0x394] ss:$8 sps:$4 sm:$0xff]  }
 0x680   : > { %v6003_v59 = vld [vmem:[#allocation21 + $0x3b4] ss:$8 sps:$4 sm:$0xff]  }
 0x681   : > { %4805 = vmatpush1.bf16.msra.mxu1 %v5918_v56  ;;  %v5997_v56 = vld [vmem:[#allocation21 + $0x3a4] ss:$8 sps:$4 sm:$0xff]  }
 0x682   : > { %v3943_v39 = vld [vmem:[#allocation3 + $0x8] sm:$0xff]  ;;  %4887 = vmatpush1.bf16.msra.mxu0 %v5919_v11  ;;  %4806 = vmatprep.subr.bf16.mxu1 %v5920_v57  ;;  %v5992_v11 = vld [vmem:[#allocation21 + $0x1a0] ss:$8 sps:$4 sm:$0xff]  }
 0x683   : > { %v3945_v44 = vmax.f32 %v3943_v39, 0.0  ;;  %4888 = vmatprep.subr.bf16.mxu0 %v5922_v58  ;;  %v5971_v39 = vld [vmem:[#allocation21 + $0x360] ss:$8 sps:$4 sm:$0xff]   ;;  %v6000_v58 = vld [vmem:[#allocation21 + $0x1b4] ss:$8 sps:$4 sm:$0xff]  }
 0x684   : > { %v5995_v57 = vld [vmem:[#allocation21 + $0x3a0] ss:$8 sps:$4 sm:$0xff]  }
 0x685   : > { %v3972_v16 = vrot.slane %v3945_v44, %v7332_v15  ;;  %v3965_v45 = vcombine.high %v3945_v44, %v3945_v44  ;;  %4807 = vmatpush1.bf16.msra.mxu1 %v5924_v60  ;;  %v5977_v44 = vld [vmem:[#allocation21 + $0x370] ss:$8 sps:$4 sm:$0xff]  }
 0x686   : > { %4889 = vmatpush1.bf16.msra.mxu0 %v5925_v13  ;;  %4808 = vmatprep.subr.bf16.mxu1 %v5926_v61  ;;  %v6001_v60 = vld [vmem:[#allocation21 + $0x3b0] ss:$8 sps:$4 sm:$0xff]   ;;  %v6006_v13 = vld [vmem:[#allocation21 + $0x1c4] ss:$8 sps:$4 sm:$0xff]  }
 0x687   : > { %v3980_v55 = vcombine.high %v3972_v16, %v3972_v16  ;;  %v7371_v1 = vrot.slane %v3965_v45, %v7332_v15  ;;  %4890 = vmatprep.subr.bf16.mxu0 %v5928_v62  ;;  %v3994_v17 = vpack.c.bf16 %v3972_v16, %v3972_v16  ;;  %v5932_v15 = vld [vmem:[#allocation21 + $0x100] ss:$8 sps:$4 sm:$0xff]   ;;  %v5985_v16 = vld [vmem:[#allocation21 + $0x384] ss:$8 sps:$4 sm:$0xff]   ;;  %v5998_v45 = vld [vmem:[#allocation21 + $0x1b0] ss:$8 sps:$4 sm:$0xff]  }
 0x688   : > { %v6009_v61 = vld [vmem:[#allocation21 + $0x3c4] ss:$8 sps:$4 sm:$0xff]   ;;  %v6004_v62 = vld [vmem:[#allocation21 + $0x1c0] ss:$8 sps:$4 sm:$0xff]  }
 0x689   : > { %v3995_v42 = vpack.c.bf16 %v3980_v55, %v3980_v55  ;;  %v3981_v8 = vcombine.high %v7371_v1, %v7371_v1  ;;  %4809 = vmatpush1.bf16.msra.mxu1 %v5930_v26  ;;  %v5989_v55 = vld [vmem:[#allocation21 + $0x390] ss:$8 sps:$4 sm:$0xff]   ;;  %v6007_v26 = vld [vmem:[#allocation21 + $0x3c0] ss:$8 sps:$4 sm:$0xff]  }
 0x68a   : > { %4891 = vmatpush1.bf16.msra.mxu0 %v5931_v2  ;;  %4819 = vmatprep.subr.bf16.mxu1 %v5934_v3  ;;  %v6012_v2 = vld [vmem:[#allocation21 + $0x1d4] ss:$8 sps:$4 sm:$0xff]  }
 0x68b   : > { %4892 = vmatprep.mubr.bf16.mxu0 %v3995_v42  ;;  %4901 = vmatprep.subr.bf16.mxu0 %v5937_v5  ;;  %v3997_v22 = vpack.c.bf16 %v3981_v8, %v3981_v8  ;;  %v5994_v42 = vld [vmem:[#allocation21 + $0x1a4] ss:$8 sps:$4 sm:$0xff]   ;;  %v6015_v3 = vld [vmem:[#allocation21 + $0x3d4] ss:$8 sps:$4 sm:$0xff]   ;;  %v6010_v5 = vld [vmem:[#allocation21 + $0x1d0] ss:$8 sps:$4 sm:$0xff]  }
 0x68c   : > { %4811 = vmatmul.mubr.bf16.vlgmr.msra.gmra.mrb[0].mxu1 %v3990_v9  ;;  %v6018_v8 = vld [vmem:[#allocation21 + $0x1e4] ss:$8 sps:$4 sm:$0xff]  }
 0x68d   : > { %4893 = vmatmul.mubr.bf16.vlgmr.msra.gmra.mrb[0].mxu0 %v3994_v17  ;;  %4820 = vmatpush1.bf16.msra.mxu1 %v5932_v15  ;;  %v6021_v9 = vld [vmem:[#allocation21 + $0x3e4] ss:$8 sps:$4 sm:$0xff]   ;;  %v6016_v17 = vld [vmem:[#allocation21 + $0x1e0] ss:$8 sps:$4 sm:$0xff]  }
 0x68e   : > { %4902 = vmatpush1.bf16.msra.mxu0 %v5935_v18  ;;  %4821 = vmatprep.subr.bf16.mxu1 %v5940_v19  ;;  %v6019_v15 = vld [vmem:[#allocation21 + $0x3e0] ss:$8 sps:$4 sm:$0xff]   ;;  %v6024_v18 = vld [vmem:[#allocation21 + $0x1f4] ss:$8 sps:$4 sm:$0xff]  }
 0x68f   : > { %4903 = vmatprep.subr.bf16.mxu0 %v5943_v43  ;;  %4851 = vmatprep.mubr.bf16.mxu1 %v3993_v20  ;;  %v6027_v19 = vld [vmem:[#allocation21 + $0x3f4] ss:$8 sps:$4 sm:$0xff]   ;;  %v4961_v20 = vld [vmem:[%s7551_s28 + $0x88] sm:$0xff] }
 0x690   : > { %4933 = vmatprep.mubr.bf16.mxu0 %v3997_v22  ;;  %v4960_v43 = vld [vmem:[%s7551_s28 + $0x80] sm:$0xff] }
 0x691   : > { %4822 = vmatpush1.bf16.msra.mxu1 %v5938_v7  ;;  %v6022_v22 = vld [vmem:[#allocation21 + $0x1f0] ss:$8 sps:$4 sm:$0xff]  }
 0x692   : > { %4904 = vmatpush1.bf16.msra.mxu0 %v5941_v21  ;;  %4823 = vmatprep.subr.bf16.mxu1 %v5946_v46  ;;  %v6025_v7 = vld [vmem:[#allocation21 + $0x3f0] ss:$8 sps:$4 sm:$0xff]   ;;  %v5575_v21 = vpack.c.bf16 %v4961_v20, %v4960_v43 }
 0x693   : > { %4905 = vmatprep.subr.bf16.mxu0 %v5949_v24  ;;  %v4944_v46 = vld [vmem:[%s7551_s28] sm:$0xff]  ;;  %v4945_v24 = vld [vmem:[%s7551_s28 + $0x8] sm:$0xff] }
 0x695   : > { %4824 = vmatpush1.bf16.msra.mxu1 %v5944_v25  ;;  %v4962_v25 = vld [vmem:[%s7551_s28 + $0x90] sm:$0xff] }
 0x696   : > { %4906 = vmatpush1.bf16.msra.mxu0 %v5947_v4  ;;  %4825 = vmatprep.subr.bf16.mxu1 %v5952_v12  ;;  %v4963_v4 = vld [vmem:[%s7551_s28 + $0x98] sm:$0xff]  ;;  %v3992_v12 = vpack.c.bf16 %v7368_v63, %v7368_v63  ;;  %v4964_v63 = vld [vmem:[%s7551_s28 + $0xa0] sm:$0xff] }
 0x697   : > { %4907 = vmatprep.subr.bf16.mxu0 %v5955_v14  ;;  %v3996_v14 = vpack.c.bf16 %v7371_v1, %v7371_v1  ;;  %v4965_v1 = vld [vmem:[%s7551_s28 + $0xa8] sm:$0xff] }
 0x699   : > { %4826 = vmatpush1.bf16.msra.mxu1 %v5950_v29  ;;  %v5577_v29 = vpack.c.bf16 %v4945_v24, %v4944_v46 }
 0x69a   : > { %4908 = vmatpush1.bf16.msra.mxu0 %v5953_v10  ;;  %4827 = vmatprep.subr.bf16.mxu1 %v5958_v30  ;;  %v5579_v10 = vpack.c.bf16 %v4963_v4, %v4962_v25  ;;  %v4946_v30 = vld [vmem:[%s7551_s28 + $0x10] sm:$0xff]  ;;  %v5518_v4 = vld [vmem:[#allocation4] ss:$0 sm:$0xff] }
 0x69b   : > { %4909 = vmatprep.subr.bf16.mxu0 %v5961_v31  ;;  %v4947_v31 = vld [vmem:[%s7551_s28 + $0x18] sm:$0xff] }
 0x69d   : > { %4828 = vmatpush1.bf16.msra.mxu1 %v5956_v32  ;;  %v5581_v32 = vpack.c.bf16 %v4947_v31, %v4946_v30 }
 0x69e   : > { %4910 = vmatpush1.bf16.msra.mxu0 %v5959_v33  ;;  %4829 = vmatprep.subr.bf16.mxu1 %v5964_v34  ;;  %v5583_v33 = vpack.c.bf16 %v4965_v1, %v4964_v63  ;;  %v4948_v34 = vld [vmem:[%s7551_s28 + $0x20] sm:$0xff] }
 0x69f   : > { %4911 = vmatprep.subr.bf16.mxu0 %v5967_v27  ;;  %v4949_v27 = vld [vmem:[%s7551_s28 + $0x28] sm:$0xff] }
 0x6a1   : > { %4830 = vmatpush1.bf16.msra.mxu1 %v5962_v41  ;;  %v4966_v41 = vld [vmem:[%s7551_s28 + $0xb0] sm:$0xff] }
 0x6a2   : > { %4912 = vmatpush1.bf16.msra.mxu0 %v5965_v35  ;;  %4831 = vmatprep.subr.bf16.mxu1 %v5970_v36  ;;  %v4967_v35 = vld [vmem:[%s7551_s28 + $0xb8] sm:$0xff]  ;;  %v5585_v36 = vpack.c.bf16 %v4949_v27, %v4948_v34 }
 0x6a3   : > { %4913 = vmatprep.subr.bf16.mxu0 %v5973_v37  ;;  %v5587_v37 = vpack.c.bf16 %v4967_v35, %v4966_v41 }
 0x6a5   : > { %4832 = vmatpush1.bf16.msra.mxu1 %v5968_v38  ;;  %v4950_v38 = vld [vmem:[%s7551_s28 + $0x30] sm:$0xff] }
 0x6a6   : > { %4914 = vmatpush1.bf16.msra.mxu0 %v5971_v39  ;;  %4833 = vmatprep.subr.bf16.mxu1 %v5976_v28  ;;  %v4951_v39 = vld [vmem:[%s7551_s28 + $0x38] sm:$0xff]  ;;  %v4968_v28 = vld [vmem:[%s7551_s28 + $0xc0] sm:$0xff] }
 0x6a7   : > { %4915 = vmatprep.subr.bf16.mxu0 %v5979_v40  ;;  %v4969_v40 = vld [vmem:[%s7551_s28 + $0xc8] sm:$0xff] }
 0x6a9   : > { %4834 = vmatpush1.bf16.msra.mxu1 %v5974_v50  ;;  %v5589_v50 = vpack.c.bf16 %v4951_v39, %v4950_v38 }
 0x6aa   : > { %4916 = vmatpush1.bf16.msra.mxu0 %v5977_v44  ;;  %4835 = vmatprep.subr.bf16.mxu1 %v5982_v47  ;;  %v5591_v44 = vpack.c.bf16 %v4969_v40, %v4968_v28  ;;  %v4952_v47 = vld [vmem:[%s7551_s28 + $0x40] sm:$0xff] }
 0x6ab   : > { %4917 = vmatprep.subr.bf16.mxu0 %v5985_v16  ;;  %v4953_v16 = vld [vmem:[%s7551_s28 + $0x48] sm:$0xff] }
 0x6ad   : > { %4836 = vmatpush1.bf16.msra.mxu1 %v5980_v23  ;;  %v4970_v23 = vld [vmem:[%s7551_s28 + $0xd0] sm:$0xff] }
 0x6ae   : > { %4918 = vmatpush1.bf16.msra.mxu0 %v5983_v53  ;;  %4837 = vmatprep.subr.bf16.mxu1 %v5988_v49  ;;  %v4971_v53 = vld [vmem:[%s7551_s28 + $0xd8] sm:$0xff]  ;;  %v5593_v49 = vpack.c.bf16 %v4953_v16, %v4952_v47 }
 0x6af   : > { %4919 = vmatprep.subr.bf16.mxu0 %v5991_v51  ;;  %v5595_v51 = vpack.c.bf16 %v4971_v53, %v4970_v23 }
 0x6b1   : > { %4838 = vmatpush1.bf16.msra.mxu1 %v5986_v52  ;;  %v4954_v52 = vld [vmem:[%s7551_s28 + $0x50] sm:$0xff] }
 0x6b2   : > { %4920 = vmatpush1.bf16.msra.mxu0 %v5989_v55  ;;  %4839 = vmatprep.subr.bf16.mxu1 %v5994_v42  ;;  %v4955_v55 = vld [vmem:[%s7551_s28 + $0x58] sm:$0xff] }
 0x6b3   : > { %4921 = vmatprep.subr.bf16.mxu0 %v5997_v56  ;;  %v5597_v42 = vpack.c.bf16 %v4955_v55, %v4954_v52  ;;  %v4972_v56 = vld [vmem:[%s7551_s28 + $0xe0] sm:$0xff] }
 0x6b5   : > { %4840 = vmatpush1.bf16.msra.mxu1 %v5992_v11  ;;  %v4973_v11 = vld [vmem:[%s7551_s28 + $0xe8] sm:$0xff] }
 0x6b6   : > { %4922 = vmatpush1.bf16.msra.mxu0 %v5995_v57  ;;  %4841 = vmatprep.subr.bf16.mxu1 %v6000_v58  ;;  %v5599_v57 = vpack.c.bf16 %v4973_v11, %v4972_v56  ;;  %v4956_v58 = vld [vmem:[%s7551_s28 + $0x60] sm:$0xff] }
 0x6b7   : > { %4923 = vmatprep.subr.bf16.mxu0 %v6003_v59  ;;  %v4957_v59 = vld [vmem:[%s7551_s28 + $0x68] sm:$0xff] }
 0x6b9   : > { %4842 = vmatpush1.bf16.msra.mxu1 %v5998_v45  ;;  %v5601_v45 = vpack.c.bf16 %v4957_v59, %v4956_v58 }
 0x6ba   : > { %4924 = vmatpush1.bf16.msra.mxu0 %v6001_v60  ;;  %4843 = vmatprep.subr.bf16.mxu1 %v6006_v13  ;;  %v4974_v60 = vld [vmem:[%s7551_s28 + $0xf0] sm:$0xff]  ;;  %v4975_v13 = vld [vmem:[%s7551_s28 + $0xf8] sm:$0xff] }
 0x6bb   : > { %4925 = vmatprep.subr.bf16.mxu0 %v6009_v61  ;;  %v5603_v61 = vpack.c.bf16 %v4975_v13, %v4974_v60 }
 0x6bd   : > { %4844 = vmatpush1.bf16.msra.mxu1 %v6004_v62  ;;  %v4958_v62 = vld [vmem:[%s7551_s28 + $0x70] sm:$0xff] }
 0x6be   : > { %4926 = vmatpush1.bf16.msra.mxu0 %v6007_v26  ;;  %4845 = vmatprep.subr.bf16.mxu1 %v6012_v2  ;;  %v4959_v26 = vld [vmem:[%s7551_s28 + $0x78] sm:$0xff] }
 0x6bf   : > { %4927 = vmatprep.subr.bf16.mxu0 %v6015_v3  ;;  %v5605_v2 = vpack.c.bf16 %v4959_v26, %v4958_v62  ;;  %v4126_v3 = vld [vmem:[#allocation22] sm:$0x3] }
 0x6c1   : > { %4846 = vmatpush1.bf16.msra.mxu1 %v6010_v5  ;;  %v4131_v5 = vrot.slane %v4126_v3, %v3844_v48 }
 0x6c2   : > { %4928 = vmatpush1.bf16.msra.mxu0 %v6013_v6  ;;  %4847 = vmatprep.subr.bf16.mxu1 %v6018_v8  ;;  %v4135_v6 = vrot.slane %v4126_v3, %v3848_v54 }
 0x6c3   : > { %4929 = vmatprep.subr.bf16.mxu0 %v6021_v9 }
 0x6c5   : > { %4848 = vmatpush1.bf16.msra.mxu1 %v6016_v17 }
 0x6c6   : > { %4930 = vmatpush1.bf16.msra.mxu0 %v6019_v15  ;;  %4849 = vmatprep.subr.bf16.mxu1 %v6024_v18 }
 0x6c7   : > { %4931 = vmatprep.subr.bf16.mxu0 %v6027_v19 }
 0x6c9   : > { %4850 = vmatpush1.bf16.msra.mxu1 %v6022_v22 }
 0x6ca   : > { %4932 = vmatpush1.bf16.msra.mxu0 %v6025_v7  ;;  %5576 = vmatprep.subr.bf16.mxu1 %v5575_v21 }
 0x6cc   : > { %4852 = vmatmul.mubr.bf16.vlgmr.msra.gmra.mrb[0].mxu1 %v3992_v12 }
 0x6cd   : > { %4934 = vmatmul.mubr.bf16.vlgmr.msra.gmra.mrb[0].mxu0 %v3996_v14  ;;  %5578 = vmatpush3.bf16.msra.mxu1 %v5577_v29 }
 0x6ce   : > { %5580 = vmatprep.subr.bf16.mxu1 %v5579_v10 }
 0x6d1   : > { %5582 = vmatpush3.bf16.msra.mxu1 %v5581_v32 }
 0x6d2   : > { %5584 = vmatprep.subr.bf16.mxu1 %v5583_v33 }
 0x6d5   : > { %5586 = vmatpush3.bf16.msra.mxu1 %v5585_v36 }
 0x6d6   : > { %5588 = vmatprep.subr.bf16.mxu1 %v5587_v37 }
 0x6d9   : > { %5590 = vmatpush3.bf16.msra.mxu1 %v5589_v50 }
 0x6da   : > { %5592 = vmatprep.subr.bf16.mxu1 %v5591_v44 }
 0x6dd   : > { %5594 = vmatpush3.bf16.msra.mxu1 %v5593_v49 }
 0x6de   : > { %5596 = vmatprep.subr.bf16.mxu1 %v5595_v51 }
 0x6e1   : > { %5598 = vmatpush3.bf16.msra.mxu1 %v5597_v42 }
 0x6e2   : > { %5600 = vmatprep.subr.bf16.mxu1 %v5599_v57 }
 0x6e5   : > { %5602 = vmatpush3.bf16.msra.mxu1 %v5601_v45 }
 0x6e6   : > { %5604 = vmatprep.subr.bf16.mxu1 %v5603_v61 }
 0x6e9   : > { %5606 = vmatpush3.bf16.msra.mxu1 %v5605_v2 }
 0x79f   : > { %v4853_v8 = vpop.f32.mrb[0].mxu1 }
 0x7a0   : > { %v4935_v9 = vpop.f32.mrb[0].mxu0  ;;  %v5655_v17 = vadd.f32 %v4853_v8, %v4131_v5  ;;  %v4855_v15 = vpop.f32.mrb[1].mxu1 }
 0x7a1   : > { %v4937_v18 = vpop.f32.mrb[1].mxu0  ;;  %v5657_v19 = vadd.f32 %v4855_v15, %v4135_v6  ;;  %v4857_v43 = vpop.f32.mrb[2].mxu1 }
 0x7a2   : > { %v4939_v20 = vpop.f32.mrb[2].mxu0  ;;  %v5656_v22 = vadd.f32 %v5655_v17, %v4935_v9  ;;  %v4858_v7 = vpop.f32.mrb[3].mxu1 }
 0x7a3   : > { %v4940_v21 = vpop.f32.mrb[3].mxu0  ;;  %v5658_v46 = vadd.f32 %v5657_v19, %v4937_v18 }
 0x7a4   : > { %v4942_v25 = vmax.f32 %v5656_v22, 0.0 }
 0x7a5   : > { %v4943_v24 = vmax.f32 %v5658_v46, 0.0 }
 0x7a7   : > { %5047 = vmatprep.mubr.f32.mxu1 %v4943_v24 }
 0x7a8   : > { %5048 = vmatmul.mubr.f32.vlgmr.msra.gmra.mrb[4].mxu1 %v4942_v25 }
 0x87b   : > { %v5560_v48 = vpop.f32.mrb[4].mxu1 }
 0x87c   : > { %v5561_v0 = vpop.f32.mrb[5].mxu1 }
 0x87d   : > { %v5562_v54 = vadd.f32 %v5561_v0, %v5560_v48 }
 0x87f   : > { %v5050_v12 = vadd.f32 %v5562_v54, %v5518_v4 }
 0x881   : > { %5054 = vst.msk [vmem:[%s7552_s7] sm:$0x3] %vm5053_vm3, %v5050_v12 }
 0x882 PF: > { %p32_p1 = scmp.ge.s32.totalorder %s6808_s24, 4   ;;  %s7553_s15 = smov %s6420_s16 }
 0x883   : > { %s7554_s16 = smov %s6424_s17  ;;  %s7555_s17 = smov %s6820_s29 }
 0x884   : > { %s7556_s18 = smov %s6808_s24  ;;  %34 = sbr.rel (!%p32_p1) target bundleno = 14 (0xe), region = 166 }
 0x88b   :  { %5066 = vsyncpa [#allocation6], 1 }
 0x88c   :  { %5068 = vsyncpa [#allocation6 + $0x1], 1 }
 0x88d   :  { %5069 = vsyncpa [#allocation8], 1 }
 0x88e   :  { %5070 = vsyncpa [#allocation11], 1 }
 0x88f   :  { %5071 = vsyncpa [#allocation14], 1 }
 0x890   :  { %5072 = vsyncpa [#allocation17], 1 }
 0x891   :  { %5074 = vsyncpa [#allocation17 + $0x1], 1 }
 0x892   :  { %5075 = vsyncpa [#allocation20], 1 }
 0x893   :  { %5076 = vsyncpa [#allocation23], 1 }

</bundles_post_ra>
